<compile_context>
chip_gen: v7x
topology: tpu7x:2x2x1
jax: 0.10.0
libtpu: 0.0.40
codegen_flags: <defaults>
</compile_context>

<pallas_src>
import functools

import jax
import jax.numpy as jnp
from jax import lax
from jax.experimental import pallas as pl
from jax.experimental.pallas import tpu as pltpu


def _resblock_tile_kernel(xw_ref, w1_ref, b1_ref, w2_ref, b2_ref,
                          y_ref, patch_ref, r1p_ref, *, TH, H, W, C):
    """One (batch, row-tile) step of the fused ResBlock.

    xw_ref   : (1, 1, TH+4, W+2, C) input window (2-row halo top/bottom, 1-col W pad)
    w*_ref   : (9*C, C)  conv weights, row (kh*3+kw)*C + cin  -> tap (kh, kw, cin)
    b*_ref   : (1, C)
    y_ref    : (1, TH*W, C) output block (pixels x channels)
    patch_ref: ((TH+2)*W, 9*C) VMEM im2col scratch
    r1p_ref  : (TH+2, W+2, C)  VMEM W-padded relu(conv1) scratch
    """
    t = pl.program_id(1)

    xw = xw_ref[0, 0]                       # (TH+4, W+2, C) raw x (skip path needs it)
    xr = jnp.maximum(xw, 0.0)               # relu(x) for conv1 (tile-local, tiny)

    def conv3x3(src, rows, w_ref, b_ref):
        # src: (rows+2, W+2, C) zero-padded rows.  Build the im2col patch matrix in
        # VMEM, then contract all 9 taps in ONE (rows*W, 9C) x (9C, C) MXU matmul.
        npix = rows * W
        for kh in range(3):
            for kw in range(3):
                k = kh * 3 + kw
                patch_ref[:npix, k * C:(k + 1) * C] = (
                    src[kh:kh + rows, kw:kw + W, :].reshape(npix, C))
        return (jnp.dot(patch_ref[:npix, :], w_ref[...],
                        preferred_element_type=jnp.float32) + b_ref[...])

    # conv1 over TH+2 rows: the extra top/bottom row is the halo conv2 consumes.
    r1 = conv3x3(xr, TH + 2, w1_ref, b1_ref)                 # ((TH+2)*W, C)
    r1 = jnp.maximum(r1, 0.0).reshape(TH + 2, W, C)

    # conv2 zero-pads its input: halo rows outside the real image must be 0
    # (NOT conv1 applied to zero padding, which would be relu(b1)).
    grow = lax.broadcasted_iota(jnp.int32, (TH + 2, 1, 1), 0) + t * TH - 1
    r1 = jnp.where((grow >= 0) & (grow < H), r1, 0.0)

    # W zero padding for conv2: zero only the two 1-pixel border columns.
    r1p_ref[:, 0:1, :] = jnp.zeros((TH + 2, 1, C), jnp.float32)
    r1p_ref[:, W + 1:W + 2, :] = jnp.zeros((TH + 2, 1, C), jnp.float32)
    r1p_ref[:, 1:W + 1, :] = r1

    r2 = conv3x3(r1p_ref[...], TH, w2_ref, b2_ref)           # (TH*W, C)

    # identity skip (indim == outdim, stride == 1 -> downsample is None)
    x_center = xw[2:2 + TH, 1:1 + W, :].reshape(TH * W, C)
    y_ref[0] = (x_center + r2).astype(y_ref.dtype)


def _pick_row_tile(H, W, C, budget_bytes=4 << 20):
    """Largest row tile (multiple of 8 dividing H) fitting a per-step VMEM budget."""
    def cost(th):  # f32 bytes: 2x dbl-buffered window + im2col + r1p + 2x out + weights
        return 4 * (2 * (th + 4) * (W + 2) * C + (th + 2) * W * 9 * C
                    + (th + 2) * (W + 2) * C + 2 * th * W * C + 2 * 9 * C * C)
    best = H
    for th in (8, 16, 32, 64, 128):
        if H % th == 0 and cost(th) <= budget_bytes:
            best = th
    return best


def resblock_forward_nhwc(x_nhwc, w1, b1, w2, b2, *, row_tile=None):
    """x_nhwc: (N,H,W,C) f32; w*: (Cout,Cin,3,3) PyTorch OIHW; b*: (Cout,)."""
    N, H, W, C = x_nhwc.shape
    # TODO(synk): downsample branch (stride != 1 or outdim != indim) not implemented.
    assert w1.shape[0] == C and w1.shape[1] == C, "identity-skip config only"

    TH = _pick_row_tile(H, W, C) if row_tile is None else row_tile
    assert H % TH == 0 and (TH % 8 == 0 or TH == H), "row tile must divide H (x8)"
    nT = H // TH

    # (kh, kw, cin) -> rows of a (9*C, C) matrix so each conv is one MXU matmul.
    def prep_w(w):  # OIHW (Cout,Cin,3,3) -> (kh,kw,Cin,Cout) -> (9*Cin, Cout)
        return jnp.transpose(w, (2, 3, 1, 0)).reshape(9 * w.shape[1], w.shape[0])

    w1k, w2k = prep_w(w1), prep_w(w2)
    b1k, b2k = b1.reshape(1, C), b2.reshape(1, C)

    # Overlapping row windows with a 2-row halo and 1-col W zero pad, so each grid
    # step is self-contained and BlockSpec can double-buffer it (halo duplication
    # overhead is only 4/TH of the input rows).
    xp = jnp.pad(x_nhwc, ((0, 0), (2, 2), (1, 1), (0, 0)))
    x_win = jnp.stack([xp[:, t * TH:t * TH + TH + 4] for t in range(nT)], axis=1)
    # x_win: (N, nT, TH+4, W+2, C)

    kernel = functools.partial(_resblock_tile_kernel, TH=TH, H=H, W=W, C=C)

    y_flat = pl.pallas_call(
        kernel,
        out_shape=jax.ShapeDtypeStruct((N, H * W, C), jnp.float32),
        grid=(N, nT),
        in_specs=[
            pl.BlockSpec((1, 1, TH + 4, W + 2, C), lambda n, t: (n, t, 0, 0, 0)),
            pl.BlockSpec((9 * C, C), lambda n, t: (0, 0)),   # weights resident
            pl.BlockSpec((1, C), lambda n, t: (0, 0)),
            pl.BlockSpec((9 * C, C), lambda n, t: (0, 0)),
            pl.BlockSpec((1, C), lambda n, t: (0, 0)),
        ],
        out_specs=pl.BlockSpec((1, TH * W, C), lambda n, t: (n, t, 0)),
        scratch_shapes=[
            pltpu.VMEM(((TH + 2) * W, 9 * C), jnp.float32),   # im2col patches
            pltpu.VMEM((TH + 2, W + 2, C), jnp.float32),      # W-padded relu(r1)
        ],
        compiler_params=pltpu.CompilerParams(
            dimension_semantics=("parallel", "parallel")),
    )(x_win, w1k, b1k, w2k, b2k)

    return y_flat.reshape(N, H, W, C)


def resblock_forward(x_nchw, w1, b1, w2, b2, *, row_tile=None):
    """NCHW wrapper matching PyTorch's nn.Conv2d layout."""
    x_nhwc = jnp.transpose(x_nchw, (0, 2, 3, 1))
    y_nhwc = resblock_forward_nhwc(x_nhwc, w1, b1, w2, b2, row_tile=row_tile)
    return jnp.transpose(y_nhwc, (0, 3, 1, 2))


# ----- pure-JAX reference (mirrors PyTorch NCHW/OIHW conv exactly) -----
def _conv_ref(x, w, b):
    y = lax.conv_general_dilated(
        x, w, window_strides=(1, 1), padding=((1, 1), (1, 1)),
        dimension_numbers=("NCHW", "OIHW", "NCHW"))
    return y + b.reshape(1, -1, 1, 1)


def _resblock_ref(x, w1, b1, w2, b2):
    r = _conv_ref(jnp.maximum(x, 0.0), w1, b1)
    r = _conv_ref(jnp.maximum(r, 0.0), w2, b2)
    return x + r


if __name__ == "__main__":
    N, C, H, W = 2, 4, 16, 16   # indim == outdim == 4, stride == 1
    key = jax.random.PRNGKey(0)
    kx, k1, k2, k3, k4 = jax.random.split(key, 5)

    x = jax.random.normal(kx, (N, C, H, W), dtype=jnp.float32)
    w1 = jax.random.normal(k1, (C, C, 3, 3), dtype=jnp.float32) * 0.1
    b1 = jax.random.normal(k2, (C,), dtype=jnp.float32) * 0.1
    w2 = jax.random.normal(k3, (C, C, 3, 3), dtype=jnp.float32) * 0.1
    b2 = jax.random.normal(k4, (C,), dtype=jnp.float32) * 0.1

    y_ref_val = _resblock_ref(x, w1, b1, w2, b2)

    # Multi-tile grid (2 batches x 2 row-tiles): exercises the halo / boundary masking.
    fwd8 = jax.jit(functools.partial(resblock_forward, row_tile=8))
    y8 = jax.block_until_ready(fwd8(x, w1, b1, w2, b2))
    assert y8.shape == (N, C, H, W)
    assert jnp.allclose(y8, y_ref_val, atol=1e-4, rtol=1e-4), "mismatch (row_tile=8)"

    # Default heuristic tile (one row-tile per image here).
    y_def = jax.block_until_ready(jax.jit(resblock_forward)(x, w1, b1, w2, b2))
    assert jnp.allclose(y_def, y_ref_val, atol=1e-4, rtol=1e-4), "mismatch (default)"

    print("KERNEL_OK")
</pallas_src>

<mosaic_0001>
module attributes {stable_mosaic.version = 11 : i64} {
  func.func @_resblock_tile_kernel(%arg0: i32, %arg1: i32, %arg2: memref<1x1x12x18x4xf32, #tpu.memory_space<vmem>>, %arg3: memref<36x4xf32, #tpu.memory_space<vmem>>, %arg4: memref<1x4xf32, #tpu.memory_space<vmem>>, %arg5: memref<36x4xf32, #tpu.memory_space<vmem>>, %arg6: memref<1x4xf32, #tpu.memory_space<vmem>>, %arg7: memref<1x128x4xf32, #tpu.memory_space<vmem>>, %arg8: memref<160x36xf32, #tpu.memory_space<vmem>>, %arg9: memref<10x18x4xf32, #tpu.memory_space<vmem>>) attributes {dimension_semantics = [#tpu.dimension_semantics<parallel>, #tpu.dimension_semantics<parallel>], iteration_bounds = array<i64: 2, 2>, scalar_prefetch = 0 : i64, scratch_operands = 2 : i64, tpu.core_type = #tpu.core_type<tc>, window_params = [{transform_indices = @transform_0, window_bounds = array<i64: 1, 1, 12, 18, 4>}, {pipeline_mode = #tpu.pipeline_mode<synchronous>, transform_indices = @transform_1, window_bounds = array<i64: 36, 4>}, {pipeline_mode = #tpu.pipeline_mode<synchronous>, transform_indices = @transform_2, window_bounds = array<i64: 1, 4>}, {pipeline_mode = #tpu.pipeline_mode<synchronous>, transform_indices = @transform_3, window_bounds = array<i64: 36, 4>}, {pipeline_mode = #tpu.pipeline_mode<synchronous>, transform_indices = @transform_4, window_bounds = array<i64: 1, 4>}, {transform_indices = @transform_5, window_bounds = array<i64: 1, 128, 4>}]} {
    %c0 = arith.constant 0 : index
    %c0_0 = arith.constant 0 : index
    %c0_1 = arith.constant 0 : index
    %c0_2 = arith.constant 0 : index
    %c0_3 = arith.constant 0 : index
    %0 = vector.load %arg2[%c0, %c0_0, %c0_1, %c0_2, %c0_3] : memref<1x1x12x18x4xf32, #tpu.memory_space<vmem>>, vector<1x1x12x18x4xf32>
    %1 = vector.shape_cast %0 : vector<1x1x12x18x4xf32> to vector<12x18x4xf32>
    %cst = arith.constant 0.000000e+00 : f32
    %2 = vector.broadcast %cst : f32 to vector<12x18x4xf32>
    %3 = arith.maximumf %1, %2 : vector<12x18x4xf32>
    %4 = vector.extract_strided_slice %3 {offsets = [0, 0, 0], sizes = [10, 16, 4], strides = [1, 1, 1]} : vector<12x18x4xf32> to vector<10x16x4xf32>
    %5 = vector.shape_cast %4 : vector<10x16x4xf32> to vector<160x4xf32>
    %c0_4 = arith.constant 0 : index
    %c0_5 = arith.constant 0 : index
    %6 = vector.load %arg8[%c0_4, %c0_5] : memref<160x36xf32, #tpu.memory_space<vmem>>, vector<160x4xf32>
    tpu.vector_store %arg8[%c0_4, %c0_5], %5 {strides = array<i32>} : memref<160x36xf32, #tpu.memory_space<vmem>>, vector<160x4xf32>,
    %7 = vector.extract_strided_slice %3 {offsets = [0, 1, 0], sizes = [10, 16, 4], strides = [1, 1, 1]} : vector<12x18x4xf32> to vector<10x16x4xf32>
    %8 = vector.shape_cast %7 : vector<10x16x4xf32> to vector<160x4xf32>
    %c0_6 = arith.constant 0 : index
    %c4 = arith.constant 4 : index
    %9 = vector.load %arg8[%c0_6, %c4] : memref<160x36xf32, #tpu.memory_space<vmem>>, vector<160x4xf32>
    tpu.vector_store %arg8[%c0_6, %c4], %8 {strides = array<i32>} : memref<160x36xf32, #tpu.memory_space<vmem>>, vector<160x4xf32>,
    %10 = vector.extract_strided_slice %3 {offsets = [0, 2, 0], sizes = [10, 16, 4], strides = [1, 1, 1]} : vector<12x18x4xf32> to vector<10x16x4xf32>
    %11 = vector.shape_cast %10 : vector<10x16x4xf32> to vector<160x4xf32>
    %c0_7 = arith.constant 0 : index
    %c8 = arith.constant 8 : index
    %12 = vector.load %arg8[%c0_7, %c8] : memref<160x36xf32, #tpu.memory_space<vmem>>, vector<160x4xf32>
    tpu.vector_store %arg8[%c0_7, %c8], %11 {strides = array<i32>} : memref<160x36xf32, #tpu.memory_space<vmem>>, vector<160x4xf32>,
    %13 = vector.extract_strided_slice %3 {offsets = [1, 0, 0], sizes = [10, 16, 4], strides = [1, 1, 1]} : vector<12x18x4xf32> to vector<10x16x4xf32>
    %14 = vector.shape_cast %13 : vector<10x16x4xf32> to vector<160x4xf32>
    %c0_8 = arith.constant 0 : index
    %c12 = arith.constant 12 : index
    %15 = vector.load %arg8[%c0_8, %c12] : memref<160x36xf32, #tpu.memory_space<vmem>>, vector<160x4xf32>
    tpu.vector_store %arg8[%c0_8, %c12], %14 {strides = array<i32>} : memref<160x36xf32, #tpu.memory_space<vmem>>, vector<160x4xf32>,
    %16 = vector.extract_strided_slice %3 {offsets = [1, 1, 0], sizes = [10, 16, 4], strides = [1, 1, 1]} : vector<12x18x4xf32> to vector<10x16x4xf32>
    %17 = vector.shape_cast %16 : vector<10x16x4xf32> to vector<160x4xf32>
    %c0_9 = arith.constant 0 : index
    %c16 = arith.constant 16 : index
    %18 = vector.load %arg8[%c0_9, %c16] : memref<160x36xf32, #tpu.memory_space<vmem>>, vector<160x4xf32>
    tpu.vector_store %arg8[%c0_9, %c16], %17 {strides = array<i32>} : memref<160x36xf32, #tpu.memory_space<vmem>>, vector<160x4xf32>,
    %19 = vector.extract_strided_slice %3 {offsets = [1, 2, 0], sizes = [10, 16, 4], strides = [1, 1, 1]} : vector<12x18x4xf32> to vector<10x16x4xf32>
    %20 = vector.shape_cast %19 : vector<10x16x4xf32> to vector<160x4xf32>
    %c0_10 = arith.constant 0 : index
    %c20 = arith.constant 20 : index
    %21 = vector.load %arg8[%c0_10, %c20] : memref<160x36xf32, #tpu.memory_space<vmem>>, vector<160x4xf32>
    tpu.vector_store %arg8[%c0_10, %c20], %20 {strides = array<i32>} : memref<160x36xf32, #tpu.memory_space<vmem>>, vector<160x4xf32>,
    %22 = vector.extract_strided_slice %3 {offsets = [2, 0, 0], sizes = [10, 16, 4], strides = [1, 1, 1]} : vector<12x18x4xf32> to vector<10x16x4xf32>
    %23 = vector.shape_cast %22 : vector<10x16x4xf32> to vector<160x4xf32>
    %c0_11 = arith.constant 0 : index
    %c24 = arith.constant 24 : index
    %24 = vector.load %arg8[%c0_11, %c24] : memref<160x36xf32, #tpu.memory_space<vmem>>, vector<160x4xf32>
    tpu.vector_store %arg8[%c0_11, %c24], %23 {strides = array<i32>} : memref<160x36xf32, #tpu.memory_space<vmem>>, vector<160x4xf32>,
    %25 = vector.extract_strided_slice %3 {offsets = [2, 1, 0], sizes = [10, 16, 4], strides = [1, 1, 1]} : vector<12x18x4xf32> to vector<10x16x4xf32>
    %26 = vector.shape_cast %25 : vector<10x16x4xf32> to vector<160x4xf32>
    %c0_12 = arith.constant 0 : index
    %c28 = arith.constant 28 : index
    %27 = vector.load %arg8[%c0_12, %c28] : memref<160x36xf32, #tpu.memory_space<vmem>>, vector<160x4xf32>
    tpu.vector_store %arg8[%c0_12, %c28], %26 {strides = array<i32>} : memref<160x36xf32, #tpu.memory_space<vmem>>, vector<160x4xf32>,
    %28 = vector.extract_strided_slice %3 {offsets = [2, 2, 0], sizes = [10, 16, 4], strides = [1, 1, 1]} : vector<12x18x4xf32> to vector<10x16x4xf32>
    %29 = vector.shape_cast %28 : vector<10x16x4xf32> to vector<160x4xf32>
    %c0_13 = arith.constant 0 : index
    %c32 = arith.constant 32 : index
    %30 = vector.load %arg8[%c0_13, %c32] : memref<160x36xf32, #tpu.memory_space<vmem>>, vector<160x4xf32>
    tpu.vector_store %arg8[%c0_13, %c32], %29 {strides = array<i32>} : memref<160x36xf32, #tpu.memory_space<vmem>>, vector<160x4xf32>,
    %c0_14 = arith.constant 0 : index
    %c0_15 = arith.constant 0 : index
    %31 = vector.load %arg8[%c0_14, %c0_15] : memref<160x36xf32, #tpu.memory_space<vmem>>, vector<160x36xf32>
    %c0_16 = arith.constant 0 : index
    %c0_17 = arith.constant 0 : index
    %32 = vector.load %arg3[%c0_16, %c0_17] : memref<36x4xf32, #tpu.memory_space<vmem>>, vector<36x4xf32>
    %cst_18 = arith.constant dense<0.000000e+00> : vector<160x4xf32>
    %33 = tpu.matmul %31, %32, %cst_18 {dimension_numbers = #tpu.dot_dimension_numbers<[1], [0], [0], [1], [0, 0, 1, 1], [], []>} : vector<160x36xf32>, vector<36x4xf32>, vector<160x4xf32> -> vector<160x4xf32>
    %c0_19 = arith.constant 0 : index
    %c0_20 = arith.constant 0 : index
    %34 = vector.load %arg4[%c0_19, %c0_20] : memref<1x4xf32, #tpu.memory_space<vmem>>, vector<1x4xf32>
    %35 = vector.broadcast %34 : vector<1x4xf32> to vector<160x4xf32>
    %36 = arith.addf %33, %35 : vector<160x4xf32>
    %cst_21 = arith.constant 0.000000e+00 : f32
    %37 = vector.broadcast %cst_21 : f32 to vector<160x4xf32>
    %38 = arith.maximumf %36, %37 : vector<160x4xf32>
    %39 = vector.shape_cast %38 : vector<160x4xf32> to vector<10x16x4xf32>
    %40 = tpu.iota {dimensions = array<i32: 0>} : vector<10x1x1xi32>
    %c8_i32 = arith.constant 8 : i32
    %41 = arith.muli %arg1, %c8_i32 : i32
    %42 = vector.broadcast %41 : i32 to vector<10x1x1xi32>
    %43 = arith.addi %40, %42 : vector<10x1x1xi32>
    %c1_i32 = arith.constant 1 : i32
    %44 = vector.broadcast %c1_i32 : i32 to vector<10x1x1xi32>
    %45 = arith.subi %43, %44 : vector<10x1x1xi32>
    %c0_i32 = arith.constant 0 : i32
    %46 = vector.broadcast %c0_i32 : i32 to vector<10x1x1xi32>
    %47 = arith.cmpi sge, %45, %46 : vector<10x1x1xi32>
    %c16_i32 = arith.constant 16 : i32
    %48 = vector.broadcast %c16_i32 : i32 to vector<10x1x1xi32>
    %49 = arith.cmpi slt, %45, %48 : vector<10x1x1xi32>
    %50 = arith.andi %47, %49 : vector<10x1x1xi1>
    %cst_22 = arith.constant 0.000000e+00 : f32
    %51 = vector.shape_cast %50 : vector<10x1x1xi1> to vector<10x1x1xi1>
    %52 = vector.broadcast %51 : vector<10x1x1xi1> to vector<10x16x4xi1>
    %53 = vector.broadcast %cst_22 : f32 to vector<10x16x4xf32>
    %54 = arith.select %52, %39, %53 : vector<10x16x4xi1>, vector<10x16x4xf32>
    %cst_23 = arith.constant 0.000000e+00 : f32
    %55 = vector.broadcast %cst_23 : f32 to vector<10x1x4xf32>
    %c0_24 = arith.constant 0 : index
    %c0_25 = arith.constant 0 : index
    %c0_26 = arith.constant 0 : index
    %56 = vector.load %arg9[%c0_24, %c0_25, %c0_26] : memref<10x18x4xf32, #tpu.memory_space<vmem>>, vector<10x1x4xf32>
    tpu.vector_store %arg9[%c0_24, %c0_25, %c0_26], %55 {strides = array<i32>} : memref<10x18x4xf32, #tpu.memory_space<vmem>>, vector<10x1x4xf32>,
    %cst_27 = arith.constant 0.000000e+00 : f32
    %57 = vector.broadcast %cst_27 : f32 to vector<10x1x4xf32>
    %c0_28 = arith.constant 0 : index
    %c17 = arith.constant 17 : index
    %c0_29 = arith.constant 0 : index
    %58 = vector.load %arg9[%c0_28, %c17, %c0_29] : memref<10x18x4xf32, #tpu.memory_space<vmem>>, vector<10x1x4xf32>
    tpu.vector_store %arg9[%c0_28, %c17, %c0_29], %57 {strides = array<i32>} : memref<10x18x4xf32, #tpu.memory_space<vmem>>, vector<10x1x4xf32>,
    %c0_30 = arith.constant 0 : index
    %c1 = arith.constant 1 : index
    %c0_31 = arith.constant 0 : index
    %59 = vector.load %arg9[%c0_30, %c1, %c0_31] : memref<10x18x4xf32, #tpu.memory_space<vmem>>, vector<10x16x4xf32>
    tpu.vector_store %arg9[%c0_30, %c1, %c0_31], %54 {strides = array<i32>} : memref<10x18x4xf32, #tpu.memory_space<vmem>>, vector<10x16x4xf32>,
    %c0_32 = arith.constant 0 : index
    %c0_33 = arith.constant 0 : index
    %c0_34 = arith.constant 0 : index
    %60 = vector.load %arg9[%c0_32, %c0_33, %c0_34] : memref<10x18x4xf32, #tpu.memory_space<vmem>>, vector<10x18x4xf32>
    %61 = vector.extract_strided_slice %60 {offsets = [0, 0, 0], sizes = [8, 16, 4], strides = [1, 1, 1]} : vector<10x18x4xf32> to vector<8x16x4xf32>
    %62 = vector.shape_cast %61 : vector<8x16x4xf32> to vector<128x4xf32>
    %c0_35 = arith.constant 0 : index
    %c0_36 = arith.constant 0 : index
    %63 = vector.load %arg8[%c0_35, %c0_36] : memref<160x36xf32, #tpu.memory_space<vmem>>, vector<128x4xf32>
    tpu.vector_store %arg8[%c0_35, %c0_36], %62 {strides = array<i32>} : memref<160x36xf32, #tpu.memory_space<vmem>>, vector<128x4xf32>,
    %64 = vector.extract_strided_slice %60 {offsets = [0, 1, 0], sizes = [8, 16, 4], strides = [1, 1, 1]} : vector<10x18x4xf32> to vector<8x16x4xf32>
    %65 = vector.shape_cast %64 : vector<8x16x4xf32> to vector<128x4xf32>
    %c0_37 = arith.constant 0 : index
    %c4_38 = arith.constant 4 : index
    %66 = vector.load %arg8[%c0_37, %c4_38] : memref<160x36xf32, #tpu.memory_space<vmem>>, vector<128x4xf32>
    tpu.vector_store %arg8[%c0_37, %c4_38], %65 {strides = array<i32>} : memref<160x36xf32, #tpu.memory_space<vmem>>, vector<128x4xf32>,
    %67 = vector.extract_strided_slice %60 {offsets = [0, 2, 0], sizes = [8, 16, 4], strides = [1, 1, 1]} : vector<10x18x4xf32> to vector<8x16x4xf32>
    %68 = vector.shape_cast %67 : vector<8x16x4xf32> to vector<128x4xf32>
    %c0_39 = arith.constant 0 : index
    %c8_40 = arith.constant 8 : index
    %69 = vector.load %arg8[%c0_39, %c8_40] : memref<160x36xf32, #tpu.memory_space<vmem>>, vector<128x4xf32>
    tpu.vector_store %arg8[%c0_39, %c8_40], %68 {strides = array<i32>} : memref<160x36xf32, #tpu.memory_space<vmem>>, vector<128x4xf32>,
    %70 = vector.extract_strided_slice %60 {offsets = [1, 0, 0], sizes = [8, 16, 4], strides = [1, 1, 1]} : vector<10x18x4xf32> to vector<8x16x4xf32>
    %71 = vector.shape_cast %70 : vector<8x16x4xf32> to vector<128x4xf32>
    %c0_41 = arith.constant 0 : index
    %c12_42 = arith.constant 12 : index
    %72 = vector.load %arg8[%c0_41, %c12_42] : memref<160x36xf32, #tpu.memory_space<vmem>>, vector<128x4xf32>
    tpu.vector_store %arg8[%c0_41, %c12_42], %71 {strides = array<i32>} : memref<160x36xf32, #tpu.memory_space<vmem>>, vector<128x4xf32>,
    %73 = vector.extract_strided_slice %60 {offsets = [1, 1, 0], sizes = [8, 16, 4], strides = [1, 1, 1]} : vector<10x18x4xf32> to vector<8x16x4xf32>
    %74 = vector.shape_cast %73 : vector<8x16x4xf32> to vector<128x4xf32>
    %c0_43 = arith.constant 0 : index
    %c16_44 = arith.constant 16 : index
    %75 = vector.load %arg8[%c0_43, %c16_44] : memref<160x36xf32, #tpu.memory_space<vmem>>, vector<128x4xf32>
    tpu.vector_store %arg8[%c0_43, %c16_44], %74 {strides = array<i32>} : memref<160x36xf32, #tpu.memory_space<vmem>>, vector<128x4xf32>,
    %76 = vector.extract_strided_slice %60 {offsets = [1, 2, 0], sizes = [8, 16, 4], strides = [1, 1, 1]} : vector<10x18x4xf32> to vector<8x16x4xf32>
    %77 = vector.shape_cast %76 : vector<8x16x4xf32> to vector<128x4xf32>
    %c0_45 = arith.constant 0 : index
    %c20_46 = arith.constant 20 : index
    %78 = vector.load %arg8[%c0_45, %c20_46] : memref<160x36xf32, #tpu.memory_space<vmem>>, vector<128x4xf32>
    tpu.vector_store %arg8[%c0_45, %c20_46], %77 {strides = array<i32>} : memref<160x36xf32, #tpu.memory_space<vmem>>, vector<128x4xf32>,
    %79 = vector.extract_strided_slice %60 {offsets = [2, 0, 0], sizes = [8, 16, 4], strides = [1, 1, 1]} : vector<10x18x4xf32> to vector<8x16x4xf32>
    %80 = vector.shape_cast %79 : vector<8x16x4xf32> to vector<128x4xf32>
    %c0_47 = arith.constant 0 : index
    %c24_48 = arith.constant 24 : index
    %81 = vector.load %arg8[%c0_47, %c24_48] : memref<160x36xf32, #tpu.memory_space<vmem>>, vector<128x4xf32>
    tpu.vector_store %arg8[%c0_47, %c24_48], %80 {strides = array<i32>} : memref<160x36xf32, #tpu.memory_space<vmem>>, vector<128x4xf32>,
    %82 = vector.extract_strided_slice %60 {offsets = [2, 1, 0], sizes = [8, 16, 4], strides = [1, 1, 1]} : vector<10x18x4xf32> to vector<8x16x4xf32>
    %83 = vector.shape_cast %82 : vector<8x16x4xf32> to vector<128x4xf32>
    %c0_49 = arith.constant 0 : index
    %c28_50 = arith.constant 28 : index
    %84 = vector.load %arg8[%c0_49, %c28_50] : memref<160x36xf32, #tpu.memory_space<vmem>>, vector<128x4xf32>
    tpu.vector_store %arg8[%c0_49, %c28_50], %83 {strides = array<i32>} : memref<160x36xf32, #tpu.memory_space<vmem>>, vector<128x4xf32>,
    %85 = vector.extract_strided_slice %60 {offsets = [2, 2, 0], sizes = [8, 16, 4], strides = [1, 1, 1]} : vector<10x18x4xf32> to vector<8x16x4xf32>
    %86 = vector.shape_cast %85 : vector<8x16x4xf32> to vector<128x4xf32>
    %c0_51 = arith.constant 0 : index
    %c32_52 = arith.constant 32 : index
    %87 = vector.load %arg8[%c0_51, %c32_52] : memref<160x36xf32, #tpu.memory_space<vmem>>, vector<128x4xf32>
    tpu.vector_store %arg8[%c0_51, %c32_52], %86 {strides = array<i32>} : memref<160x36xf32, #tpu.memory_space<vmem>>, vector<128x4xf32>,
    %c0_53 = arith.constant 0 : index
    %c0_54 = arith.constant 0 : index
    %88 = vector.load %arg8[%c0_53, %c0_54] : memref<160x36xf32, #tpu.memory_space<vmem>>, vector<128x36xf32>
    %c0_55 = arith.constant 0 : index
    %c0_56 = arith.constant 0 : index
    %89 = vector.load %arg5[%c0_55, %c0_56] : memref<36x4xf32, #tpu.memory_space<vmem>>, vector<36x4xf32>
    %cst_57 = arith.constant dense<0.000000e+00> : vector<128x4xf32>
    %90 = tpu.matmul %88, %89, %cst_57 {dimension_numbers = #tpu.dot_dimension_numbers<[1], [0], [0], [1], [0, 0, 1, 1], [], []>} : vector<128x36xf32>, vector<36x4xf32>, vector<128x4xf32> -> vector<128x4xf32>
    %c0_58 = arith.constant 0 : index
    %c0_59 = arith.constant 0 : index
    %91 = vector.load %arg6[%c0_58, %c0_59] : memref<1x4xf32, #tpu.memory_space<vmem>>, vector<1x4xf32>
    %92 = vector.broadcast %91 : vector<1x4xf32> to vector<128x4xf32>
    %93 = arith.addf %90, %92 : vector<128x4xf32>
    %94 = vector.extract_strided_slice %1 {offsets = [2, 1, 0], sizes = [8, 16, 4], strides = [1, 1, 1]} : vector<12x18x4xf32> to vector<8x16x4xf32>
    %95 = vector.shape_cast %94 : vector<8x16x4xf32> to vector<128x4xf32>
    %96 = arith.addf %95, %93 : vector<128x4xf32>
    %c0_60 = arith.constant 0 : index
    %c0_61 = arith.constant 0 : index
    %c0_62 = arith.constant 0 : index
    %97 = vector.load %arg7[%c0_60, %c0_61, %c0_62] : memref<1x128x4xf32, #tpu.memory_space<vmem>>, vector<1x128x4xf32>
    %98 = vector.shape_cast %97 : vector<1x128x4xf32> to vector<128x4xf32>
    %99 = vector.shape_cast %96 : vector<128x4xf32> to vector<1x128x4xf32>
    tpu.vector_store %arg7[%c0_60, %c0_61, %c0_62], %99 {strides = array<i32>} : memref<1x128x4xf32, #tpu.memory_space<vmem>>, vector<1x128x4xf32>,
    return
  }
  func.func @transform_0(%arg0: i32, %arg1: i32) -> (i32, i32, i32, i32, i32) {
    %c0_i32 = arith.constant 0 : i32
    %c0_i32_0 = arith.constant 0 : i32
    %c0_i32_1 = arith.constant 0 : i32
    %c0_i32_2 = arith.constant 0 : i32
    return %arg0, %arg1, %c0_i32, %c0_i32_0, %c0_i32_1 : i32, i32, i32, i32, i32
  }
  func.func @transform_1(%arg0: i32, %arg1: i32) -> (i32, i32) {
    %c0_i32 = arith.constant 0 : i32
    %c0_i32_0 = arith.constant 0 : i32
    %c0_i32_1 = arith.constant 0 : i32
    return %c0_i32, %c0_i32_0 : i32, i32
  }
  func.func @transform_2(%arg0: i32, %arg1: i32) -> (i32, i32) {
    %c0_i32 = arith.constant 0 : i32
    %c0_i32_0 = arith.constant 0 : i32
    %c0_i32_1 = arith.constant 0 : i32
    return %c0_i32, %c0_i32_0 : i32, i32
  }
  func.func @transform_3(%arg0: i32, %arg1: i32) -> (i32, i32) {
    %c0_i32 = arith.constant 0 : i32
    %c0_i32_0 = arith.constant 0 : i32
    %c0_i32_1 = arith.constant 0 : i32
    return %c0_i32, %c0_i32_0 : i32, i32
  }
  func.func @transform_4(%arg0: i32, %arg1: i32) -> (i32, i32) {
    %c0_i32 = arith.constant 0 : i32
    %c0_i32_0 = arith.constant 0 : i32
    %c0_i32_1 = arith.constant 0 : i32
    return %c0_i32, %c0_i32_0 : i32, i32
  }
  func.func @transform_5(%arg0: i32, %arg1: i32) -> (i32, i32, i32) {
    %c0_i32 = arith.constant 0 : i32
    %c0_i32_0 = arith.constant 0 : i32
    return %arg0, %arg1, %c0_i32 : i32, i32, i32
  }
}

</mosaic_0001>

<bundles_post_ra>
// kernel: resblock_forward.1
= control target key start
LH: loop header
LB: loop body
LE: loop exit
PB: predicated region body
PF: predicated region fallthrough
CT: control target
= control target key end

     0   :  { %s3042_s18 = smov 0   ;;  %s3044_s19 = smov 0   ;;  %s4229_s0 = inlined_call_operand.vmem [shape: f32[2,2,12,18,4], index: 0, kind: input, shape index: {}]   ;;  %s4230_s1 = inlined_call_operand.vmem [shape: f32[36,4], index: 1, kind: input, shape index: {}]   ;;  %s4231_s2 = inlined_call_operand.vmem [shape: f32[1,4], index: 2, kind: input, shape index: {}]   ;;  %s4232_s3 = inlined_call_operand.vmem [shape: f32[36,4], index: 3, kind: input, shape index: {}]   ;;  %s4233_s4 = inlined_call_operand.vmem [shape: f32[1,4], index: 4, kind: input, shape index: {}]   ;;  %s4234_s5 = inlined_call_operand.vmem [shape: f32[2,256,4], index: 5, kind: output, shape index: {}]  }
   0x1   :  { %s3046_s20 = smov 0   ;;  %s3048_s21 = smov 0  }
   0x2   :  { %s3050_s22 = smov 0  }
   0x3 LB: > { %s24_s23 = sadd.s32 1, %s2993_s20  ;;  %s27_s24 = sadd.s32 1, %s2997_s21  ;;  %s3001_s22 = sphi %s3050_s22, %s15_s22   ;;  %s2997_s21 = sphi %s3048_s21, %s4238_s21   ;;  %s2993_s20 = sphi %s3046_s20, %s4237_s20   ;;  %s2989_s19 = sphi %s3044_s19, %s4236_s19   ;;  %s2985_s18 = sphi %s3042_s18, %s4235_s18  }
   0x4   : > { %p25_p0 = scmp.ge.s32.totalorder %s24_s23, 2  ;;  %p2694_p1 = scmp.ge.s32.totalorder %s3001_s22, 1 }
   0x5   : > { %p207_p2 = scmp.lt.s32.totalorder %s3001_s22, 5 }
   0x6   : > { %s4240_s23 = smov (%p25_p0, %s24_s23), 0  ;;  %s4242_s24 = smov (!%p25_p0, %s27_s24), %s2997_s21 }
   0x7   : > { %p208_p3 = pnand %p2694_p1, %p207_p2  ;;  %p29_p4 = scmp.ge.s32.totalorder %s4242_s24, 2 }
   0x8   : > { %p243_p5 = scmp.lt.s32.totalorder (!%p208_p3), %s2989_s19, 1  ;;  %p245_p6 = scmp.lt.s32.totalorder (!%p208_p3), %s2985_s18, 1  ;;  %vm334_vm0 = vcmask (!%p208_p3), 31744   ;;  %vm517_vm1 = vcmask (!%p208_p3), 1045504   ;;  %vm385_vm2 = vcmask (!%p208_p3), 1046528   ;;  %v1181_v57 = vld [vmem:[%s4230_s1] sm:$0xff] (!%p208_p3) }
   0x9   : > { %s4244_s24 = smov (%p29_p4, %s4242_s24), 0  ;;  %211 = sbr.rel (%p208_p3) target bundleno = 1058 (0x422), region = 40 }
   0xa   : > { %s3003_s8 = smov (!%p208_p3), 12   ;;  %s3004_s9 = smov (!%p208_p3), 8   ;;  %v1182_v58 = vld [vmem:[%s4230_s1 + $0x8] sm:$0xff] (!%p208_p3)  ;;  %v1183_v63 = vld [vmem:[%s4230_s1 + $0x10] sm:$0xff] (!%p208_p3)  ;;  %vm1254_vm3 = vcmask (!%p208_p3), 1043456   ;;  %vm496_vm4 = vcmask (!%p208_p3), 64544  }
   0xb   : > { %s3005_s10 = smov (!%p208_p3), 4   ;;  %s3006_s11 = smov (!%p208_p3), 16   ;;  %v2871_v59 = vpack.c.bf16 (!%p208_p3), %v1182_v58, %v1181_v57  ;;  %vm628_vm5 = vcmask (!%p208_p3), 97344   ;;  %vm711_vm6 = vcmask (!%p208_p3), 130144   ;;  %vm798_vm7 = vcmask (!%p208_p3), 162944  }
   0xc   : > { %s3007_s12 = smov (!%p208_p3), 20   ;;  %s3008_s13 = smov (!%p208_p3), 24   ;;  %vm884_vm8 = vcmask (!%p208_p3), 195744   ;;  %vm967_vm9 = vcmask (!%p208_p3), 228544   ;;  %vm1054_vm10 = vcmask (!%p208_p3), 261344   ;;  %vm1140_vm11 = vcmask (!%p208_p3), 294144  }
   0xd   : > { %2872 = vmatprep.subr.bf16.mxu0 (!%p208_p3), %v2871_v59  ;;  %s3010_s30 = smov (!%p208_p3), 32   ;;  %vm1193_vm12 = vcmask (!%p208_p3), 293888   ;;  %vm1532_vm13 = vcmask (!%p208_p3), 24576   ;;  %s2721_s15 = sshll.u32 (!%p208_p3), %s2985_s18, 3 }
   0xe   : > { %2874 = vmatpush3.bf16.msra.mxu0 (!%p208_p3), %v2871_v59 }
  0x10   : > { %s4246_s19 = smov (!%p243_p5, %s2989_s19), 1 }
  0x11   : > { %s246_s25 = scalar_select %p245_p6, %s2985_s18, 1 }
  0x12   : > { %s2888_s26 = smul.u32 72, %s4246_s19 }
  0x13   : > { %s2887_s27 = smul.u32 36, %s246_s25  ;;  %s3009_s25 = smov 28  }
  0x15   : > { %s249_s28 = sadd.s32 %s2888_s26, %s2887_s27 }
  0x16   : > { %s2695_s29 = sshll.u32 %s249_s28, 3 }
  0x17   : > { %s3082_s7 = scalar_lea.vmem %s4229_s0, %s2695_s29 }
  0x18   : > { %v266_v0 = vld [vmem:[%s3082_s7 + $0x20] sm:$0xff]  ;;  %v265_v1 = vld [vmem:[%s3082_s7 + $0x18] sm:$0xff]  ;;  %v263_v5 = vld [vmem:[%s3082_s7 + $0x8] sm:$0xff] }
  0x19   : > { %v262_v2 = vld [vmem:[%s3082_s7] sm:$0xff]  ;;  %v3087_v3 = vmax.f32 %v266_v0, 0.0  ;;  %v3089_v4 = vmax.f32 %v265_v1, 0.0  ;;  %v264_v7 = vld [vmem:[%s3082_s7 + $0x10] sm:$0x3]  ;;  %v299_v8 = vmax.f32 %v263_v5, 0.0 }
  0x1a   : > { %v298_v6 = vmax.f32 %v262_v2, 0.0  ;;  %v300_v9 = vmax.f32 %v264_v7, 0.0  ;;  %v267_v12 = vld [vmem:[%s3082_s7 + $0x28] sm:$0x3]  ;;  %v268_v17 = vld [vmem:[%s3082_s7 + $0x30] sm:$0xff]  ;;  %v269_v18 = vld [vmem:[%s3082_s7 + $0x38] sm:$0xff] }
  0x1b   : > { %653 = vrot.lane.b32.xlu1 %v3087_v3, %s3003_s8  ;;  %651 = vrot.lane.b32.xlu0 %v3089_v4, %s3003_s8  ;;  %337 = vst.msk [vmem:[#allocation2 + $0x10] sm:$0xff] %vm334_vm0, %v3089_v4  ;;  %338 = vst.msk [vmem:[#allocation2 + $0x18] sm:$0xff] %vm334_vm0, %v3087_v3  ;;  %v519_v13 = vrot.slane %v299_v8, 2  ;;  %v387_v14 = vrot.slane %v299_v8, 1  ;;  %v271_v19 = vld [vmem:[%s3082_s7 + $0x48] sm:$0xff]  ;;  %v272_v20 = vld [vmem:[%s3082_s7 + $0x50] sm:$0xff] }
  0x1c   : > { %v518_v10 = vrot.slane %v298_v6, 2  ;;  %v386_v11 = vrot.slane %v298_v6, 1  ;;  %335 = vst.msk [vmem:[#allocation2] sm:$0xff] %vm334_vm0, %v298_v6  ;;  %v521_v15 = vrot.slane %v300_v9, 2  ;;  %v389_v16 = vrot.slane %v300_v9, 1  ;;  %336 = vst.msk [vmem:[#allocation2 + $0x8] sm:$0xff] %vm334_vm0, %v299_v8 }
  0x1d   : > { %v391_v23 = vrot.slane %v3089_v4, 1  ;;  %v392_v25 = vrot.slane %v3087_v3, 1  ;;  %v303_v26 = vmax.f32 %v267_v12, 0.0  ;;  %v3115_v27 = vmax.f32 %v268_v17, 0.0  ;;  %v274_v32 = vld [vmem:[%s3082_s7 + $0x60] sm:$0xff]  ;;  %v275_v33 = vld [vmem:[%s3082_s7 + $0x68] sm:$0xff] }
  0x1e   : > { %v520_v21 = vsel %vm517_vm1, %v518_v10, %v519_v13  ;;  %v388_v22 = vsel %vm385_vm2, %v386_v11, %v387_v14  ;;  %v522_v24 = vsel %vm517_vm1, %v519_v13, %v521_v15  ;;  %v390_v28 = vsel %vm385_vm2, %v387_v14, %v389_v16  ;;  %v277_v34 = vld [vmem:[%s3082_s7 + $0x78] sm:$0xff]  ;;  %v278_v42 = vld [vmem:[%s3082_s7 + $0x80] sm:$0xff]  ;;  %v280_v48 = vld [vmem:[%s3082_s7 + $0x90] sm:$0xff] }
  0x1f   : > { %568 = vrot.lane.b32.xlu1 %v520_v21, %s3004_s9  ;;  %436 = vrot.lane.b32.xlu0 %v388_v22, %s3005_s10  ;;  %v3118_v29 = vmax.f32 %v269_v18, 0.0  ;;  %v3120_v30 = vmax.f32 %v271_v19, 0.0  ;;  %v3122_v31 = vmax.f32 %v272_v20, 0.0  ;;  %339 = vst.msk [vmem:[#allocation2 + $0x20] sm:$0xff] %vm334_vm0, %v3115_v27  ;;  %v393_v35 = vsel %vm385_vm2, %v391_v23, %v392_v25  ;;  %v270_v52 = vld [vmem:[%s3082_s7 + $0x40] sm:$0x3] }
  0x20   : > { %v523_v36 = vrot.slane %v3089_v4, 2  ;;  %v524_v37 = vrot.slane %v3087_v3, 2  ;;  %v394_v38 = vrot.slane %v303_v26, 1  ;;  %v3140_v39 = vmax.f32 %v274_v32, 0.0  ;;  %v281_v53 = vld [vmem:[%s3082_s7 + $0x98] sm:$0xff]  ;;  %v283_v7 = vld [vmem:[%s3082_s7 + $0xa8] sm:$0xff] }
  0x21   : > { %340 = vst.msk [vmem:[#allocation2 + $0x28] sm:$0xff] %vm334_vm0, %v3118_v29  ;;  %341 = vst.msk [vmem:[#allocation2 + $0x30] sm:$0xff] %vm334_vm0, %v3120_v30  ;;  %v3142_v40 = vmax.f32 %v275_v33, 0.0  ;;  %v3144_v41 = vmax.f32 %v277_v34, 0.0  ;;  %v3157_v45 = vmax.f32 %v278_v42, 0.0  ;;  %v526_v46 = vrot.slane %v303_v26, 2 }
  0x22   : > { %342 = vst.msk [vmem:[#allocation2 + $0x38] sm:$0xff] %vm334_vm0, %v3122_v31  ;;  %343 = vst.msk [vmem:[#allocation2 + $0x40] sm:$0xff] %vm334_vm0, %v3140_v39  ;;  %v525_v43 = vsel %vm517_vm1, %v523_v36, %v524_v37  ;;  %v395_v44 = vsel %vm385_vm2, %v392_v25, %v394_v38  ;;  %v3167_v49 = vmax.f32 %v280_v48, 0.0  ;;  %v396_v50 = vrot.slane %v3115_v27, 1  ;;  %v1184_v0 = vld [vmem:[%s4230_s1 + $0x18] sm:$0xff]  ;;  %v284_v12 = vld [vmem:[%s3082_s7 + $0xb0] sm:$0xff] }
  0x23   : > { %570 = vrot.lane.b32.xlu1 %v522_v24, %s3004_s9  ;;  %438 = vrot.lane.b32.xlu0 %v390_v28, %s3005_s10  ;;  %344 = vst.msk [vmem:[#allocation2 + $0x48] sm:$0xff] %vm334_vm0, %v3142_v40  ;;  %345 = vst.msk [vmem:[#allocation2 + $0x50] sm:$0xff] %vm334_vm0, %v3144_v41  ;;  %v527_v47 = vsel %vm517_vm1, %v524_v37, %v526_v46  ;;  %v397_v51 = vrot.slane %v3118_v29, 1  ;;  %v3178_v54 = vmax.f32 %v281_v53, 0.0  ;;  %v306_v56 = vmax.f32 %v270_v52, 0.0  ;;  %v286_v23 = vld [vmem:[%s3082_s7 + $0xc0] sm:$0xff] }
  0x24   : > { %346 = vst.msk [vmem:[#allocation2 + $0x58] sm:$0xff] %vm334_vm0, %v3157_v45  ;;  %347 = vst.msk [vmem:[#allocation2 + $0x60] sm:$0xff] %vm334_vm0, %v3167_v49  ;;  %v528_v60 = vrot.slane %v3115_v27, 2  ;;  %v529_v61 = vrot.slane %v3118_v29, 2  ;;  %v2875_v1 = vpack.c.bf16 %v1184_v0, %v1183_v63  ;;  %v1185_v4 = vld [vmem:[%s4230_s1 + $0x20] sm:$0xf] }
  0x25   : > { %v398_v55 = vsel %vm385_vm2, %v396_v50, %v397_v51  ;;  %348 = vst.msk [vmem:[#allocation2 + $0x68] sm:$0xff] %vm334_vm0, %v3178_v54  ;;  %v399_v62 = vrot.slane %v306_v56, 1  ;;  %v531_v5 = vrot.slane %v306_v56, 2  ;;  %v3223_v8 = vmax.f32 %v283_v7, 0.0  ;;  %v273_v11 = vld [vmem:[%s3082_s7 + $0x58] sm:$0x3] }
  0x26   : > { %v530_v2 = vsel %vm517_vm1, %v528_v60, %v529_v61  ;;  %2876 = vmatprep.subr.bf16.mxu0 %v2875_v1  ;;  %v401_v9 = vrot.slane %v3120_v30, 1  ;;  %v402_v10 = vrot.slane %v3122_v31, 1  ;;  %v3234_v13 = vmax.f32 %v284_v12, 0.0  ;;  %v287_v28 = vld [vmem:[%s3082_s7 + $0xc8] sm:$0xff]  ;;  %v289_v42 = vld [vmem:[%s3082_s7 + $0xd8] sm:$0xff]  ;;  %v290_v53 = vld [vmem:[%s3082_s7 + $0xe0] sm:$0xff] }
  0x27   : > { %440 = vrot.lane.b32.xlu1 %v393_v35, %s3005_s10  ;;  %738 = vrot.lane.b32.xlu0 %v393_v35, %s3006_s11  ;;  %v400_v3 = vsel %vm385_vm2, %v397_v51, %v399_v62  ;;  %v532_v6 = vsel %vm517_vm1, %v529_v61, %v531_v5  ;;  %349 = vst.msk [vmem:[#allocation2 + $0x70] sm:$0xff] %vm334_vm0, %v3223_v8  ;;  %v309_v15 = vmax.f32 %v273_v11, 0.0  ;;  %v533_v16 = vrot.slane %v3120_v30, 2  ;;  %v279_v52 = vld [vmem:[%s3082_s7 + $0x88] sm:$0x3] }
  0x28   : > { %2878 = vmatpush3.bf16.msra.mxu0 %v2875_v1  ;;  %v403_v14 = vsel %vm385_vm2, %v401_v9, %v402_v10  ;;  %350 = vst.msk [vmem:[#allocation2 + $0x78] sm:$0xff] %vm334_vm0, %v3234_v13  ;;  %v534_v17 = vrot.slane %v3122_v31, 2  ;;  %v3262_v24 = vmax.f32 %v286_v23, 0.0  ;;  %v406_v25 = vrot.slane %v3140_v39, 1 }
  0x29   : > { %2805 = vmatprep.subr.msk.mxu0 %vm1254_vm3, %v1185_v4  ;;  %v404_v18 = vrot.slane %v309_v15, 1  ;;  %v536_v21 = vrot.slane %v309_v15, 2  ;;  %v407_v26 = vrot.slane %v3142_v40, 1  ;;  %v538_v32 = vrot.slane %v3140_v39, 2 }
  0x2a   : > { %v535_v19 = vsel %vm517_vm1, %v533_v16, %v534_v17  ;;  %351 = vst.msk [vmem:[#allocation2 + $0x80] sm:$0xff] %vm334_vm0, %v3262_v24  ;;  %v539_v33 = vrot.slane %v3142_v40, 2  ;;  %v3301_v46 = vmax.f32 %v289_v42, 0.0  ;;  %v412_v48 = vrot.slane %v3157_v45, 1 }
  0x2b   : > { %824 = vrot.lane.b32.xlu1 %v525_v43, %s3007_s12  ;;  %740 = vrot.lane.b32.xlu0 %v395_v44, %s3006_s11  ;;  %v405_v20 = vsel %vm385_vm2, %v402_v10, %v404_v18  ;;  %v537_v22 = vsel %vm517_vm1, %v534_v17, %v536_v21  ;;  %v315_v57 = vmax.f32 %v279_v52, 0.0  ;;  %v543_v60 = vrot.slane %v3144_v41, 2 }
  0x2c   : > { %2806 = vmatpush3.msk.msra.mxu0 %vm1254_vm3, %v1185_v4  ;;  %v540_v35 = vsel %vm517_vm1, %v538_v32, %v539_v33  ;;  %353 = vst.msk [vmem:[#allocation2 + $0x90] sm:$0xff] %vm334_vm0, %v3301_v46  ;;  %v544_v61 = vrot.slane %v3157_v45, 2  ;;  %v416_v15 = vrot.slane %v3167_v49, 1  ;;  %v417_v16 = vrot.slane %v3178_v54, 1 }
  0x2d   : > { %v414_v62 = vrot.slane %v315_v57, 1  ;;  %v546_v4 = vrot.slane %v315_v57, 2 }
  0x2e   : > { %v545_v1 = vsel %vm517_vm1, %v543_v60, %v544_v61  ;;  %v553_v60 = vrot.slane %v3223_v8, 2 }
  0x2f   : > { %572 = vrot.lane.b32.xlu1 %v525_v43, %s3004_s9  ;;  %442 = vrot.lane.b32.xlu0 %v395_v44, %s3005_s10 }
  0x33   : > { %907 = vrot.lane.b32.xlu1 %v3115_v27, %s3008_s13  ;;  %826 = vrot.lane.b32.xlu0 %v527_v47, %s3007_s12 }
  0x37   : > { %655 = vrot.lane.b32.xlu1 %v3115_v27, %s3003_s8  ;;  %574 = vrot.lane.b32.xlu0 %v527_v47, %s3004_s9  ;;  %v276_v27 = vld [vmem:[%s3082_s7 + $0x70] sm:$0x3]  ;;  %v411_v47 = vrot.slane %v3144_v41, 1 }
  0x39   : > { %v413_v56 = vsel %vm385_vm2, %v411_v47, %v412_v48 }
  0x3b   : > { %994 = vrot.lane.b32.xlu1 %v398_v55, %s3009_s25  ;;  %909 = vrot.lane.b32.xlu0 %v3118_v29, %s3008_s13 }
  0x3f   : > { %742 = vrot.lane.b32.xlu1 %v398_v55, %s3006_s11  ;;  %657 = vrot.lane.b32.xlu0 %v3118_v29, %s3003_s8  ;;  %v3273_v29 = vmax.f32 %v287_v28, 0.0 }
  0x41   : > { %352 = vst.msk [vmem:[#allocation2 + $0x88] sm:$0xff] %vm334_vm0, %v3273_v29 }
  0x43   : > { %1080 = vrot.lane.b32.xlu1 %v530_v2, %s3010_s30  ;;  %996 = vrot.lane.b32.xlu0 %v400_v3, %s3009_s25 }
  0x47   : > { %744 = vrot.lane.b32.xlu1 %v400_v3, %s3006_s11  ;;  %444 = vrot.lane.b32.xlu0 %v398_v55, %s3005_s10  ;;  %v3316_v55 = vmax.f32 %v290_v53, 0.0  ;;  %v285_v53 = vld [vmem:[%s3082_s7 + $0xb8] sm:$0x3] }
  0x48   : > { %v321_v57 = vmax.f32 %v285_v53, 0.0 }
  0x49   : > { %354 = vst.msk [vmem:[#allocation2 + $0x98] sm:$0xff] %vm334_vm0, %v3316_v55 }
  0x4b   : > { %1082 = vrot.lane.b32.xlu1 %v532_v6, %s3010_s30  ;;  %828 = vrot.lane.b32.xlu0 %v530_v2, %s3007_s12 }
  0x4f   : > { %576 = vrot.lane.b32.xlu1 %v530_v2, %s3004_s9  ;;  %446 = vrot.lane.b32.xlu0 %v400_v3, %s3005_s10  ;;  %v415_v2 = vsel %vm385_vm2, %v412_v48, %v414_v62  ;;  %v421_v48 = vrot.slane %v3223_v8, 1  ;;  %v424_v62 = vrot.slane %v321_v57, 1 }
  0x53   : > { %911 = vrot.lane.b32.xlu1 %v3120_v30, %s3008_s13  ;;  %830 = vrot.lane.b32.xlu0 %v532_v6, %s3007_s12 }
  0x57   : > { %659 = vrot.lane.b32.xlu1 %v3120_v30, %s3003_s8  ;;  %578 = vrot.lane.b32.xlu0 %v532_v6, %s3004_s9  ;;  %v408_v30 = vsel %vm385_vm2, %v406_v25, %v407_v26  ;;  %v548_v25 = vrot.slane %v3167_v49, 2 }
  0x5b   : > { %998 = vrot.lane.b32.xlu1 %v403_v14, %s3009_s25  ;;  %913 = vrot.lane.b32.xlu0 %v3122_v31, %s3008_s13 }
  0x5f   : > { %746 = vrot.lane.b32.xlu1 %v403_v14, %s3006_s11  ;;  %661 = vrot.lane.b32.xlu0 %v3122_v31, %s3003_s8  ;;  %v312_v31 = vmax.f32 %v276_v27, 0.0 }
  0x61   : > { %v409_v34 = vrot.slane %v312_v31, 1  ;;  %v541_v37 = vrot.slane %v312_v31, 2 }
  0x63   : > { %1084 = vrot.lane.b32.xlu1 %v535_v19, %s3010_s30  ;;  %1000 = vrot.lane.b32.xlu0 %v405_v20, %s3009_s25  ;;  %v410_v36 = vsel %vm385_vm2, %v407_v26, %v409_v34  ;;  %v542_v38 = vsel %vm517_vm1, %v539_v33, %v541_v37  ;;  %v549_v26 = vrot.slane %v3178_v54, 2 }
  0x65   : > { %v550_v32 = vsel %vm517_vm1, %v548_v25, %v549_v26  ;;  %v558_v25 = vrot.slane %v3262_v24, 2 }
  0x67   : > { %748 = vrot.lane.b32.xlu1 %v405_v20, %s3006_s11  ;;  %448 = vrot.lane.b32.xlu0 %v403_v14, %s3005_s10 }
  0x6b   : > { %1086 = vrot.lane.b32.xlu1 %v537_v22, %s3010_s30  ;;  %832 = vrot.lane.b32.xlu0 %v535_v19, %s3007_s12 }
  0x6f   : > { %580 = vrot.lane.b32.xlu1 %v535_v19, %s3004_s9  ;;  %450 = vrot.lane.b32.xlu0 %v405_v20, %s3005_s10  ;;  %v282_v19 = vld [vmem:[%s3082_s7 + $0xa0] sm:$0x3]  ;;  %v418_v20 = vsel %vm385_vm2, %v416_v15, %v417_v16  ;;  %v426_v15 = vrot.slane %v3262_v24, 1 }
  0x70   : > { %v318_v21 = vmax.f32 %v282_v19, 0.0  ;;  %v288_v19 = vld [vmem:[%s3082_s7 + $0xd0] sm:$0x3] }
  0x72   : > { %v419_v27 = vrot.slane %v318_v21, 1 }
  0x73   : > { %915 = vrot.lane.b32.xlu1 %v3140_v39, %s3008_s13  ;;  %834 = vrot.lane.b32.xlu0 %v537_v22, %s3007_s12 }
  0x77   : > { %663 = vrot.lane.b32.xlu1 %v3140_v39, %s3003_s8  ;;  %582 = vrot.lane.b32.xlu0 %v537_v22, %s3004_s9 }
  0x7b   : > { %1002 = vrot.lane.b32.xlu1 %v408_v30, %s3009_s25  ;;  %917 = vrot.lane.b32.xlu0 %v3142_v40, %s3008_s13 }
  0x7f   : > { %750 = vrot.lane.b32.xlu1 %v408_v30, %s3006_s11  ;;  %665 = vrot.lane.b32.xlu0 %v3142_v40, %s3003_s8 }
  0x83   : > { %1088 = vrot.lane.b32.xlu1 %v540_v35, %s3010_s30  ;;  %1004 = vrot.lane.b32.xlu0 %v410_v36, %s3009_s25 }
  0x87   : > { %752 = vrot.lane.b32.xlu1 %v410_v36, %s3006_s11  ;;  %452 = vrot.lane.b32.xlu0 %v408_v30, %s3005_s10 }
  0x8b   : > { %1090 = vrot.lane.b32.xlu1 %v542_v38, %s3010_s30  ;;  %836 = vrot.lane.b32.xlu0 %v540_v35, %s3007_s12 }
  0x8d   : > { %v654_v39 = vpop.permute.xlu1 %653  ;;  %v652_v40 = vpop.permute.xlu0 %651 }
  0x8f   : > { %584 = vrot.lane.b32.xlu1 %v540_v35, %s3004_s9  ;;  %454 = vrot.lane.b32.xlu0 %v410_v36, %s3005_s10  ;;  %v551_v35 = vrot.slane %v318_v21, 2  ;;  %v324_v21 = vmax.f32 %v288_v19, 0.0 }
  0x91   : > { %v569_v43 = vpop.permute.xlu1 %568  ;;  %v437_v44 = vpop.permute.xlu0 %436 }
  0x92   : > { %497 = vst.msk [vmem:[#allocation2] sm:$0xff] %vm496_vm4, %v437_v44 }
  0x93   : > { %629 = vst.msk [vmem:[#allocation2] sm:$0xff] %vm628_vm5, %v569_v43  ;;  %919 = vrot.lane.b32.xlu1 %v3144_v41, %s3008_s13  ;;  %838 = vrot.lane.b32.xlu0 %v542_v38, %s3007_s12 }
  0x94   : > { %712 = vst.msk [vmem:[#allocation2] sm:$0xff] %vm711_vm6, %v652_v40 }
  0x95   : > { %v571_v50 = vpop.permute.xlu1 %570  ;;  %v439_v51 = vpop.permute.xlu0 %438 }
  0x96   : > { %498 = vst.msk [vmem:[#allocation2 + $0x8] sm:$0xff] %vm496_vm4, %v439_v51 }
  0x97   : > { %630 = vst.msk [vmem:[#allocation2 + $0x8] sm:$0xff] %vm628_vm5, %v571_v50  ;;  %667 = vrot.lane.b32.xlu1 %v3144_v41, %s3003_s8  ;;  %586 = vrot.lane.b32.xlu0 %v542_v38, %s3004_s9  ;;  %v422_v50 = vrot.slane %v3234_v13, 1 }
  0x98   : > { %713 = vst.msk [vmem:[#allocation2 + $0x8] sm:$0xff] %vm711_vm6, %v654_v39 }
  0x99   : > { %v441_v58 = vpop.permute.xlu1 %440  ;;  %v739_v59 = vpop.permute.xlu0 %738 }
  0x9a   : > { %499 = vst.msk [vmem:[#allocation2 + $0x10] sm:$0xff] %vm496_vm4, %v441_v58 }
  0x9b   : > { %799 = vst.msk [vmem:[#allocation2] sm:$0xff] %vm798_vm7, %v739_v59  ;;  %1006 = vrot.lane.b32.xlu1 %v413_v56, %s3009_s25  ;;  %921 = vrot.lane.b32.xlu0 %v3157_v45, %s3008_s13 }
  0x9d   : > { %v825_v63 = vpop.permute.xlu1 %824  ;;  %v741_v0 = vpop.permute.xlu0 %740 }
  0x9e   : > { %885 = vst.msk [vmem:[#allocation2] sm:$0xff] %vm884_vm8, %v825_v63 }
  0x9f   : > { %800 = vst.msk [vmem:[#allocation2 + $0x8] sm:$0xff] %vm798_vm7, %v741_v0  ;;  %754 = vrot.lane.b32.xlu1 %v413_v56, %s3006_s11  ;;  %669 = vrot.lane.b32.xlu0 %v3157_v45, %s3003_s8  ;;  %v547_v45 = vsel %vm517_vm1, %v544_v61, %v546_v4  ;;  %v554_v61 = vrot.slane %v3234_v13, 2  ;;  %v556_v4 = vrot.slane %v321_v57, 2 }
  0xa1   : > { %v573_v3 = vpop.permute.xlu1 %572  ;;  %v443_v41 = vpop.permute.xlu0 %442 }
  0xa2   : > { %631 = vst.msk [vmem:[#allocation2 + $0x10] sm:$0xff] %vm628_vm5, %v573_v3 }
  0xa3   : > { %500 = vst.msk [vmem:[#allocation2 + $0x18] sm:$0xff] %vm496_vm4, %v443_v41  ;;  %1092 = vrot.lane.b32.xlu1 %v545_v1, %s3010_s30  ;;  %1008 = vrot.lane.b32.xlu0 %v415_v2, %s3009_s25 }
  0xa5   : > { %v908_v5 = vpop.permute.xlu1 %907  ;;  %v827_v6 = vpop.permute.xlu0 %826 }
  0xa6   : > { %968 = vst.msk [vmem:[#allocation2] sm:$0xff] %vm967_vm9, %v908_v5 }
  0xa7   : > { %886 = vst.msk [vmem:[#allocation2 + $0x8] sm:$0xff] %vm884_vm8, %v827_v6  ;;  %756 = vrot.lane.b32.xlu1 %v415_v2, %s3006_s11  ;;  %456 = vrot.lane.b32.xlu0 %v413_v56, %s3005_s10  ;;  %v423_v56 = vsel %vm385_vm2, %v421_v48, %v422_v50 }
  0xa9   : > { %v656_v7 = vpop.permute.xlu1 %655  ;;  %v575_v9 = vpop.permute.xlu0 %574 }
  0xaa   : > { %714 = vst.msk [vmem:[#allocation2 + $0x10] sm:$0xff] %vm711_vm6, %v656_v7 }
  0xab   : > { %632 = vst.msk [vmem:[#allocation2 + $0x18] sm:$0xff] %vm628_vm5, %v575_v9  ;;  %1094 = vrot.lane.b32.xlu1 %v547_v45, %s3010_s30  ;;  %840 = vrot.lane.b32.xlu0 %v545_v1, %s3007_s12 }
  0xad   : > { %v995_v10 = vpop.permute.xlu1 %994  ;;  %v910_v11 = vpop.permute.xlu0 %909 }
  0xae   : > { %1055 = vst.msk [vmem:[#allocation2] sm:$0xff] %vm1054_vm10, %v995_v10 }
  0xaf   : > { %969 = vst.msk [vmem:[#allocation2 + $0x8] sm:$0xff] %vm967_vm9, %v910_v11  ;;  %588 = vrot.lane.b32.xlu1 %v545_v1, %s3004_s9  ;;  %458 = vrot.lane.b32.xlu0 %v415_v2, %s3005_s10  ;;  %v555_v2 = vsel %vm517_vm1, %v553_v60, %v554_v61 }
  0xb1   : > { %v743_v12 = vpop.permute.xlu1 %742  ;;  %v658_v14 = vpop.permute.xlu0 %657 }
  0xb2   : > { %801 = vst.msk [vmem:[#allocation2 + $0x10] sm:$0xff] %vm798_vm7, %v743_v12 }
  0xb3   : > { %715 = vst.msk [vmem:[#allocation2 + $0x18] sm:$0xff] %vm711_vm6, %v658_v14  ;;  %923 = vrot.lane.b32.xlu1 %v3167_v49, %s3008_s13  ;;  %842 = vrot.lane.b32.xlu0 %v547_v45, %s3007_s12 }
  0xb5   : > { %v1081_v17 = vpop.permute.xlu1 %1080  ;;  %v997_v18 = vpop.permute.xlu0 %996 }
  0xb6   : > { %1141 = vst.msk [vmem:[#allocation2] sm:$0xff] %vm1140_vm11, %v1081_v17 }
  0xb7   : > { %1056 = vst.msk [vmem:[#allocation2 + $0x8] sm:$0xff] %vm1054_vm10, %v997_v18  ;;  %671 = vrot.lane.b32.xlu1 %v3167_v49, %s3003_s8  ;;  %590 = vrot.lane.b32.xlu0 %v547_v45, %s3004_s9  ;;  %v420_v49 = vsel %vm385_vm2, %v417_v16, %v419_v27  ;;  %v427_v16 = vrot.slane %v3273_v29, 1  ;;  %v429_v27 = vrot.slane %v324_v21, 1 }
  0xb9   : > { %v745_v22 = vpop.permute.xlu1 %744  ;;  %v445_v23 = vpop.permute.xlu0 %444 }
  0xba   : > { %802 = vst.msk [vmem:[#allocation2 + $0x18] sm:$0xff] %vm798_vm7, %v745_v22 }
  0xbb   : > { %501 = vst.msk [vmem:[#allocation2 + $0x20] sm:$0xff] %vm496_vm4, %v445_v23  ;;  %1010 = vrot.lane.b32.xlu1 %v418_v20, %s3009_s25  ;;  %925 = vrot.lane.b32.xlu0 %v3178_v54, %s3008_s13 }
  0xbd   : > { %v1083_v28 = vpop.permute.xlu1 %1082  ;;  %v829_v30 = vpop.permute.xlu0 %828  ;;  %v1161_v31 = vld [vmem:[#allocation2] sm:$0xff] }
  0xbe   : > { %1142 = vst.msk [vmem:[#allocation2 + $0x8] sm:$0xff] %vm1140_vm11, %v1083_v28  ;;  %2807 = vmatprep.mubr.msk.f32.mxu0 %vm1193_vm12, %v1161_v31 }
  0xbf   : > { %887 = vst.msk [vmem:[#allocation2 + $0x10] sm:$0xff] %vm884_vm8, %v829_v30  ;;  %758 = vrot.lane.b32.xlu1 %v418_v20, %s3006_s11  ;;  %673 = vrot.lane.b32.xlu0 %v3178_v54, %s3003_s8  ;;  %v552_v54 = vsel %vm517_vm1, %v549_v26, %v551_v35  ;;  %v559_v26 = vrot.slane %v3273_v29, 2 }
  0xc1   : > { %v577_v33 = vpop.permute.xlu1 %576  ;;  %v447_v34 = vpop.permute.xlu0 %446 }
  0xc2   : > { %633 = vst.msk [vmem:[#allocation2 + $0x20] sm:$0xff] %vm628_vm5, %v577_v33 }
  0xc3   : > { %502 = vst.msk [vmem:[#allocation2 + $0x28] sm:$0xff] %vm496_vm4, %v447_v34  ;;  %1096 = vrot.lane.b32.xlu1 %v550_v32, %s3010_s30  ;;  %1012 = vrot.lane.b32.xlu0 %v420_v49, %s3009_s25  ;;  %v561_v34 = vrot.slane %v324_v21, 2 }
  0xc5   : > { %v912_v36 = vpop.permute.xlu1 %911  ;;  %v831_v37 = vpop.permute.xlu0 %830  ;;  %v1162_v38 = vld [vmem:[#allocation2 + $0x8] sm:$0xff] }
  0xc6   : > { %970 = vst.msk [vmem:[#allocation2 + $0x10] sm:$0xff] %vm967_vm9, %v912_v36  ;;  %2808 = vmatmul.mubr.msk.f32.vlgmr.msra.gmra.mrb[0].mxu0 %vm1193_vm12, %v1162_v38 }
  0xc7   : > { %888 = vst.msk [vmem:[#allocation2 + $0x18] sm:$0xff] %vm884_vm8, %v831_v37  ;;  %760 = vrot.lane.b32.xlu1 %v420_v49, %s3006_s11  ;;  %460 = vrot.lane.b32.xlu0 %v418_v20, %s3005_s10  ;;  %v428_v20 = vsel %vm385_vm2, %v426_v15, %v427_v16 }
  0xc9   : > { %v660_v39 = vpop.permute.xlu1 %659  ;;  %v579_v40 = vpop.permute.xlu0 %578 }
  0xca   : > { %716 = vst.msk [vmem:[#allocation2 + $0x20] sm:$0xff] %vm711_vm6, %v660_v39 }
  0xcb   : > { %634 = vst.msk [vmem:[#allocation2 + $0x28] sm:$0xff] %vm628_vm5, %v579_v40  ;;  %1098 = vrot.lane.b32.xlu1 %v552_v54, %s3010_s30  ;;  %844 = vrot.lane.b32.xlu0 %v550_v32, %s3007_s12 }
  0xcd   : > { %v999_v42 = vpop.permute.xlu1 %998  ;;  %v914_v43 = vpop.permute.xlu0 %913 }
  0xce   : > { %1057 = vst.msk [vmem:[#allocation2 + $0x10] sm:$0xff] %vm1054_vm10, %v999_v42 }
  0xcf   : > { %971 = vst.msk [vmem:[#allocation2 + $0x18] sm:$0xff] %vm967_vm9, %v914_v43  ;;  %592 = vrot.lane.b32.xlu1 %v550_v32, %s3004_s9  ;;  %462 = vrot.lane.b32.xlu0 %v420_v49, %s3005_s10  ;;  %v560_v32 = vsel %vm517_vm1, %v558_v25, %v559_v26 }
  0xd1   : > { %v747_v44 = vpop.permute.xlu1 %746  ;;  %v662_v47 = vpop.permute.xlu0 %661 }
  0xd2   : > { %803 = vst.msk [vmem:[#allocation2 + $0x20] sm:$0xff] %vm798_vm7, %v747_v44  ;;  %v431_v44 = vrot.slane %v3301_v46, 1 }
  0xd3   : > { %717 = vst.msk [vmem:[#allocation2 + $0x28] sm:$0xff] %vm711_vm6, %v662_v47  ;;  %927 = vrot.lane.b32.xlu1 %v3223_v8, %s3008_s13  ;;  %846 = vrot.lane.b32.xlu0 %v552_v54, %s3007_s12  ;;  %v432_v47 = vrot.slane %v3316_v55, 1 }
  0xd5   : > { %v1085_v51 = vpop.permute.xlu1 %1084  ;;  %v1001_v52 = vpop.permute.xlu0 %1000 }
  0xd6   : > { %1143 = vst.msk [vmem:[#allocation2 + $0x10] sm:$0xff] %vm1140_vm11, %v1085_v51  ;;  %v291_v51 = vld [vmem:[%s3082_s7 + $0xe8] sm:$0x3] }
  0xd7   : > { %1058 = vst.msk [vmem:[#allocation2 + $0x18] sm:$0xff] %vm1054_vm10, %v1001_v52  ;;  %675 = vrot.lane.b32.xlu1 %v3223_v8, %s3003_s8  ;;  %594 = vrot.lane.b32.xlu0 %v552_v54, %s3004_s9  ;;  %v425_v8 = vsel %vm385_vm2, %v422_v50, %v424_v62  ;;  %v433_v52 = vsel %vm385_vm2, %v431_v44, %v432_v47  ;;  %v327_v53 = vmax.f32 %v291_v51, 0.0 }
  0xd9   : > { %v749_v58 = vpop.permute.xlu1 %748  ;;  %v449_v59 = vpop.permute.xlu0 %448  ;;  %v434_v60 = vrot.slane %v327_v53, 1 }
  0xda   : > { %804 = vst.msk [vmem:[#allocation2 + $0x28] sm:$0xff] %vm798_vm7, %v749_v58  ;;  %v563_v58 = vrot.slane %v3301_v46, 2 }
  0xdb   : > { %503 = vst.msk [vmem:[#allocation2 + $0x30] sm:$0xff] %vm496_vm4, %v449_v59  ;;  %1014 = vrot.lane.b32.xlu1 %v423_v56, %s3009_s25  ;;  %929 = vrot.lane.b32.xlu0 %v3234_v13, %s3008_s13  ;;  %v564_v59 = vrot.slane %v3316_v55, 2 }
  0xdd   : > { %v1087_v63 = vpop.permute.xlu1 %1086  ;;  %v833_v0 = vpop.permute.xlu0 %832  ;;  %v1163_v1 = vld [vmem:[#allocation2 + $0x10] sm:$0xff] }
  0xde   : > { %1144 = vst.msk [vmem:[#allocation2 + $0x18] sm:$0xff] %vm1140_vm11, %v1087_v63  ;;  %2810 = vmatprep.mubr.msk.f32.mxu0 %vm1193_vm12, %v1163_v1  ;;  %v3011_v1 = vmov 0.0  }
  0xdf   : > { %889 = vst.msk [vmem:[#allocation2 + $0x20] sm:$0xff] %vm884_vm8, %v833_v0  ;;  %762 = vrot.lane.b32.xlu1 %v423_v56, %s3006_s11  ;;  %677 = vrot.lane.b32.xlu0 %v3234_v13, %s3003_s8  ;;  %v557_v13 = vsel %vm517_vm1, %v554_v61, %v556_v4  ;;  %v435_v0 = vsel %vm385_vm2, %v432_v47, %v434_v60 }
  0xe0   : > { %1543 = vst.msk [vmem:[#allocation3 + $0x11] sm:$0x1] %vm1532_vm13, %v3011_v1  ;;  %1533 = vst.msk [vmem:[#allocation3] sm:$0x1] %vm1532_vm13, %v3011_v1 }
  0xe1   : > { %v581_v3 = vpop.permute.xlu1 %580  ;;  %v451_v41 = vpop.permute.xlu0 %450  ;;  %1534 = vst.msk [vmem:[#allocation3 + $0x18] sm:$0x1] %vm1532_vm13, %v3011_v1  ;;  %1535 = vst.msk [vmem:[#allocation3 + $0x30] sm:$0x1] %vm1532_vm13, %v3011_v1 }
  0xe2   : > { %635 = vst.msk [vmem:[#allocation2 + $0x30] sm:$0xff] %vm628_vm5, %v581_v3 }
  0xe3   : > { %504 = vst.msk [vmem:[#allocation2 + $0x38] sm:$0xff] %vm496_vm4, %v451_v41  ;;  %1100 = vrot.lane.b32.xlu1 %v555_v2, %s3010_s30  ;;  %1016 = vrot.lane.b32.xlu0 %v425_v8, %s3009_s25 }
  0xe4   : > { %1536 = vst.msk [vmem:[#allocation3 + $0x48] sm:$0x1] %vm1532_vm13, %v3011_v1  ;;  %1537 = vst.msk [vmem:[#allocation3 + $0x60] sm:$0x1] %vm1532_vm13, %v3011_v1 }
  0xe5   : > { %v916_v5 = vpop.permute.xlu1 %915  ;;  %v835_v6 = vpop.permute.xlu0 %834  ;;  %v1164_v45 = vld [vmem:[#allocation2 + $0x18] sm:$0xff]  ;;  %1538 = vst.msk [vmem:[#allocation3 + $0x78] sm:$0x1] %vm1532_vm13, %v3011_v1  ;;  %1539 = vst.msk [vmem:[#allocation3 + $0x90] sm:$0x1] %vm1532_vm13, %v3011_v1 }
  0xe6   : > { %972 = vst.msk [vmem:[#allocation2 + $0x20] sm:$0xff] %vm967_vm9, %v916_v5  ;;  %2811 = vmatmul.mubr.msk.f32.gmra.mrb[2].mxu0 %vm1193_vm12, %v1164_v45 }
  0xe7   : > { %890 = vst.msk [vmem:[#allocation2 + $0x28] sm:$0xff] %vm884_vm8, %v835_v6  ;;  %764 = vrot.lane.b32.xlu1 %v425_v8, %s3006_s11  ;;  %464 = vrot.lane.b32.xlu0 %v423_v56, %s3005_s10 }
  0xe8   : > { %1540 = vst.msk [vmem:[#allocation3 + $0xa8] sm:$0x1] %vm1532_vm13, %v3011_v1  ;;  %1541 = vst.msk [vmem:[#allocation3 + $0xc0] sm:$0x1] %vm1532_vm13, %v3011_v1 }
  0xe9   : > { %v664_v7 = vpop.permute.xlu1 %663  ;;  %v583_v9 = vpop.permute.xlu0 %582  ;;  %1542 = vst.msk [vmem:[#allocation3 + $0xd8] sm:$0x1] %vm1532_vm13, %v3011_v1  ;;  %1544 = vst.msk [vmem:[#allocation3 + $0x29] sm:$0x1] %vm1532_vm13, %v3011_v1 }
  0xea   : > { %718 = vst.msk [vmem:[#allocation2 + $0x30] sm:$0xff] %vm711_vm6, %v664_v7 }
  0xeb   : > { %636 = vst.msk [vmem:[#allocation2 + $0x38] sm:$0xff] %vm628_vm5, %v583_v9  ;;  %1102 = vrot.lane.b32.xlu1 %v557_v13, %s3010_s30  ;;  %848 = vrot.lane.b32.xlu0 %v555_v2, %s3007_s12 }
  0xec   : > { %1545 = vst.msk [vmem:[#allocation3 + $0x41] sm:$0x1] %vm1532_vm13, %v3011_v1  ;;  %1546 = vst.msk [vmem:[#allocation3 + $0x59] sm:$0x1] %vm1532_vm13, %v3011_v1 }
  0xed   : > { %v1003_v10 = vpop.permute.xlu1 %1002  ;;  %v918_v11 = vpop.permute.xlu0 %917  ;;  %1547 = vst.msk [vmem:[#allocation3 + $0x71] sm:$0x1] %vm1532_vm13, %v3011_v1  ;;  %1548 = vst.msk [vmem:[#allocation3 + $0x89] sm:$0x1] %vm1532_vm13, %v3011_v1 }
  0xee   : > { %1059 = vst.msk [vmem:[#allocation2 + $0x20] sm:$0xff] %vm1054_vm10, %v1003_v10 }
  0xef   : > { %973 = vst.msk [vmem:[#allocation2 + $0x28] sm:$0xff] %vm967_vm9, %v918_v11  ;;  %596 = vrot.lane.b32.xlu1 %v555_v2, %s3004_s9  ;;  %466 = vrot.lane.b32.xlu0 %v425_v8, %s3005_s10  ;;  %v566_v8 = vrot.slane %v327_v53, 2  ;;  %v293_v11 = vld [vmem:[%s3082_s7 + $0xf8] sm:$0xff] }
  0xf0   : > { %1549 = vst.msk [vmem:[#allocation3 + $0xa1] sm:$0x1] %vm1532_vm13, %v3011_v1  ;;  %1550 = vst.msk [vmem:[#allocation3 + $0xb9] sm:$0x1] %vm1532_vm13, %v3011_v1  ;;  %v329_v15 = vmax.f32 %v293_v11, 0.0 }
  0xf1   : > { %v751_v12 = vpop.permute.xlu1 %750  ;;  %v666_v14 = vpop.permute.xlu0 %665  ;;  %1551 = vst.msk [vmem:[#allocation3 + $0xd1] sm:$0x1] %vm1532_vm13, %v3011_v1  ;;  %1552 = vst.msk [vmem:[#allocation3 + $0xe9] sm:$0x1] %vm1532_vm13, %v3011_v1  ;;  %v567_v5 = vsel %vm517_vm1, %v564_v59, %v566_v8 }
  0xf2   : > { %805 = vst.msk [vmem:[#allocation2 + $0x30] sm:$0xff] %vm798_vm7, %v751_v12 }
  0xf3   : > { %719 = vst.msk [vmem:[#allocation2 + $0x38] sm:$0xff] %vm711_vm6, %v666_v14  ;;  %931 = vrot.lane.b32.xlu1 %v3262_v24, %s3008_s13  ;;  %850 = vrot.lane.b32.xlu0 %v557_v13, %s3007_s12 }
  0xf5   : > { %v1089_v17 = vpop.permute.xlu1 %1088  ;;  %v1005_v18 = vpop.permute.xlu0 %1004 }
  0xf6   : > { %1145 = vst.msk [vmem:[#allocation2 + $0x20] sm:$0xff] %vm1140_vm11, %v1089_v17  ;;  %v734_v17 = vrot.slane %v329_v15, 1 }
  0xf7   : > { %1060 = vst.msk [vmem:[#allocation2 + $0x28] sm:$0xff] %vm1054_vm10, %v1005_v18  ;;  %679 = vrot.lane.b32.xlu1 %v3262_v24, %s3003_s8  ;;  %598 = vrot.lane.b32.xlu0 %v557_v13, %s3004_s9  ;;  %v430_v24 = vsel %vm385_vm2, %v427_v16, %v429_v27  ;;  %v292_v13 = vld [vmem:[%s3082_s7 + $0xf0] sm:$0xff] }
  0xf8   : > { %v328_v10 = vmax.f32 %v292_v13, 0.0 }
  0xf9   : > { %v753_v22 = vpop.permute.xlu1 %752  ;;  %v453_v23 = vpop.permute.xlu0 %452 }
  0xfa   : > { %806 = vst.msk [vmem:[#allocation2 + $0x38] sm:$0xff] %vm798_vm7, %v753_v22  ;;  %v733_v16 = vrot.slane %v328_v10, 1  ;;  %v819_v27 = vrot.slane %v328_v10, 2 }
  0xfb   : > { %505 = vst.msk [vmem:[#allocation2 + $0x40] sm:$0xff] %vm496_vm4, %v453_v23  ;;  %1018 = vrot.lane.b32.xlu1 %v428_v20, %s3009_s25  ;;  %933 = vrot.lane.b32.xlu0 %v3273_v29, %s3008_s13 }
  0xfc   : > { %v735_v21 = vsel %vm385_vm2, %v733_v16, %v734_v17 }
  0xfd   : > { %v1091_v28 = vpop.permute.xlu1 %1090  ;;  %v837_v30 = vpop.permute.xlu0 %836  ;;  %v1165_v31 = vld [vmem:[#allocation2 + $0x20] sm:$0xff] }
  0xfe   : > { %1146 = vst.msk [vmem:[#allocation2 + $0x28] sm:$0xff] %vm1140_vm11, %v1091_v28  ;;  %2813 = vmatprep.mubr.msk.f32.mxu0 %vm1193_vm12, %v1165_v31  ;;  %v820_v28 = vrot.slane %v329_v15, 2 }
  0xff   : > { %891 = vst.msk [vmem:[#allocation2 + $0x30] sm:$0xff] %vm884_vm8, %v837_v30  ;;  %766 = vrot.lane.b32.xlu1 %v428_v20, %s3006_s11  ;;  %681 = vrot.lane.b32.xlu0 %v3273_v29, %s3003_s8  ;;  %v562_v29 = vsel %vm517_vm1, %v559_v26, %v561_v34 }
 0x101   : > { %v585_v49 = vpop.permute.xlu1 %584  ;;  %v455_v33 = vpop.permute.xlu0 %454 }
 0x102   : > { %637 = vst.msk [vmem:[#allocation2 + $0x40] sm:$0xff] %vm628_vm5, %v585_v49  ;;  %v821_v49 = vsel %vm517_vm1, %v819_v27, %v820_v28 }
 0x103   : > { %506 = vst.msk [vmem:[#allocation2 + $0x48] sm:$0xff] %vm496_vm4, %v455_v33  ;;  %1104 = vrot.lane.b32.xlu1 %v560_v32, %s3010_s30  ;;  %1020 = vrot.lane.b32.xlu0 %v430_v24, %s3009_s25 }
 0x105   : > { %v920_v35 = vpop.permute.xlu1 %919  ;;  %v839_v36 = vpop.permute.xlu0 %838  ;;  %v1166_v37 = vld [vmem:[#allocation2 + $0x28] sm:$0xff] }
 0x106   : > { %974 = vst.msk [vmem:[#allocation2 + $0x30] sm:$0xff] %vm967_vm9, %v920_v35  ;;  %2814 = vmatmul.mubr.msk.f32.gmra.mrb[4].mxu0 %vm1193_vm12, %v1166_v37  ;;  %v296_v37 = vld [vmem:[%s3082_s7 + $0x110] sm:$0xff] }
 0x107   : > { %892 = vst.msk [vmem:[#allocation2 + $0x38] sm:$0xff] %vm884_vm8, %v839_v36  ;;  %768 = vrot.lane.b32.xlu1 %v430_v24, %s3006_s11  ;;  %468 = vrot.lane.b32.xlu0 %v428_v20, %s3005_s10  ;;  %v294_v20 = vld [vmem:[%s3082_s7 + $0x100] sm:$0x3]  ;;  %v295_v36 = vld [vmem:[%s3082_s7 + $0x108] sm:$0xff] }
 0x108   : > { %v330_v22 = vmax.f32 %v294_v20, 0.0 }
 0x109   : > { %v668_v38 = vpop.permute.xlu1 %667  ;;  %v587_v54 = vpop.permute.xlu0 %586 }
 0x10a   : > { %720 = vst.msk [vmem:[#allocation2 + $0x40] sm:$0xff] %vm711_vm6, %v668_v38  ;;  %v736_v26 = vrot.slane %v330_v22, 1  ;;  %v822_v35 = vrot.slane %v330_v22, 2 }
 0x10b   : > { %638 = vst.msk [vmem:[#allocation2 + $0x48] sm:$0xff] %vm628_vm5, %v587_v54  ;;  %1106 = vrot.lane.b32.xlu1 %v562_v29, %s3010_s30  ;;  %852 = vrot.lane.b32.xlu0 %v560_v32, %s3007_s12 }
 0x10d   : > { %v1007_v39 = vpop.permute.xlu1 %1006  ;;  %v922_v40 = vpop.permute.xlu0 %921 }
 0x10e   : > { %1061 = vst.msk [vmem:[#allocation2 + $0x30] sm:$0xff] %vm1054_vm10, %v1007_v39  ;;  %v297_v39 = vld [vmem:[%s3082_s7 + $0x118] sm:$0x3] }
 0x10f   : > { %975 = vst.msk [vmem:[#allocation2 + $0x38] sm:$0xff] %vm967_vm9, %v922_v40  ;;  %600 = vrot.lane.b32.xlu1 %v560_v32, %s3004_s9  ;;  %470 = vrot.lane.b32.xlu0 %v430_v24, %s3005_s10  ;;  %v737_v24 = vsel %vm385_vm2, %v734_v17, %v736_v26  ;;  %v331_v40 = vmax.f32 %v295_v36, 0.0  ;;  %v333_v44 = vmax.f32 %v297_v39, 0.0 }
 0x111   : > { %v755_v42 = vpop.permute.xlu1 %754  ;;  %v670_v43 = vpop.permute.xlu0 %669 }
 0x112   : > { %807 = vst.msk [vmem:[#allocation2 + $0x40] sm:$0xff] %vm798_vm7, %v755_v42  ;;  %v332_v42 = vmax.f32 %v296_v37, 0.0 }
 0x113   : > { %721 = vst.msk [vmem:[#allocation2 + $0x48] sm:$0xff] %vm711_vm6, %v670_v43  ;;  %935 = vrot.lane.b32.xlu1 %v3301_v46, %s3008_s13  ;;  %854 = vrot.lane.b32.xlu0 %v562_v29, %s3007_s12  ;;  %v823_v43 = vsel %vm517_vm1, %v820_v28, %v822_v35 }
 0x114   : > { %v990_v51 = vrot.slane %v332_v42, 1  ;;  %v1076_v60 = vrot.slane %v332_v42, 2 }
 0x115   : > { %v1093_v48 = vpop.permute.xlu1 %1092  ;;  %v1009_v50 = vpop.permute.xlu0 %1008 }
 0x116   : > { %1147 = vst.msk [vmem:[#allocation2 + $0x30] sm:$0xff] %vm1140_vm11, %v1093_v48 }
 0x117   : > { %1062 = vst.msk [vmem:[#allocation2 + $0x38] sm:$0xff] %vm1054_vm10, %v1009_v50  ;;  %683 = vrot.lane.b32.xlu1 %v3301_v46, %s3003_s8  ;;  %602 = vrot.lane.b32.xlu0 %v562_v29, %s3004_s9  ;;  %v565_v46 = vsel %vm517_vm1, %v563_v58, %v564_v59  ;;  %v989_v50 = vrot.slane %v331_v40, 1  ;;  %v1075_v59 = vrot.slane %v331_v40, 2 }
 0x119   : > { %v757_v56 = vpop.permute.xlu1 %756  ;;  %v457_v57 = vpop.permute.xlu0 %456 }
 0x11a   : > { %808 = vst.msk [vmem:[#allocation2 + $0x48] sm:$0xff] %vm798_vm7, %v757_v56 }
 0x11b   : > { %507 = vst.msk [vmem:[#allocation2 + $0x50] sm:$0xff] %vm496_vm4, %v457_v57  ;;  %1022 = vrot.lane.b32.xlu1 %v433_v52, %s3009_s25  ;;  %937 = vrot.lane.b32.xlu0 %v3316_v55, %s3008_s13  ;;  %v991_v57 = vsel %vm385_vm2, %v989_v50, %v990_v51 }
 0x11d   : > { %v1095_v61 = vpop.permute.xlu1 %1094  ;;  %v841_v62 = vpop.permute.xlu0 %840  ;;  %v1167_v63 = vld [vmem:[#allocation2 + $0x30] sm:$0xff] }
 0x11e   : > { %1148 = vst.msk [vmem:[#allocation2 + $0x38] sm:$0xff] %vm1140_vm11, %v1095_v61  ;;  %2816 = vmatprep.mubr.msk.f32.mxu0 %vm1193_vm12, %v1167_v63  ;;  %v1078_v61 = vrot.slane %v333_v44, 2 }
 0x11f   : > { %893 = vst.msk [vmem:[#allocation2 + $0x40] sm:$0xff] %vm884_vm8, %v841_v62  ;;  %770 = vrot.lane.b32.xlu1 %v433_v52, %s3006_s11  ;;  %685 = vrot.lane.b32.xlu0 %v3316_v55, %s3003_s8 }
 0x121   : > { %v589_v55 = vpop.permute.xlu1 %588  ;;  %v459_v2 = vpop.permute.xlu0 %458 }
 0x122   : > { %639 = vst.msk [vmem:[#allocation2 + $0x50] sm:$0xff] %vm628_vm5, %v589_v55 }
 0x123   : > { %508 = vst.msk [vmem:[#allocation2 + $0x58] sm:$0xff] %vm496_vm4, %v459_v2  ;;  %1108 = vrot.lane.b32.xlu1 %v565_v46, %s3010_s30  ;;  %1024 = vrot.lane.b32.xlu0 %v435_v0, %s3009_s25 }
 0x125   : > { %v924_v3 = vpop.permute.xlu1 %923  ;;  %v843_v41 = vpop.permute.xlu0 %842  ;;  %v1168_v4 = vld [vmem:[#allocation2 + $0x38] sm:$0xff] }
 0x126   : > { %976 = vst.msk [vmem:[#allocation2 + $0x40] sm:$0xff] %vm967_vm9, %v924_v3  ;;  %2817 = vmatmul.mubr.msk.f32.gmra.mrb[6].mxu0 %vm1193_vm12, %v1168_v4 }
 0x127   : > { %894 = vst.msk [vmem:[#allocation2 + $0x48] sm:$0xff] %vm884_vm8, %v843_v41  ;;  %772 = vrot.lane.b32.xlu1 %v435_v0, %s3006_s11  ;;  %472 = vrot.lane.b32.xlu0 %v433_v52, %s3005_s10  ;;  %v992_v52 = vrot.slane %v333_v44, 1 }
 0x129   : > { %v672_v6 = vpop.permute.xlu1 %671  ;;  %v591_v45 = vpop.permute.xlu0 %590  ;;  %v993_v58 = vsel %vm385_vm2, %v990_v51, %v992_v52 }
 0x12a   : > { %722 = vst.msk [vmem:[#allocation2 + $0x50] sm:$0xff] %vm711_vm6, %v672_v6 }
 0x12b   : > { %640 = vst.msk [vmem:[#allocation2 + $0x58] sm:$0xff] %vm628_vm5, %v591_v45  ;;  %1110 = vrot.lane.b32.xlu1 %v567_v5, %s3010_s30  ;;  %856 = vrot.lane.b32.xlu0 %v565_v46, %s3007_s12 }
 0x12d   : > { %v1011_v7 = vpop.permute.xlu1 %1010  ;;  %v926_v9 = vpop.permute.xlu0 %925 }
 0x12e   : > { %1063 = vst.msk [vmem:[#allocation2 + $0x40] sm:$0xff] %vm1054_vm10, %v1011_v7 }
 0x12f   : > { %977 = vst.msk [vmem:[#allocation2 + $0x48] sm:$0xff] %vm967_vm9, %v926_v9  ;;  %474 = vrot.lane.b32.xlu0 %v435_v0, %s3005_s10  ;;  %604 = vrot.lane.b32.xlu1 %v565_v46, %s3004_s9  ;;  %v1077_v46 = vsel %vm517_vm1, %v1075_v59, %v1076_v60  ;;  %v1079_v0 = vsel %vm517_vm1, %v1076_v60, %v1078_v61 }
 0x131   : > { %v759_v12 = vpop.permute.xlu1 %758  ;;  %v674_v14 = vpop.permute.xlu0 %673 }
 0x132   : > { %809 = vst.msk [vmem:[#allocation2 + $0x50] sm:$0xff] %vm798_vm7, %v759_v12 }
 0x133   : > { %723 = vst.msk [vmem:[#allocation2 + $0x58] sm:$0xff] %vm711_vm6, %v674_v14  ;;  %858 = vrot.lane.b32.xlu0 %v567_v5, %s3007_s12  ;;  %939 = vrot.lane.b32.xlu1 %v328_v10, %s3008_s13 }
 0x135   : > { %v1097_v18 = vpop.permute.xlu1 %1096  ;;  %v1013_v19 = vpop.permute.xlu0 %1012 }
 0x136   : > { %1149 = vst.msk [vmem:[#allocation2 + $0x40] sm:$0xff] %vm1140_vm11, %v1097_v18 }
 0x137   : > { %1064 = vst.msk [vmem:[#allocation2 + $0x48] sm:$0xff] %vm1054_vm10, %v1013_v19  ;;  %606 = vrot.lane.b32.xlu0 %v567_v5, %s3004_s9  ;;  %687 = vrot.lane.b32.xlu1 %v328_v10, %s3003_s8 }
 0x139   : > { %v761_v23 = vpop.permute.xlu1 %760  ;;  %v461_v25 = vpop.permute.xlu0 %460 }
 0x13a   : > { %810 = vst.msk [vmem:[#allocation2 + $0x58] sm:$0xff] %vm798_vm7, %v761_v23 }
 0x13b   : > { %509 = vst.msk [vmem:[#allocation2 + $0x60] sm:$0xff] %vm496_vm4, %v461_v25  ;;  %941 = vrot.lane.b32.xlu0 %v329_v15, %s3008_s13  ;;  %1026 = vrot.lane.b32.xlu1 %v735_v21, %s3009_s25 }
 0x13d   : > { %v1099_v30 = vpop.permute.xlu1 %1098  ;;  %v845_v31 = vpop.permute.xlu0 %844  ;;  %v1169_v32 = vld [vmem:[#allocation2 + $0x40] sm:$0xff] }
 0x13e   : > { %1150 = vst.msk [vmem:[#allocation2 + $0x48] sm:$0xff] %vm1140_vm11, %v1099_v30  ;;  %2819 = vmatprep.mubr.msk.f32.mxu0 %vm1193_vm12, %v1169_v32 }
 0x13f   : > { %895 = vst.msk [vmem:[#allocation2 + $0x50] sm:$0xff] %vm884_vm8, %v845_v31  ;;  %689 = vrot.lane.b32.xlu0 %v329_v15, %s3003_s8  ;;  %774 = vrot.lane.b32.xlu1 %v735_v21, %s3006_s11 }
 0x141   : > { %v593_v33 = vpop.permute.xlu1 %592  ;;  %v463_v34 = vpop.permute.xlu0 %462 }
 0x142   : > { %641 = vst.msk [vmem:[#allocation2 + $0x60] sm:$0xff] %vm628_vm5, %v593_v33 }
 0x143   : > { %510 = vst.msk [vmem:[#allocation2 + $0x68] sm:$0xff] %vm496_vm4, %v463_v34  ;;  %1028 = vrot.lane.b32.xlu0 %v737_v24, %s3009_s25  ;;  %1112 = vrot.lane.b32.xlu1 %v821_v49, %s3010_s30  ;;  %v3656_v34 = vstv %s2721_s15 }
 0x144   : > { %v2722_v37 = vadd.s32 4294967295, %v3656_v34 }
 0x145   : > { %v928_v29 = vpop.permute.xlu1 %927  ;;  %v847_v38 = vpop.permute.xlu0 %846  ;;  %v1170_v54 = vld [vmem:[#allocation2 + $0x48] sm:$0xff] }
 0x146   : > { %978 = vst.msk [vmem:[#allocation2 + $0x50] sm:$0xff] %vm967_vm9, %v928_v29  ;;  %2820 = vmatmul.mubr.msk.f32.gmra.mrb[8].mxu0 %vm1193_vm12, %v1170_v54  ;;  %v3664_v29 = vld [vmem:[%s4231_s2] ss:$0 sm:$0xff]  ;;  %vm1462_vm14 = vcmp.ge.s32.totalorder %v2722_v37, 0  ;;  %vm1472_vm15 = vcmp.lt.s32.totalorder %v2722_v37, 16 }
 0x147   : > { %896 = vst.msk [vmem:[#allocation2 + $0x58] sm:$0xff] %vm884_vm8, %v847_v38  ;;  %776 = vrot.lane.b32.xlu0 %v737_v24, %s3006_s11  ;;  %860 = vrot.lane.b32.xlu1 %v821_v49, %s3007_s12  ;;  %vm1482_vm13 = vmand %vm1462_vm14, %vm1472_vm15  ;;  %vm1463_vm14 = vcmp.ge.s32.totalorder %v3656_v34, 0  ;;  %vm1473_vm15 = vcmp.lt.s32.totalorder %v3656_v34, 16 }
 0x149   : > { %v676_v47 = vpop.permute.xlu1 %675  ;;  %v595_v48 = vpop.permute.xlu0 %594 }
 0x14a   : > { %724 = vst.msk [vmem:[#allocation2 + $0x60] sm:$0xff] %vm711_vm6, %v676_v47 }
 0x14b   : > { %642 = vst.msk [vmem:[#allocation2 + $0x68] sm:$0xff] %vm628_vm5, %v595_v48  ;;  %1114 = vrot.lane.b32.xlu0 %v823_v43, %s3010_s30  ;;  %862 = vrot.lane.b32.xlu1 %v823_v43, %s3007_s12 }
 0x14d   : > { %v1015_v53 = vpop.permute.xlu1 %1014  ;;  %v930_v56 = vpop.permute.xlu0 %929 }
 0x14e   : > { %1065 = vst.msk [vmem:[#allocation2 + $0x50] sm:$0xff] %vm1054_vm10, %v1015_v53 }
 0x14f   : > { %979 = vst.msk [vmem:[#allocation2 + $0x58] sm:$0xff] %vm967_vm9, %v930_v56  ;;  %943 = vrot.lane.b32.xlu0 %v331_v40, %s3008_s13  ;;  %945 = vrot.lane.b32.xlu1 %v332_v42, %s3008_s13 }
 0x151   : > { %v763_v62 = vpop.permute.xlu1 %762  ;;  %v678_v63 = vpop.permute.xlu0 %677 }
 0x152   : > { %811 = vst.msk [vmem:[#allocation2 + $0x60] sm:$0xff] %vm798_vm7, %v763_v62 }
 0x153   : > { %725 = vst.msk [vmem:[#allocation2 + $0x68] sm:$0xff] %vm711_vm6, %v678_v63  ;;  %1030 = vrot.lane.b32.xlu0 %v991_v57, %s3009_s25  ;;  %1032 = vrot.lane.b32.xlu1 %v993_v58, %s3009_s25 }
 0x155   : > { %v1101_v1 = vpop.permute.xlu1 %1100  ;;  %v1017_v55 = vpop.permute.xlu0 %1016 }
 0x156   : > { %1151 = vst.msk [vmem:[#allocation2 + $0x50] sm:$0xff] %vm1140_vm11, %v1101_v1 }
 0x157   : > { %1066 = vst.msk [vmem:[#allocation2 + $0x58] sm:$0xff] %vm1054_vm10, %v1017_v55  ;;  %1116 = vrot.lane.b32.xlu0 %v1077_v46, %s3010_s30  ;;  %1118 = vrot.lane.b32.xlu1 %v1079_v0, %s3010_s30 }
 0x159   : > { %v765_v2 = vpop.permute.xlu1 %764  ;;  %v465_v8 = vpop.permute.xlu0 %464 }
 0x15a   : > { %812 = vst.msk [vmem:[#allocation2 + $0x68] sm:$0xff] %vm798_vm7, %v765_v2 }
 0x15b   : > { %511 = vst.msk [vmem:[#allocation2 + $0x70] sm:$0xff] %vm496_vm4, %v465_v8 }
 0x15d   : > { %v1103_v3 = vpop.permute.xlu1 %1102  ;;  %v849_v41 = vpop.permute.xlu0 %848  ;;  %v1171_v4 = vld [vmem:[#allocation2 + $0x50] sm:$0xff] }
 0x15e   : > { %1152 = vst.msk [vmem:[#allocation2 + $0x58] sm:$0xff] %vm1140_vm11, %v1103_v3  ;;  %2822 = vmatprep.mubr.msk.f32.mxu0 %vm1193_vm12, %v1171_v4 }
 0x15f   : > { %897 = vst.msk [vmem:[#allocation2 + $0x60] sm:$0xff] %vm884_vm8, %v849_v41 }
 0x161   : > { %v597_v5 = vpop.permute.xlu1 %596  ;;  %v467_v6 = vpop.permute.xlu0 %466 }
 0x162   : > { %643 = vst.msk [vmem:[#allocation2 + $0x70] sm:$0xff] %vm628_vm5, %v597_v5 }
 0x163   : > { %512 = vst.msk [vmem:[#allocation2 + $0x78] sm:$0xff] %vm496_vm4, %v467_v6 }
 0x165   : > { %v932_v45 = vpop.permute.xlu1 %931  ;;  %v851_v13 = vpop.permute.xlu0 %850  ;;  %v1172_v7 = vld [vmem:[#allocation2 + $0x58] sm:$0xff] }
 0x166   : > { %980 = vst.msk [vmem:[#allocation2 + $0x60] sm:$0xff] %vm967_vm9, %v932_v45  ;;  %2823 = vmatmul.mubr.msk.f32.gmra.mrb[10].mxu0 %vm1193_vm12, %v1172_v7 }
 0x167   : > { %898 = vst.msk [vmem:[#allocation2 + $0x68] sm:$0xff] %vm884_vm8, %v851_v13 }
 0x169   : > { %v680_v9 = vpop.permute.xlu1 %679  ;;  %v599_v10 = vpop.permute.xlu0 %598 }
 0x16a   : > { %726 = vst.msk [vmem:[#allocation2 + $0x70] sm:$0xff] %vm711_vm6, %v680_v9 }
 0x16b   : > { %644 = vst.msk [vmem:[#allocation2 + $0x78] sm:$0xff] %vm628_vm5, %v599_v10 }
 0x16d   : > { %v1019_v11 = vpop.permute.xlu1 %1018  ;;  %v934_v12 = vpop.permute.xlu0 %933 }
 0x16e   : > { %1067 = vst.msk [vmem:[#allocation2 + $0x60] sm:$0xff] %vm1054_vm10, %v1019_v11 }
 0x16f   : > { %981 = vst.msk [vmem:[#allocation2 + $0x68] sm:$0xff] %vm967_vm9, %v934_v12 }
 0x171   : > { %v767_v14 = vpop.permute.xlu1 %766  ;;  %v682_v15 = vpop.permute.xlu0 %681 }
 0x172   : > { %813 = vst.msk [vmem:[#allocation2 + $0x70] sm:$0xff] %vm798_vm7, %v767_v14 }
 0x173   : > { %727 = vst.msk [vmem:[#allocation2 + $0x78] sm:$0xff] %vm711_vm6, %v682_v15 }
 0x175   : > { %v1105_v16 = vpop.permute.xlu1 %1104  ;;  %v1021_v17 = vpop.permute.xlu0 %1020 }
 0x176   : > { %1153 = vst.msk [vmem:[#allocation2 + $0x60] sm:$0xff] %vm1140_vm11, %v1105_v16 }
 0x177   : > { %1068 = vst.msk [vmem:[#allocation2 + $0x68] sm:$0xff] %vm1054_vm10, %v1021_v17 }
 0x179   : > { %v769_v18 = vpop.permute.xlu1 %768  ;;  %v469_v19 = vpop.permute.xlu0 %468 }
 0x17a   : > { %814 = vst.msk [vmem:[#allocation2 + $0x78] sm:$0xff] %vm798_vm7, %v769_v18 }
 0x17b   : > { %513 = vst.msk [vmem:[#allocation2 + $0x80] sm:$0xff] %vm496_vm4, %v469_v19 }
 0x17d   : > { %v1107_v20 = vpop.permute.xlu1 %1106  ;;  %v853_v21 = vpop.permute.xlu0 %852  ;;  %v1173_v22 = vld [vmem:[#allocation2 + $0x60] sm:$0xff] }
 0x17e   : > { %1154 = vst.msk [vmem:[#allocation2 + $0x68] sm:$0xff] %vm1140_vm11, %v1107_v20  ;;  %2825 = vmatprep.mubr.msk.f32.mxu0 %vm1193_vm12, %v1173_v22 }
 0x17f   : > { %899 = vst.msk [vmem:[#allocation2 + $0x70] sm:$0xff] %vm884_vm8, %v853_v21 }
 0x181   : > { %v601_v23 = vpop.permute.xlu1 %600  ;;  %v471_v25 = vpop.permute.xlu0 %470 }
 0x182   : > { %645 = vst.msk [vmem:[#allocation2 + $0x80] sm:$0xff] %vm628_vm5, %v601_v23 }
 0x183   : > { %514 = vst.msk [vmem:[#allocation2 + $0x88] sm:$0xff] %vm496_vm4, %v471_v25 }
 0x185   : > { %v936_v26 = vpop.permute.xlu1 %935  ;;  %v855_v27 = vpop.permute.xlu0 %854  ;;  %v1174_v28 = vld [vmem:[#allocation2 + $0x68] sm:$0xff] }
 0x186   : > { %982 = vst.msk [vmem:[#allocation2 + $0x70] sm:$0xff] %vm967_vm9, %v936_v26  ;;  %2826 = vmatmul.mubr.msk.f32.gmra.mrb[12].mxu0 %vm1193_vm12, %v1174_v28 }
 0x187   : > { %900 = vst.msk [vmem:[#allocation2 + $0x78] sm:$0xff] %vm884_vm8, %v855_v27 }
 0x189   : > { %v684_v30 = vpop.permute.xlu1 %683  ;;  %v603_v31 = vpop.permute.xlu0 %602 }
 0x18a   : > { %728 = vst.msk [vmem:[#allocation2 + $0x80] sm:$0xff] %vm711_vm6, %v684_v30 }
 0x18b   : > { %646 = vst.msk [vmem:[#allocation2 + $0x88] sm:$0xff] %vm628_vm5, %v603_v31 }
 0x18d   : > { %v1023_v32 = vpop.permute.xlu1 %1022  ;;  %v938_v24 = vpop.permute.xlu0 %937 }
 0x18e   : > { %1069 = vst.msk [vmem:[#allocation2 + $0x70] sm:$0xff] %vm1054_vm10, %v1023_v32 }
 0x18f   : > { %983 = vst.msk [vmem:[#allocation2 + $0x78] sm:$0xff] %vm967_vm9, %v938_v24 }
 0x191   : > { %v771_v49 = vpop.permute.xlu1 %770  ;;  %v686_v33 = vpop.permute.xlu0 %685 }
 0x192   : > { %815 = vst.msk [vmem:[#allocation2 + $0x80] sm:$0xff] %vm798_vm7, %v771_v49 }
 0x193   : > { %729 = vst.msk [vmem:[#allocation2 + $0x88] sm:$0xff] %vm711_vm6, %v686_v33 }
 0x195   : > { %v1109_v35 = vpop.permute.xlu1 %1108  ;;  %v1025_v36 = vpop.permute.xlu0 %1024 }
 0x196   : > { %1155 = vst.msk [vmem:[#allocation2 + $0x70] sm:$0xff] %vm1140_vm11, %v1109_v35 }
 0x197   : > { %1070 = vst.msk [vmem:[#allocation2 + $0x78] sm:$0xff] %vm1054_vm10, %v1025_v36 }
 0x199   : > { %v773_v38 = vpop.permute.xlu1 %772  ;;  %v473_v54 = vpop.permute.xlu0 %472 }
 0x19a   : > { %816 = vst.msk [vmem:[#allocation2 + $0x88] sm:$0xff] %vm798_vm7, %v773_v38  ;;  %v2809_v39 = vpop.f32.mrb[0].mxu0 }
 0x19b   : > { %515 = vst.msk [vmem:[#allocation2 + $0x90] sm:$0xff] %vm496_vm4, %v473_v54  ;;  %v1330_v40 = vadd.f32 %v2809_v39, %v3664_v29  ;;  %v1324_v42 = vpop.f32.mrb[1].mxu0 }
 0x19c   : > { %v1325_v43 = vadd.f32 %v3664_v29, %v1324_v42 }
 0x19d   : > { %v1424_v44 = vmax.f32 %v1330_v40, 0.0  ;;  %v1111_v47 = vpop.permute.xlu1 %1110  ;;  %v857_v48 = vpop.permute.xlu0 %856  ;;  %v1175_v50 = vld [vmem:[#allocation2 + $0x70] sm:$0xff] }
 0x19e   : > { %v1423_v51 = vmax.f32 %v1325_v43, 0.0  ;;  %1156 = vst.msk [vmem:[#allocation2 + $0x78] sm:$0xff] %vm1140_vm11, %v1111_v47  ;;  %2828 = vmatprep.mubr.msk.f32.mxu0 %vm1193_vm12, %v1175_v50 }
 0x19f   : > { %901 = vst.msk [vmem:[#allocation2 + $0x80] sm:$0xff] %vm884_vm8, %v857_v48  ;;  %v1513_v52 = vsel %vm1482_vm13, %v1424_v44, 0.0  ;;  %v1445_v48 = vadd.s32 2, %v3656_v34 }
 0x1a0   : > { %1554 = vst.msk [vmem:[#allocation3 + $0x9] sm:$0xff] %vm334_vm0, %v1513_v52  ;;  %v1512_v53 = vsel %vm1482_vm13, %v1423_v51, 0.0  ;;  %vm1483_vm13 = vmand %vm1463_vm14, %vm1473_vm15 }
 0x1a1   : > { %1553 = vst.msk [vmem:[#allocation3 + $0x1] sm:$0xff] %vm334_vm0, %v1512_v53  ;;  %v475_v56 = vpop.permute.xlu0 %474  ;;  %v605_v57 = vpop.permute.xlu1 %604  ;;  %v2723_v53 = vadd.s32 4294967295, %v1445_v48 }
 0x1a2   : > { %516 = vst.msk [vmem:[#allocation2 + $0x98] sm:$0xff] %vm496_vm4, %v475_v56 }
 0x1a3   : > { %647 = vst.msk [vmem:[#allocation2 + $0x90] sm:$0xff] %vm628_vm5, %v605_v57  ;;  %vm1464_vm14 = vcmp.ge.s32.totalorder %v2723_v53, 0  ;;  %vm1474_vm15 = vcmp.lt.s32.totalorder %v2723_v53, 16 }
 0x1a5   : > { %v859_v58 = vpop.permute.xlu0 %858  ;;  %v1176_v59 = vld [vmem:[#allocation2 + $0x78] sm:$0xff]  ;;  %v940_v60 = vpop.permute.xlu1 %939 }
 0x1a6   : > { %902 = vst.msk [vmem:[#allocation2 + $0x88] sm:$0xff] %vm884_vm8, %v859_v58  ;;  %2829 = vmatmul.mubr.msk.f32.gmra.mrb[14].mxu0 %vm1193_vm12, %v1176_v59 }
 0x1a7   : > { %984 = vst.msk [vmem:[#allocation2 + $0x80] sm:$0xff] %vm967_vm9, %v940_v60  ;;  %v1575_v61 = vld [vmem:[#allocation3 + $0x10] sm:$0x3] }
 0x1a8   : > { %v1574_v62 = vld [vmem:[#allocation3 + $0x8] sm:$0xff]  ;;  %v1646_v63 = vrot.slane %v1575_v61, 1  ;;  %v1573_v46 = vld [vmem:[#allocation3] sm:$0xff]  ;;  %v1750_v8 = vrot.slane %v1575_v61, 2 }
 0x1a9   : > { %v607_v0 = vpop.permute.xlu0 %606  ;;  %v1644_v1 = vrot.slane %v1574_v62, 1  ;;  %1604 = vst.msk [vmem:[#allocation2 + $0x8] sm:$0xff] %vm334_vm0, %v1574_v62  ;;  %v1643_v55 = vrot.slane %v1573_v46, 1  ;;  %1603 = vst.msk [vmem:[#allocation2] sm:$0xff] %vm334_vm0, %v1573_v46  ;;  %v688_v2 = vpop.permute.xlu1 %687  ;;  %v1748_v4 = vrot.slane %v1574_v62, 2  ;;  %v1747_v5 = vrot.slane %v1573_v46, 2 }
 0x1aa   : > { %648 = vst.msk [vmem:[#allocation2 + $0x98] sm:$0xff] %vm628_vm5, %v607_v0 }
 0x1ab   : > { %730 = vst.msk [vmem:[#allocation2 + $0x90] sm:$0xff] %vm711_vm6, %v688_v2  ;;  %v1647_v3 = vsel %vm385_vm2, %v1644_v1, %v1646_v63  ;;  %v1645_v41 = vsel %vm385_vm2, %v1643_v55, %v1644_v1  ;;  %v1751_v13 = vsel %vm517_vm1, %v1748_v4, %v1750_v8  ;;  %v1749_v7 = vsel %vm517_vm1, %v1747_v5, %v1748_v4  ;;  %v2277_v5 = vld [vmem:[%s4232_s3] sm:$0xff] }
 0x1ac   : > { %1685 = vrot.lane.b32.xlu1 %v1647_v3, %s3005_s10  ;;  %1683 = vrot.lane.b32.xlu0 %v1645_v41, %s3005_s10 }
 0x1ad   : > { %v942_v6 = vpop.permute.xlu0 %941  ;;  %v1027_v45 = vpop.permute.xlu1 %1026 }
 0x1ae   : > { %985 = vst.msk [vmem:[#allocation2 + $0x88] sm:$0xff] %vm967_vm9, %v942_v6  ;;  %v2278_v6 = vld [vmem:[%s4232_s3 + $0x8] sm:$0xff] }
 0x1af   : > { %1071 = vst.msk [vmem:[#allocation2 + $0x80] sm:$0xff] %vm1054_vm10, %v1027_v45  ;;  %v1446_v45 = vadd.s32 3, %v3656_v34 }
 0x1b0   : > { %1789 = vrot.lane.b32.xlu1 %v1751_v13, %s3004_s9  ;;  %1787 = vrot.lane.b32.xlu0 %v1749_v7, %s3004_s9  ;;  %v2879_v13 = vpack.c.bf16 %v2278_v6, %v2277_v5 }
 0x1b1   : > { %v690_v9 = vpop.permute.xlu0 %689  ;;  %v775_v10 = vpop.permute.xlu1 %774 }
 0x1b2   : > { %731 = vst.msk [vmem:[#allocation2 + $0x98] sm:$0xff] %vm711_vm6, %v690_v9  ;;  %2880 = vmatprep.subr.bf16.mxu1 %v2879_v13 }
 0x1b3   : > { %817 = vst.msk [vmem:[#allocation2 + $0x90] sm:$0xff] %vm798_vm7, %v775_v10  ;;  %2882 = vmatpush3.bf16.msra.mxu1 %v2879_v13  ;;  %v2279_v10 = vld [vmem:[%s4232_s3 + $0x10] sm:$0xff] }
 0x1b5   : > { %v1029_v11 = vpop.permute.xlu0 %1028  ;;  %v1113_v12 = vpop.permute.xlu1 %1112 }
 0x1b6   : > { %1072 = vst.msk [vmem:[#allocation2 + $0x88] sm:$0xff] %vm1054_vm10, %v1029_v11  ;;  %v2280_v11 = vld [vmem:[%s4232_s3 + $0x18] sm:$0xff] }
 0x1b7   : > { %1157 = vst.msk [vmem:[#allocation2 + $0x80] sm:$0xff] %vm1140_vm11, %v1113_v12  ;;  %v2724_v12 = vadd.s32 4294967295, %v1446_v45 }
 0x1b9   : > { %v777_v14 = vpop.permute.xlu0 %776  ;;  %v2812_v15 = vpop.f32.mrb[2].mxu0 }
 0x1ba   : > { %818 = vst.msk [vmem:[#allocation2 + $0x98] sm:$0xff] %vm798_vm7, %v777_v14  ;;  %v1340_v16 = vadd.f32 %v2812_v15, %v3664_v29  ;;  %v1334_v17 = vpop.f32.mrb[3].mxu0  ;;  %v861_v18 = vpop.permute.xlu1 %860  ;;  %v2883_v14 = vpack.c.bf16 %v2280_v11, %v2279_v10 }
 0x1bb   : > { %v1335_v19 = vadd.f32 %v3664_v29, %v1334_v17  ;;  %903 = vst.msk [vmem:[#allocation2 + $0x90] sm:$0xff] %vm884_vm8, %v861_v18  ;;  %v2281_v17 = vld [vmem:[%s4232_s3 + $0x20] sm:$0xf] }
 0x1bc   : > { %v1426_v20 = vmax.f32 %v1340_v16, 0.0  ;;  %2884 = vmatprep.subr.bf16.mxu1 %v2883_v14 }
 0x1bd   : > { %v1425_v21 = vmax.f32 %v1335_v19, 0.0  ;;  %v1115_v22 = vpop.permute.xlu0 %1114  ;;  %2886 = vmatpush3.bf16.msra.mxu1 %v2883_v14 }
 0x1be   : > { %v1177_v23 = vld [vmem:[#allocation2 + $0x80] sm:$0xff]  ;;  %v1515_v25 = vsel %vm1483_vm13, %v1426_v20, 0.0  ;;  %1158 = vst.msk [vmem:[#allocation2 + $0x88] sm:$0xff] %vm1140_vm11, %v1115_v22  ;;  %v863_v26 = vpop.permute.xlu1 %862  ;;  %2845 = vmatprep.subr.msk.mxu1 %vm1254_vm3, %v2281_v17 }
 0x1bf   : > { %2831 = vmatprep.mubr.msk.f32.mxu0 %vm1193_vm12, %v1177_v23  ;;  %1556 = vst.msk [vmem:[#allocation3 + $0x21] sm:$0xff] %vm334_vm0, %v1515_v25  ;;  %v1514_v27 = vsel %vm1483_vm13, %v1425_v21, 0.0  ;;  %vm1484_vm13 = vmand %vm1464_vm14, %vm1474_vm15  ;;  %vm1465_vm14 = vcmp.ge.s32.totalorder %v2724_v12, 0  ;;  %vm1475_vm15 = vcmp.lt.s32.totalorder %v2724_v12, 16 }
 0x1c0   : > { %904 = vst.msk [vmem:[#allocation2 + $0x98] sm:$0xff] %vm884_vm8, %v863_v26 }
 0x1c1   : > { %1555 = vst.msk [vmem:[#allocation3 + $0x19] sm:$0xff] %vm334_vm0, %v1514_v27  ;;  %v944_v28 = vpop.permute.xlu0 %943  ;;  %2846 = vmatpush3.msk.msra.mxu1 %vm1254_vm3, %v2281_v17 }
 0x1c2   : > { %986 = vst.msk [vmem:[#allocation2 + $0x90] sm:$0xff] %vm967_vm9, %v944_v28  ;;  %v946_v30 = vpop.permute.xlu1 %945 }
 0x1c3   : > { %987 = vst.msk [vmem:[#allocation2 + $0x98] sm:$0xff] %vm967_vm9, %v946_v30 }
 0x1c5   : > { %v1178_v31 = vld [vmem:[#allocation2 + $0x88] sm:$0xff]  ;;  %v1031_v32 = vpop.permute.xlu0 %1030 }
 0x1c6   : > { %2832 = vmatmul.mubr.msk.f32.gmra.mrb[16].mxu0 %vm1193_vm12, %v1178_v31  ;;  %1073 = vst.msk [vmem:[#allocation2 + $0x90] sm:$0xff] %vm1054_vm10, %v1031_v32  ;;  %v1033_v24 = vpop.permute.xlu1 %1032  ;;  %v1578_v37 = vld [vmem:[#allocation3 + $0x28] sm:$0x3] }
 0x1c7   : > { %1074 = vst.msk [vmem:[#allocation2 + $0x98] sm:$0xff] %vm1054_vm10, %v1033_v24  ;;  %v1651_v43 = vrot.slane %v1578_v37, 1  ;;  %v1755_v52 = vrot.slane %v1578_v37, 2 }
 0x1c8   : > { %v1577_v49 = vld [vmem:[#allocation3 + $0x20] sm:$0xff]  ;;  %v1576_v33 = vld [vmem:[#allocation3 + $0x18] sm:$0xff] }
 0x1c9   : > { %v1649_v35 = vrot.slane %v1577_v49, 1  ;;  %1855 = vrot.lane.b32.xlu1 %v1577_v49, %s3003_s8  ;;  %1606 = vst.msk [vmem:[#allocation2 + $0x18] sm:$0xff] %vm334_vm0, %v1577_v49  ;;  %v1648_v36 = vrot.slane %v1576_v33, 1  ;;  %1853 = vrot.lane.b32.xlu0 %v1576_v33, %s3003_s8  ;;  %1605 = vst.msk [vmem:[#allocation2 + $0x10] sm:$0xff] %vm334_vm0, %v1576_v33  ;;  %v1117_v38 = vpop.permute.xlu0 %1116  ;;  %v1753_v40 = vrot.slane %v1577_v49, 2  ;;  %v1752_v42 = vrot.slane %v1576_v33, 2 }
 0x1ca   : > { %1159 = vst.msk [vmem:[#allocation2 + $0x90] sm:$0xff] %vm1140_vm11, %v1117_v38  ;;  %v1119_v39 = vpop.permute.xlu1 %1118 }
 0x1cb   : > { %v1650_v54 = vsel %vm385_vm2, %v1648_v36, %v1649_v35  ;;  %1160 = vst.msk [vmem:[#allocation2 + $0x98] sm:$0xff] %vm1140_vm11, %v1119_v39  ;;  %v1754_v44 = vsel %vm517_vm1, %v1752_v42, %v1753_v40  ;;  %v1652_v47 = vsel %vm385_vm2, %v1649_v35, %v1651_v43  ;;  %v1756_v56 = vsel %vm517_vm1, %v1753_v40, %v1755_v52 }
 0x1cc   : > { %v1447_v36 = vadd.s32 4, %v3656_v34 }
 0x1cd   : > { %1687 = vrot.lane.b32.xlu1 %v1650_v54, %s3005_s10  ;;  %1923 = vrot.lane.b32.xlu0 %v1650_v54, %s3006_s11 }
 0x1ce   : > { %v2725_v54 = vadd.s32 4294967295, %v1447_v36 }
 0x1d0   : > { %vm1466_vm3 = vcmp.ge.s32.totalorder %v2725_v54, 0 }
 0x1d1   : > { %1992 = vrot.lane.b32.xlu1 %v1754_v44, %s3007_s12  ;;  %1925 = vrot.lane.b32.xlu0 %v1652_v47, %s3006_s11  ;;  %v1179_v50 = vld [vmem:[#allocation2 + $0x90] sm:$0xff] }
 0x1d2   : > { %2834 = vmatprep.mubr.msk.f32.mxu0 %vm1193_vm12, %v1179_v50  ;;  %v1180_v51 = vld [vmem:[#allocation2 + $0x98] sm:$0xff] }
 0x1d3   : > { %2835 = vmatmul.mubr.msk.f32.gmra.mrb[18].mxu0 %vm1193_vm12, %v1180_v51 }
 0x1d5   : > { %1791 = vrot.lane.b32.xlu1 %v1754_v44, %s3004_s9  ;;  %1689 = vrot.lane.b32.xlu0 %v1652_v47, %s3005_s10 }
 0x1d9   : > { %1994 = vrot.lane.b32.xlu0 %v1756_v56, %s3007_s12  ;;  %v2815_v57 = vpop.f32.mrb[4].mxu0 }
 0x1da   : > { %v1350_v58 = vadd.f32 %v2815_v57, %v3664_v29  ;;  %v1344_v59 = vpop.f32.mrb[5].mxu0 }
 0x1db   : > { %v1345_v60 = vadd.f32 %v3664_v29, %v1344_v59 }
 0x1dc   : > { %v1428_v61 = vmax.f32 %v1350_v58, 0.0 }
 0x1dd   : > { %1793 = vrot.lane.b32.xlu0 %v1756_v56, %s3004_s9  ;;  %v1427_v62 = vmax.f32 %v1345_v60, 0.0 }
 0x1de   : > { %v1517_v63 = vsel %vm1484_vm13, %v1428_v61, 0.0 }
 0x1df   : > { %1558 = vst.msk [vmem:[#allocation3 + $0x39] sm:$0xff] %vm334_vm0, %v1517_v63  ;;  %v1516_v46 = vsel %vm1484_vm13, %v1427_v62, 0.0  ;;  %vm1485_vm13 = vmand %vm1465_vm14, %vm1475_vm15  ;;  %vm1476_vm14 = vcmp.lt.s32.totalorder %v2725_v54, 16 }
 0x1e0   : > { %1557 = vst.msk [vmem:[#allocation3 + $0x31] sm:$0xff] %vm334_vm0, %v1516_v46  ;;  %vm1486_vm15 = vmand %vm1466_vm3, %vm1476_vm14 }
 0x1e6   : > { %v1581_v55 = vld [vmem:[#allocation3 + $0x40] sm:$0x3] }
 0x1e7   : > { %v1579_v0 = vld [vmem:[#allocation3 + $0x30] sm:$0xff]  ;;  %v1580_v1 = vld [vmem:[#allocation3 + $0x38] sm:$0xff]  ;;  %v1656_v3 = vrot.slane %v1581_v55, 1  ;;  %v1760_v21 = vrot.slane %v1581_v55, 2 }
 0x1e8   : > { %2058 = vrot.lane.b32.xlu1 %v1579_v0, %s3008_s13  ;;  %1607 = vst.msk [vmem:[#allocation2 + $0x20] sm:$0xff] %vm334_vm0, %v1579_v0  ;;  %2060 = vrot.lane.b32.xlu0 %v1580_v1, %s3008_s13  ;;  %1608 = vst.msk [vmem:[#allocation2 + $0x28] sm:$0xff] %vm334_vm0, %v1580_v1  ;;  %v1653_v2 = vrot.slane %v1579_v0, 1  ;;  %v1654_v8 = vrot.slane %v1580_v1, 1  ;;  %v1757_v7 = vrot.slane %v1579_v0, 2  ;;  %v1758_v9 = vrot.slane %v1580_v1, 2 }
 0x1ea   : > { %v1655_v41 = vsel %vm385_vm2, %v1653_v2, %v1654_v8  ;;  %v1657_v4 = vsel %vm385_vm2, %v1654_v8, %v1656_v3  ;;  %v1759_v15 = vsel %vm517_vm1, %v1757_v7, %v1758_v9  ;;  %v1761_v27 = vsel %vm517_vm1, %v1758_v9, %v1760_v21 }
 0x1eb   : > { %v1448_v2 = vadd.s32 5, %v3656_v34 }
 0x1ec   : > { %1857 = vrot.lane.b32.xlu1 %v1579_v0, %s3003_s8  ;;  %1859 = vrot.lane.b32.xlu0 %v1580_v1, %s3003_s8 }
 0x1f0   : > { %2128 = vrot.lane.b32.xlu1 %v1655_v41, %s3009_s25  ;;  %2130 = vrot.lane.b32.xlu0 %v1657_v4, %s3009_s25 }
 0x1f4   : > { %1927 = vrot.lane.b32.xlu1 %v1655_v41, %s3006_s11  ;;  %1691 = vrot.lane.b32.xlu0 %v1655_v41, %s3005_s10  ;;  %v2726_v41 = vadd.s32 4294967295, %v1448_v2 }
 0x1f6   : > { %vm1477_vm3 = vcmp.lt.s32.totalorder %v2726_v41, 16 }
 0x1f8   : > { %2197 = vrot.lane.b32.xlu1 %v1759_v15, %s3010_s30  ;;  %1996 = vrot.lane.b32.xlu0 %v1759_v15, %s3007_s12 }
 0x1f9   : > { %v2818_v16 = vpop.f32.mrb[6].mxu0 }
 0x1fa   : > { %v1360_v18 = vadd.f32 %v2818_v16, %v3664_v29  ;;  %v1354_v19 = vpop.f32.mrb[7].mxu0 }
 0x1fb   : > { %v1355_v20 = vadd.f32 %v3664_v29, %v1354_v19 }
 0x1fc   : > { %v1430_v22 = vmax.f32 %v1360_v18, 0.0  ;;  %1929 = vrot.lane.b32.xlu1 %v1657_v4, %s3006_s11  ;;  %1693 = vrot.lane.b32.xlu0 %v1657_v4, %s3005_s10 }
 0x1fd   : > { %v1429_v23 = vmax.f32 %v1355_v20, 0.0 }
 0x1fe   : > { %v1519_v25 = vsel %vm1485_vm13, %v1430_v22, 0.0 }
 0x1ff   : > { %1560 = vst.msk [vmem:[#allocation3 + $0x51] sm:$0xff] %vm334_vm0, %v1519_v25  ;;  %v1518_v26 = vsel %vm1485_vm13, %v1429_v23, 0.0  ;;  %vm1467_vm13 = vcmp.ge.s32.totalorder %v2726_v41, 0 }
 0x200   : > { %1559 = vst.msk [vmem:[#allocation3 + $0x49] sm:$0xff] %vm334_vm0, %v1518_v26  ;;  %2199 = vrot.lane.b32.xlu1 %v1761_v27, %s3010_s30  ;;  %1998 = vrot.lane.b32.xlu0 %v1761_v27, %s3007_s12  ;;  %vm1487_vm14 = vmand %vm1467_vm13, %vm1477_vm3 }
 0x204   : > { %1795 = vrot.lane.b32.xlu1 %v1759_v15, %s3004_s9  ;;  %1797 = vrot.lane.b32.xlu0 %v1761_v27, %s3004_s9 }
 0x206   : > { %v1584_v31 = vld [vmem:[#allocation3 + $0x58] sm:$0x3] }
 0x207   : > { %v1582_v28 = vld [vmem:[#allocation3 + $0x48] sm:$0xff]  ;;  %v1583_v30 = vld [vmem:[#allocation3 + $0x50] sm:$0xff]  ;;  %v1661_v49 = vrot.slane %v1584_v31, 1  ;;  %v1765_v47 = vrot.slane %v1584_v31, 2 }
 0x208   : > { %2062 = vrot.lane.b32.xlu1 %v1582_v28, %s3008_s13  ;;  %1609 = vst.msk [vmem:[#allocation2 + $0x30] sm:$0xff] %vm334_vm0, %v1582_v28  ;;  %2064 = vrot.lane.b32.xlu0 %v1583_v30, %s3008_s13  ;;  %1610 = vst.msk [vmem:[#allocation2 + $0x38] sm:$0xff] %vm334_vm0, %v1583_v30  ;;  %v1658_v32 = vrot.slane %v1582_v28, 1  ;;  %v1659_v24 = vrot.slane %v1583_v30, 1  ;;  %v1762_v37 = vrot.slane %v1582_v28, 2  ;;  %v1763_v38 = vrot.slane %v1583_v30, 2 }
 0x20a   : > { %v1660_v33 = vsel %vm385_vm2, %v1658_v32, %v1659_v24  ;;  %v1662_v35 = vsel %vm385_vm2, %v1659_v24, %v1661_v49  ;;  %v1764_v39 = vsel %vm517_vm1, %v1762_v37, %v1763_v38  ;;  %v1766_v57 = vsel %vm517_vm1, %v1763_v38, %v1765_v47 }
 0x20c   : > { %1861 = vrot.lane.b32.xlu1 %v1582_v28, %s3003_s8  ;;  %1863 = vrot.lane.b32.xlu0 %v1583_v30, %s3003_s8 }
 0x210   : > { %2132 = vrot.lane.b32.xlu1 %v1660_v33, %s3009_s25  ;;  %2134 = vrot.lane.b32.xlu0 %v1662_v35, %s3009_s25 }
 0x214   : > { %1931 = vrot.lane.b32.xlu1 %v1660_v33, %s3006_s11  ;;  %1695 = vrot.lane.b32.xlu0 %v1660_v33, %s3005_s10  ;;  %v1449_v33 = vadd.s32 6, %v3656_v34 }
 0x216   : > { %v2727_v37 = vadd.s32 4294967295, %v1449_v33 }
 0x218   : > { %2201 = vrot.lane.b32.xlu1 %v1764_v39, %s3010_s30  ;;  %2000 = vrot.lane.b32.xlu0 %v1764_v39, %s3007_s12  ;;  %vm1478_vm13 = vcmp.lt.s32.totalorder %v2727_v37, 16 }
 0x219   : > { %v2821_v40 = vpop.f32.mrb[8].mxu0 }
 0x21a   : > { %v1370_v42 = vadd.f32 %v2821_v40, %v3664_v29  ;;  %v1364_v43 = vpop.f32.mrb[9].mxu0 }
 0x21b   : > { %v1365_v44 = vadd.f32 %v3664_v29, %v1364_v43 }
 0x21c   : > { %v1432_v48 = vmax.f32 %v1370_v42, 0.0  ;;  %1933 = vrot.lane.b32.xlu1 %v1662_v35, %s3006_s11  ;;  %1697 = vrot.lane.b32.xlu0 %v1662_v35, %s3005_s10 }
 0x21d   : > { %v1431_v50 = vmax.f32 %v1365_v44, 0.0 }
 0x21e   : > { %v1521_v51 = vsel %vm1486_vm15, %v1432_v48, 0.0  ;;  %v1686_v52 = vpop.permute.xlu1 %1685  ;;  %v1684_v53 = vpop.permute.xlu0 %1683 }
 0x21f   : > { %1562 = vst.msk [vmem:[#allocation3 + $0x69] sm:$0xff] %vm334_vm0, %v1521_v51  ;;  %v1520_v56 = vsel %vm1486_vm15, %v1431_v50, 0.0  ;;  %vm1468_vm15 = vcmp.ge.s32.totalorder %v2727_v37, 0 }
 0x220   : > { %1732 = vst.msk [vmem:[#allocation2 + $0x8] sm:$0xff] %vm496_vm4, %v1686_v52  ;;  %1731 = vst.msk [vmem:[#allocation2] sm:$0xff] %vm496_vm4, %v1684_v53  ;;  %2203 = vrot.lane.b32.xlu1 %v1766_v57, %s3010_s30  ;;  %2002 = vrot.lane.b32.xlu0 %v1766_v57, %s3007_s12 }
 0x221   : > { %1561 = vst.msk [vmem:[#allocation3 + $0x61] sm:$0xff] %vm334_vm0, %v1520_v56  ;;  %vm1488_vm3 = vmand %vm1468_vm15, %vm1478_vm13 }
 0x222   : > { %v1790_v58 = vpop.permute.xlu1 %1789  ;;  %v1788_v59 = vpop.permute.xlu0 %1787 }
 0x223   : > { %1836 = vst.msk [vmem:[#allocation2 + $0x8] sm:$0xff] %vm628_vm5, %v1790_v58  ;;  %1835 = vst.msk [vmem:[#allocation2] sm:$0xff] %vm628_vm5, %v1788_v59 }
 0x224   : > { %1799 = vrot.lane.b32.xlu1 %v1764_v39, %s3004_s9  ;;  %1801 = vrot.lane.b32.xlu0 %v1766_v57, %s3004_s9 }
 0x226   : > { %v1587_v62 = vld [vmem:[#allocation3 + $0x70] sm:$0x3] }
 0x227   : > { %v1666_v0 = vrot.slane %v1587_v62, 1  ;;  %v1770_v10 = vrot.slane %v1587_v62, 2 }
 0x228   : > { %v1585_v60 = vld [vmem:[#allocation3 + $0x60] sm:$0xff]  ;;  %v1586_v61 = vld [vmem:[#allocation3 + $0x68] sm:$0xff] }
 0x229   : > { %2066 = vrot.lane.b32.xlu1 %v1585_v60, %s3008_s13  ;;  %1611 = vst.msk [vmem:[#allocation2 + $0x40] sm:$0xff] %vm334_vm0, %v1585_v60  ;;  %2068 = vrot.lane.b32.xlu0 %v1586_v61, %s3008_s13  ;;  %1612 = vst.msk [vmem:[#allocation2 + $0x48] sm:$0xff] %vm334_vm0, %v1586_v61  ;;  %v1663_v63 = vrot.slane %v1585_v60, 1  ;;  %v1664_v46 = vrot.slane %v1586_v61, 1  ;;  %v1767_v8 = vrot.slane %v1585_v60, 2  ;;  %v1768_v3 = vrot.slane %v1586_v61, 2 }
 0x22b   : > { %v1665_v1 = vsel %vm385_vm2, %v1663_v63, %v1664_v46  ;;  %v1667_v55 = vsel %vm385_vm2, %v1664_v46, %v1666_v0  ;;  %v1769_v4 = vsel %vm517_vm1, %v1767_v8, %v1768_v3  ;;  %v1771_v18 = vsel %vm517_vm1, %v1768_v3, %v1770_v10 }
 0x22d   : > { %1865 = vrot.lane.b32.xlu1 %v1585_v60, %s3003_s8  ;;  %1867 = vrot.lane.b32.xlu0 %v1586_v61, %s3003_s8 }
 0x231   : > { %2136 = vrot.lane.b32.xlu1 %v1665_v1, %s3009_s25  ;;  %2138 = vrot.lane.b32.xlu0 %v1667_v55, %s3009_s25 }
 0x235   : > { %1935 = vrot.lane.b32.xlu1 %v1665_v1, %s3006_s11  ;;  %1699 = vrot.lane.b32.xlu0 %v1665_v1, %s3005_s10 }
 0x239   : > { %2205 = vrot.lane.b32.xlu1 %v1769_v4, %s3010_s30  ;;  %2004 = vrot.lane.b32.xlu0 %v1769_v4, %s3007_s12  ;;  %v2824_v5 = vpop.f32.mrb[10].mxu0 }
 0x23a   : > { %v1380_v6 = vadd.f32 %v2824_v5, %v3664_v29  ;;  %v1374_v45 = vpop.f32.mrb[11].mxu0 }
 0x23b   : > { %v1856_v13 = vpop.permute.xlu1 %1855  ;;  %v1375_v7 = vadd.f32 %v3664_v29, %v1374_v45  ;;  %v1854_v9 = vpop.permute.xlu0 %1853 }
 0x23c   : > { %1902 = vst.msk [vmem:[#allocation2 + $0x8] sm:$0xff] %vm711_vm6, %v1856_v13  ;;  %v1434_v11 = vmax.f32 %v1380_v6, 0.0  ;;  %1901 = vst.msk [vmem:[#allocation2] sm:$0xff] %vm711_vm6, %v1854_v9  ;;  %v1450_v6 = vadd.s32 7, %v3656_v34 }
 0x23d   : > { %1937 = vrot.lane.b32.xlu1 %v1667_v55, %s3006_s11  ;;  %1701 = vrot.lane.b32.xlu0 %v1667_v55, %s3005_s10  ;;  %v1433_v12 = vmax.f32 %v1375_v7, 0.0 }
 0x23e   : > { %v1523_v14 = vsel %vm1487_vm14, %v1434_v11, 0.0  ;;  %v2728_v11 = vadd.s32 4294967295, %v1450_v6 }
 0x23f   : > { %v1688_v15 = vpop.permute.xlu1 %1687  ;;  %1564 = vst.msk [vmem:[#allocation3 + $0x81] sm:$0xff] %vm334_vm0, %v1523_v14  ;;  %v1522_v16 = vsel %vm1487_vm14, %v1433_v12, 0.0  ;;  %v1924_v17 = vpop.permute.xlu0 %1923 }
 0x240   : > { %1733 = vst.msk [vmem:[#allocation2 + $0x10] sm:$0xff] %vm496_vm4, %v1688_v15  ;;  %vm1469_vm14 = vcmp.ge.s32.totalorder %v2728_v11, 0  ;;  %vm1479_vm15 = vcmp.lt.s32.totalorder %v2728_v11, 16 }
 0x241   : > { %1563 = vst.msk [vmem:[#allocation3 + $0x79] sm:$0xff] %vm334_vm0, %v1522_v16  ;;  %2207 = vrot.lane.b32.xlu1 %v1771_v18, %s3010_s30  ;;  %2006 = vrot.lane.b32.xlu0 %v1771_v18, %s3007_s12  ;;  %vm1489_vm13 = vmand %vm1469_vm14, %vm1479_vm15 }
 0x242   : > { %1971 = vst.msk [vmem:[#allocation2] sm:$0xff] %vm798_vm7, %v1924_v17 }
 0x243   : > { %v1993_v19 = vpop.permute.xlu1 %1992  ;;  %v1926_v20 = vpop.permute.xlu0 %1925 }
 0x244   : > { %2040 = vst.msk [vmem:[#allocation2] sm:$0xff] %vm884_vm8, %v1993_v19 }
 0x245   : > { %1972 = vst.msk [vmem:[#allocation2 + $0x8] sm:$0xff] %vm798_vm7, %v1926_v20  ;;  %1803 = vrot.lane.b32.xlu1 %v1769_v4, %s3004_s9  ;;  %1805 = vrot.lane.b32.xlu0 %v1771_v18, %s3004_s9 }
 0x246   : > { %v1590_v26 = vld [vmem:[#allocation3 + $0x88] sm:$0x3] }
 0x247   : > { %v1792_v21 = vpop.permute.xlu1 %1791  ;;  %v1690_v22 = vpop.permute.xlu0 %1689  ;;  %v1671_v31 = vrot.slane %v1590_v26, 1  ;;  %v1775_v47 = vrot.slane %v1590_v26, 2 }
 0x248   : > { %1837 = vst.msk [vmem:[#allocation2 + $0x10] sm:$0xff] %vm628_vm5, %v1792_v21  ;;  %v1588_v23 = vld [vmem:[#allocation3 + $0x78] sm:$0xff]  ;;  %v1589_v25 = vld [vmem:[#allocation3 + $0x80] sm:$0xff] }
 0x249   : > { %1734 = vst.msk [vmem:[#allocation2 + $0x18] sm:$0xff] %vm496_vm4, %v1690_v22  ;;  %2070 = vrot.lane.b32.xlu1 %v1588_v23, %s3008_s13  ;;  %2072 = vrot.lane.b32.xlu0 %v1589_v25, %s3008_s13  ;;  %v1668_v28 = vrot.slane %v1588_v23, 1  ;;  %v1669_v30 = vrot.slane %v1589_v25, 1  ;;  %v1772_v35 = vrot.slane %v1588_v23, 2  ;;  %v1773_v36 = vrot.slane %v1589_v25, 2 }
 0x24a   : > { %1613 = vst.msk [vmem:[#allocation2 + $0x50] sm:$0xff] %vm334_vm0, %v1588_v23  ;;  %1614 = vst.msk [vmem:[#allocation2 + $0x58] sm:$0xff] %vm334_vm0, %v1589_v25 }
 0x24b   : > { %v1995_v27 = vpop.permute.xlu0 %1994  ;;  %v1670_v24 = vsel %vm385_vm2, %v1668_v28, %v1669_v30  ;;  %v1672_v49 = vsel %vm385_vm2, %v1669_v30, %v1671_v31  ;;  %v1774_v38 = vsel %vm517_vm1, %v1772_v35, %v1773_v36  ;;  %v1776_v57 = vsel %vm517_vm1, %v1773_v36, %v1775_v47 }
 0x24c   : > { %2041 = vst.msk [vmem:[#allocation2 + $0x8] sm:$0xff] %vm884_vm8, %v1995_v27 }
 0x24d   : > { %1869 = vrot.lane.b32.xlu1 %v1588_v23, %s3003_s8  ;;  %1871 = vrot.lane.b32.xlu0 %v1589_v25, %s3003_s8 }
 0x24f   : > { %v1794_v32 = vpop.permute.xlu0 %1793 }
 0x250   : > { %1838 = vst.msk [vmem:[#allocation2 + $0x18] sm:$0xff] %vm628_vm5, %v1794_v32 }
 0x251   : > { %2140 = vrot.lane.b32.xlu1 %v1670_v24, %s3009_s25  ;;  %2142 = vrot.lane.b32.xlu0 %v1672_v49, %s3009_s25 }
 0x255   : > { %1939 = vrot.lane.b32.xlu1 %v1670_v24, %s3006_s11  ;;  %1703 = vrot.lane.b32.xlu0 %v1670_v24, %s3005_s10 }
 0x259   : > { %2209 = vrot.lane.b32.xlu1 %v1774_v38, %s3010_s30  ;;  %2008 = vrot.lane.b32.xlu0 %v1774_v38, %s3007_s12  ;;  %v2827_v54 = vpop.f32.mrb[12].mxu0 }
 0x25a   : > { %v1390_v39 = vadd.f32 %v2827_v54, %v3664_v29  ;;  %v1384_v40 = vpop.f32.mrb[13].mxu0  ;;  %v2059_v42 = vpop.permute.xlu1 %2058 }
 0x25b   : > { %v1385_v43 = vadd.f32 %v3664_v29, %v1384_v40  ;;  %2106 = vst.msk [vmem:[#allocation2] sm:$0xff] %vm967_vm9, %v2059_v42  ;;  %v2061_v44 = vpop.permute.xlu0 %2060 }
 0x25c   : > { %v1436_v48 = vmax.f32 %v1390_v39, 0.0  ;;  %2107 = vst.msk [vmem:[#allocation2 + $0x8] sm:$0xff] %vm967_vm9, %v2061_v44 }
 0x25d   : > { %1941 = vrot.lane.b32.xlu1 %v1672_v49, %s3006_s11  ;;  %1705 = vrot.lane.b32.xlu0 %v1672_v49, %s3005_s10  ;;  %v1435_v50 = vmax.f32 %v1385_v43, 0.0 }
 0x25e   : > { %v1525_v51 = vsel %vm1488_vm3, %v1436_v48, 0.0  ;;  %v1858_v52 = vpop.permute.xlu1 %1857 }
 0x25f   : > { %1566 = vst.msk [vmem:[#allocation3 + $0x99] sm:$0xff] %vm334_vm0, %v1525_v51  ;;  %v1524_v53 = vsel %vm1488_vm3, %v1435_v50, 0.0  ;;  %v1860_v56 = vpop.permute.xlu0 %1859  ;;  %v1451_v50 = vadd.s32 8, %v3656_v34 }
 0x260   : > { %1903 = vst.msk [vmem:[#allocation2 + $0x10] sm:$0xff] %vm711_vm6, %v1858_v52  ;;  %1904 = vst.msk [vmem:[#allocation2 + $0x18] sm:$0xff] %vm711_vm6, %v1860_v56 }
 0x261   : > { %1565 = vst.msk [vmem:[#allocation3 + $0x91] sm:$0xff] %vm334_vm0, %v1524_v53  ;;  %2211 = vrot.lane.b32.xlu1 %v1776_v57, %s3010_s30  ;;  %2010 = vrot.lane.b32.xlu0 %v1776_v57, %s3007_s12 }
 0x262   : > { %v2129_v58 = vpop.permute.xlu1 %2128 }
 0x263   : > { %2176 = vst.msk [vmem:[#allocation2] sm:$0xff] %vm1054_vm10, %v2129_v58  ;;  %v2131_v59 = vpop.permute.xlu0 %2130  ;;  %v2729_v58 = vadd.s32 4294967295, %v1451_v50 }
 0x264   : > { %2177 = vst.msk [vmem:[#allocation2 + $0x8] sm:$0xff] %vm1054_vm10, %v2131_v59 }
 0x265   : > { %1807 = vrot.lane.b32.xlu1 %v1774_v38, %s3004_s9  ;;  %1809 = vrot.lane.b32.xlu0 %v1776_v57, %s3004_s9  ;;  %vm1470_vm3 = vcmp.ge.s32.totalorder %v2729_v58, 0  ;;  %vm1480_vm14 = vcmp.lt.s32.totalorder %v2729_v58, 16 }
 0x266   : > { %v1928_v60 = vpop.permute.xlu1 %1927  ;;  %v3894_v46 = vld [vmem:[#allocation3 + $0xa0] sm:$0x3]  ;;  %vm1490_vm15 = vmand %vm1470_vm3, %vm1480_vm14 }
 0x267   : > { %1973 = vst.msk [vmem:[#allocation2 + $0x10] sm:$0xff] %vm798_vm7, %v1928_v60  ;;  %v1692_v61 = vpop.permute.xlu0 %1691  ;;  %v1676_v8 = vrot.slane %v3894_v46, 1  ;;  %v1780_v23 = vrot.slane %v3894_v46, 2 }
 0x268   : > { %v1591_v62 = vld [vmem:[#allocation3 + $0x90] sm:$0xff]  ;;  %v3885_v63 = vld [vmem:[#allocation3 + $0x98] sm:$0xff]  ;;  %1735 = vst.msk [vmem:[#allocation2 + $0x20] sm:$0xff] %vm496_vm4, %v1692_v61 }
 0x269   : > { %2074 = vrot.lane.b32.xlu1 %v1591_v62, %s3008_s13  ;;  %1615 = vst.msk [vmem:[#allocation2 + $0x60] sm:$0xff] %vm334_vm0, %v1591_v62  ;;  %2076 = vrot.lane.b32.xlu0 %v3885_v63, %s3008_s13  ;;  %1616 = vst.msk [vmem:[#allocation2 + $0x68] sm:$0xff] %vm334_vm0, %v3885_v63  ;;  %v1673_v55 = vrot.slane %v1591_v62, 1  ;;  %v1674_v2 = vrot.slane %v3885_v63, 1  ;;  %v1777_v9 = vrot.slane %v1591_v62, 2  ;;  %v1778_v10 = vrot.slane %v3885_v63, 2 }
 0x26a   : > { %v2198_v0 = vpop.permute.xlu1 %2197 }
 0x26b   : > { %2245 = vst.msk [vmem:[#allocation2] sm:$0xff] %vm1140_vm11, %v2198_v0  ;;  %v1997_v1 = vpop.permute.xlu0 %1996  ;;  %v1675_v4 = vsel %vm385_vm2, %v1673_v55, %v1674_v2  ;;  %v1677_v5 = vsel %vm385_vm2, %v1674_v2, %v1676_v8  ;;  %v1779_v15 = vsel %vm517_vm1, %v1777_v9, %v1778_v10  ;;  %v1781_v31 = vsel %vm517_vm1, %v1778_v10, %v1780_v23 }
 0x26c   : > { %2042 = vst.msk [vmem:[#allocation2 + $0x10] sm:$0xff] %vm884_vm8, %v1997_v1 }
 0x26d   : > { %1873 = vrot.lane.b32.xlu1 %v1591_v62, %s3003_s8  ;;  %1875 = vrot.lane.b32.xlu0 %v3885_v63, %s3003_s8  ;;  %v2938_v63 = vld [vmem:[%s4231_s2] ss:$0 sm:$0xff] }
 0x26e   : > { %v1930_v3 = vpop.permute.xlu1 %1929 }
 0x26f   : > { %1974 = vst.msk [vmem:[#allocation2 + $0x18] sm:$0xff] %vm798_vm7, %v1930_v3  ;;  %v1694_v41 = vpop.permute.xlu0 %1693 }
 0x270   : > { %1736 = vst.msk [vmem:[#allocation2 + $0x28] sm:$0xff] %vm496_vm4, %v1694_v41 }
 0x271   : > { %2144 = vrot.lane.b32.xlu1 %v1675_v4, %s3009_s25  ;;  %2146 = vrot.lane.b32.xlu0 %v1677_v5, %s3009_s25 }
 0x272   : > { %v2200_v45 = vpop.permute.xlu1 %2199  ;;  %v2261_v13 = vld [vmem:[#allocation2] sm:$0xff] }
 0x273   : > { %2246 = vst.msk [vmem:[#allocation2 + $0x8] sm:$0xff] %vm1140_vm11, %v2200_v45  ;;  %v1999_v7 = vpop.permute.xlu0 %1998  ;;  %2847 = vmatprep.mubr.msk.f32.mxu1 %vm1193_vm12, %v2261_v13 }
 0x274   : > { %2043 = vst.msk [vmem:[#allocation2 + $0x18] sm:$0xff] %vm884_vm8, %v1999_v7 }
 0x275   : > { %1943 = vrot.lane.b32.xlu1 %v1675_v4, %s3006_s11  ;;  %1707 = vrot.lane.b32.xlu0 %v1675_v4, %s3005_s10 }
 0x276   : > { %v1796_v12 = vpop.permute.xlu1 %1795 }
 0x277   : > { %1839 = vst.msk [vmem:[#allocation2 + $0x20] sm:$0xff] %vm628_vm5, %v1796_v12  ;;  %v1798_v14 = vpop.permute.xlu0 %1797 }
 0x278   : > { %1840 = vst.msk [vmem:[#allocation2 + $0x28] sm:$0xff] %vm628_vm5, %v1798_v14 }
 0x279   : > { %2213 = vrot.lane.b32.xlu1 %v1779_v15, %s3010_s30  ;;  %2012 = vrot.lane.b32.xlu0 %v1779_v15, %s3007_s12  ;;  %v2830_v16 = vpop.f32.mrb[14].mxu0 }
 0x27a   : > { %v1400_v17 = vadd.f32 %v2830_v16, %v3664_v29  ;;  %v1394_v18 = vpop.f32.mrb[15].mxu0  ;;  %v2063_v19 = vpop.permute.xlu1 %2062  ;;  %v2262_v20 = vld [vmem:[#allocation2 + $0x8] sm:$0xff] }
 0x27b   : > { %v1395_v21 = vadd.f32 %v3664_v29, %v1394_v18  ;;  %2108 = vst.msk [vmem:[#allocation2 + $0x10] sm:$0xff] %vm967_vm9, %v2063_v19  ;;  %v2065_v22 = vpop.permute.xlu0 %2064  ;;  %2848 = vmatmul.mubr.msk.f32.vlgmr.msra.gmra.mrb[0].mxu1 %vm1193_vm12, %v2262_v20 }
 0x27c   : > { %v1438_v25 = vmax.f32 %v1400_v17, 0.0  ;;  %2109 = vst.msk [vmem:[#allocation2 + $0x18] sm:$0xff] %vm967_vm9, %v2065_v22 }
 0x27d   : > { %1945 = vrot.lane.b32.xlu1 %v1677_v5, %s3006_s11  ;;  %1709 = vrot.lane.b32.xlu0 %v1677_v5, %s3005_s10  ;;  %v1437_v26 = vmax.f32 %v1395_v21, 0.0  ;;  %v1452_v5 = vadd.s32 9, %v3656_v34 }
 0x27e   : > { %v1527_v27 = vsel %vm1489_vm13, %v1438_v25, 0.0  ;;  %v1862_v28 = vpop.permute.xlu1 %1861 }
 0x27f   : > { %1568 = vst.msk [vmem:[#allocation3 + $0xb1] sm:$0xff] %vm334_vm0, %v1527_v27  ;;  %v1526_v29 = vsel %vm1489_vm13, %v1437_v26, 0.0  ;;  %v1864_v30 = vpop.permute.xlu0 %1863  ;;  %v2730_v10 = vadd.s32 4294967295, %v1452_v5 }
 0x280   : > { %1905 = vst.msk [vmem:[#allocation2 + $0x20] sm:$0xff] %vm711_vm6, %v1862_v28  ;;  %1906 = vst.msk [vmem:[#allocation2 + $0x28] sm:$0xff] %vm711_vm6, %v1864_v30 }
 0x281   : > { %1567 = vst.msk [vmem:[#allocation3 + $0xa9] sm:$0xff] %vm334_vm0, %v1526_v29  ;;  %2215 = vrot.lane.b32.xlu1 %v1781_v31, %s3010_s30  ;;  %2014 = vrot.lane.b32.xlu0 %v1781_v31, %s3007_s12  ;;  %vm1471_vm13 = vcmp.ge.s32.totalorder %v2730_v10, 0  ;;  %vm1481_vm3 = vcmp.lt.s32.totalorder %v2730_v10, 16 }
 0x282   : > { %v2133_v32 = vpop.permute.xlu1 %2132  ;;  %vm1491_vm14 = vmand %vm1471_vm13, %vm1481_vm3 }
 0x283   : > { %2178 = vst.msk [vmem:[#allocation2 + $0x10] sm:$0xff] %vm1054_vm10, %v2133_v32  ;;  %v2135_v24 = vpop.permute.xlu0 %2134 }
 0x284   : > { %2179 = vst.msk [vmem:[#allocation2 + $0x18] sm:$0xff] %vm1054_vm10, %v2135_v24 }
 0x285   : > { %1811 = vrot.lane.b32.xlu1 %v1779_v15, %s3004_s9  ;;  %1813 = vrot.lane.b32.xlu0 %v1781_v31, %s3004_s9 }
 0x286   : > { %v1932_v49 = vpop.permute.xlu1 %1931  ;;  %v3950_v37 = vld [vmem:[#allocation3 + $0xb8] sm:$0x3] }
 0x287   : > { %1975 = vst.msk [vmem:[#allocation2 + $0x20] sm:$0xff] %vm798_vm7, %v1932_v49  ;;  %v1696_v33 = vpop.permute.xlu0 %1695  ;;  %v1681_v42 = vrot.slane %v3950_v37, 1  ;;  %v1785_v3 = vrot.slane %v3950_v37, 2 }
 0x288   : > { %v1594_v35 = vld [vmem:[#allocation3 + $0xa8] sm:$0xff]  ;;  %v3941_v36 = vld [vmem:[#allocation3 + $0xb0] sm:$0xff]  ;;  %1737 = vst.msk [vmem:[#allocation2 + $0x30] sm:$0xff] %vm496_vm4, %v1696_v33 }
 0x289   : > { %2078 = vrot.lane.b32.xlu1 %v1594_v35, %s3008_s13  ;;  %1617 = vst.msk [vmem:[#allocation2 + $0x70] sm:$0xff] %vm334_vm0, %v1594_v35  ;;  %2080 = vrot.lane.b32.xlu0 %v3941_v36, %s3008_s13  ;;  %1618 = vst.msk [vmem:[#allocation2 + $0x78] sm:$0xff] %vm334_vm0, %v3941_v36  ;;  %v1678_v39 = vrot.slane %v1594_v35, 1  ;;  %v1679_v40 = vrot.slane %v3941_v36, 1  ;;  %v1782_v56 = vrot.slane %v1594_v35, 2  ;;  %v1783_v57 = vrot.slane %v3941_v36, 2 }
 0x28a   : > { %v2202_v38 = vpop.permute.xlu1 %2201 }
 0x28b   : > { %2247 = vst.msk [vmem:[#allocation2 + $0x10] sm:$0xff] %vm1140_vm11, %v2202_v38  ;;  %v2001_v54 = vpop.permute.xlu0 %2000  ;;  %v1680_v47 = vsel %vm385_vm2, %v1678_v39, %v1679_v40  ;;  %v1682_v48 = vsel %vm385_vm2, %v1679_v40, %v1681_v42  ;;  %v1784_v61 = vsel %vm517_vm1, %v1782_v56, %v1783_v57  ;;  %v1786_v9 = vsel %vm517_vm1, %v1783_v57, %v1785_v3 }
 0x28c   : > { %2044 = vst.msk [vmem:[#allocation2 + $0x20] sm:$0xff] %vm884_vm8, %v2001_v54 }
 0x28d   : > { %1877 = vrot.lane.b32.xlu1 %v1594_v35, %s3003_s8  ;;  %1879 = vrot.lane.b32.xlu0 %v3941_v36, %s3003_s8 }
 0x28e   : > { %v1934_v43 = vpop.permute.xlu1 %1933 }
 0x28f   : > { %1976 = vst.msk [vmem:[#allocation2 + $0x28] sm:$0xff] %vm798_vm7, %v1934_v43  ;;  %v1698_v44 = vpop.permute.xlu0 %1697 }
 0x290   : > { %1738 = vst.msk [vmem:[#allocation2 + $0x38] sm:$0xff] %vm496_vm4, %v1698_v44 }
 0x291   : > { %2148 = vrot.lane.b32.xlu1 %v1680_v47, %s3009_s25  ;;  %2150 = vrot.lane.b32.xlu0 %v1682_v48, %s3009_s25 }
 0x292   : > { %v2204_v51 = vpop.permute.xlu1 %2203  ;;  %v2263_v52 = vld [vmem:[#allocation2 + $0x10] sm:$0xff] }
 0x293   : > { %2248 = vst.msk [vmem:[#allocation2 + $0x18] sm:$0xff] %vm1140_vm11, %v2204_v51  ;;  %v2003_v53 = vpop.permute.xlu0 %2002  ;;  %2850 = vmatprep.mubr.msk.f32.mxu1 %vm1193_vm12, %v2263_v52 }
 0x294   : > { %2045 = vst.msk [vmem:[#allocation2 + $0x28] sm:$0xff] %vm884_vm8, %v2003_v53 }
 0x295   : > { %1947 = vrot.lane.b32.xlu1 %v1680_v47, %s3006_s11  ;;  %1711 = vrot.lane.b32.xlu0 %v1680_v47, %s3005_s10 }
 0x296   : > { %v1800_v59 = vpop.permute.xlu1 %1799 }
 0x297   : > { %1841 = vst.msk [vmem:[#allocation2 + $0x30] sm:$0xff] %vm628_vm5, %v1800_v59  ;;  %v1802_v60 = vpop.permute.xlu0 %1801 }
 0x298   : > { %1842 = vst.msk [vmem:[#allocation2 + $0x38] sm:$0xff] %vm628_vm5, %v1802_v60 }
 0x299   : > { %2217 = vrot.lane.b32.xlu1 %v1784_v61, %s3010_s30  ;;  %2016 = vrot.lane.b32.xlu0 %v1784_v61, %s3007_s12  ;;  %v2833_v62 = vpop.f32.mrb[16].mxu0 }
 0x29a   : > { %v1410_v46 = vadd.f32 %v2938_v63, %v2833_v62  ;;  %v1404_v0 = vpop.f32.mrb[17].mxu0  ;;  %v2264_v55 = vld [vmem:[#allocation2 + $0x18] sm:$0xff] }
 0x29b   : > { %v2067_v1 = vpop.permute.xlu1 %2066  ;;  %v1405_v2 = vadd.f32 %v2938_v63, %v1404_v0  ;;  %v2069_v8 = vpop.permute.xlu0 %2068  ;;  %2851 = vmatmul.mubr.msk.f32.gmra.mrb[2].mxu1 %vm1193_vm12, %v2264_v55 }
 0x29c   : > { %2110 = vst.msk [vmem:[#allocation2 + $0x20] sm:$0xff] %vm967_vm9, %v2067_v1  ;;  %v1440_v41 = vmax.f32 %v1410_v46, 0.0  ;;  %2111 = vst.msk [vmem:[#allocation2 + $0x28] sm:$0xff] %vm967_vm9, %v2069_v8 }
 0x29d   : > { %1949 = vrot.lane.b32.xlu1 %v1682_v48, %s3006_s11  ;;  %1713 = vrot.lane.b32.xlu0 %v1682_v48, %s3005_s10  ;;  %v1439_v4 = vmax.f32 %v1405_v2, 0.0 }
 0x29e   : > { %v1529_v6 = vsel %vm1490_vm15, %v1440_v41, 0.0 }
 0x29f   : > { %v1866_v45 = vpop.permute.xlu1 %1865  ;;  %1570 = vst.msk [vmem:[#allocation3 + $0xc9] sm:$0xff] %vm334_vm0, %v1529_v6  ;;  %v1528_v13 = vsel %vm1490_vm15, %v1439_v4, 0.0  ;;  %v1868_v7 = vpop.permute.xlu0 %1867 }
 0x2a0   : > { %1907 = vst.msk [vmem:[#allocation2 + $0x30] sm:$0xff] %vm711_vm6, %v1866_v45  ;;  %1908 = vst.msk [vmem:[#allocation2 + $0x38] sm:$0xff] %vm711_vm6, %v1868_v7 }
 0x2a1   : > { %1569 = vst.msk [vmem:[#allocation3 + $0xc1] sm:$0xff] %vm334_vm0, %v1528_v13  ;;  %2219 = vrot.lane.b32.xlu1 %v1786_v9, %s3010_s30  ;;  %2018 = vrot.lane.b32.xlu0 %v1786_v9, %s3007_s12 }
 0x2a3   : > { %v2137_v34 = vpop.permute.xlu1 %2136  ;;  %v2139_v11 = vpop.permute.xlu0 %2138 }
 0x2a4   : > { %2180 = vst.msk [vmem:[#allocation2 + $0x20] sm:$0xff] %vm1054_vm10, %v2137_v34  ;;  %2181 = vst.msk [vmem:[#allocation2 + $0x28] sm:$0xff] %vm1054_vm10, %v2139_v11 }
 0x2a5   : > { %1815 = vrot.lane.b32.xlu1 %v1784_v61, %s3004_s9  ;;  %1817 = vrot.lane.b32.xlu0 %v1786_v9, %s3004_s9  ;;  %s2697_s9 = sshll.u32 %s4246_s19, 5 }
 0x2a6   : > { %v2836_v14 = vpop.f32.mrb[18].mxu0  ;;  %v1599_v20 = vld [vmem:[#allocation3 + $0xd0] sm:$0x3] }
 0x2a7   : > { %v1936_v12 = vpop.permute.xlu1 %1935  ;;  %v1700_v15 = vpop.permute.xlu0 %1699  ;;  %v1420_v18 = vadd.f32 %v2938_v63, %v2836_v14  ;;  %v1921_v25 = vrot.slane %v1599_v20, 1  ;;  %v1990_v39 = vrot.slane %v1599_v20, 2 }
 0x2a8   : > { %1977 = vst.msk [vmem:[#allocation2 + $0x30] sm:$0xff] %vm798_vm7, %v1936_v12  ;;  %v1597_v16 = vld [vmem:[#allocation3 + $0xc0] sm:$0xff]  ;;  %v1598_v17 = vld [vmem:[#allocation3 + $0xc8] sm:$0xff]  ;;  %v1414_v19 = vpop.f32.mrb[19].mxu0 }
 0x2a9   : > { %1739 = vst.msk [vmem:[#allocation2 + $0x40] sm:$0xff] %vm496_vm4, %v1700_v15  ;;  %2082 = vrot.lane.b32.xlu1 %v1597_v16, %s3008_s13  ;;  %2084 = vrot.lane.b32.xlu0 %v1598_v17, %s3008_s13  ;;  %v1442_v21 = vmax.f32 %v1420_v18, 0.0  ;;  %v1415_v22 = vadd.f32 %v2938_v63, %v1414_v19  ;;  %v1918_v26 = vrot.slane %v1597_v16, 1  ;;  %v1919_v27 = vrot.slane %v1598_v17, 1 }
 0x2aa   : > { %v1987_v37 = vrot.slane %v1597_v16, 2  ;;  %v1988_v38 = vrot.slane %v1598_v17, 2 }
 0x2ab   : > { %v2206_v23 = vpop.permute.xlu1 %2205  ;;  %v2005_v28 = vpop.permute.xlu0 %2004  ;;  %v1531_v29 = vsel %vm1491_vm14, %v1442_v21, 0.0  ;;  %v1441_v30 = vmax.f32 %v1415_v22, 0.0  ;;  %v1920_v49 = vsel %vm385_vm2, %v1918_v26, %v1919_v27  ;;  %v1922_v33 = vsel %vm385_vm2, %v1919_v27, %v1921_v25 }
 0x2ac   : > { %2249 = vst.msk [vmem:[#allocation2 + $0x20] sm:$0xff] %vm1140_vm11, %v2206_v23  ;;  %v1989_v47 = vsel %vm517_vm1, %v1987_v37, %v1988_v38  ;;  %v1991_v48 = vsel %vm517_vm1, %v1988_v38, %v1990_v39 }
 0x2ad   : > { %2046 = vst.msk [vmem:[#allocation2 + $0x30] sm:$0xff] %vm884_vm8, %v2005_v28  ;;  %1881 = vrot.lane.b32.xlu1 %v1597_v16, %s3003_s8  ;;  %1883 = vrot.lane.b32.xlu0 %v1598_v17, %s3003_s8  ;;  %v1530_v31 = vsel %vm1491_vm14, %v1441_v30, 0.0  ;;  %s2696_s8 = sshll.u32 %s2985_s18, 4 }
 0x2ae   : > { %1572 = vst.msk [vmem:[#allocation3 + $0xe1] sm:$0xff] %vm334_vm0, %v1531_v29  ;;  %1571 = vst.msk [vmem:[#allocation3 + $0xd9] sm:$0xff] %vm334_vm0, %v1530_v31  ;;  %p255_p7 = scmp.lt.s32.totalorder %s2696_s8, 31 }
 0x2af   : > { %v1938_v32 = vpop.permute.xlu1 %1937  ;;  %v1702_v24 = vpop.permute.xlu0 %1701 }
 0x2b0   : > { %1978 = vst.msk [vmem:[#allocation2 + $0x38] sm:$0xff] %vm798_vm7, %v1938_v32  ;;  %s4248_s8 = smov (!%p255_p7, %s2696_s8), 31 }
 0x2b1   : > { %1740 = vst.msk [vmem:[#allocation2 + $0x48] sm:$0xff] %vm496_vm4, %v1702_v24  ;;  %2152 = vrot.lane.b32.xlu1 %v1920_v49, %s3009_s25  ;;  %2154 = vrot.lane.b32.xlu0 %v1922_v33, %s3009_s25  ;;  %s258_s10 = sadd.s32 %s2697_s9, %s4248_s8 }
 0x2b2   : > { %s2698_s18 = sshll.u32 %s258_s10, 3 }
 0x2b3   : > { %v2208_v35 = vpop.permute.xlu1 %2207  ;;  %v2265_v36 = vld [vmem:[#allocation2 + $0x20] sm:$0xff]  ;;  %v2007_v54 = vpop.permute.xlu0 %2006 }
 0x2b4   : > { %2250 = vst.msk [vmem:[#allocation2 + $0x28] sm:$0xff] %vm1140_vm11, %v2208_v35  ;;  %2853 = vmatprep.mubr.msk.f32.mxu1 %vm1193_vm12, %v2265_v36 }
 0x2b5   : > { %2047 = vst.msk [vmem:[#allocation2 + $0x38] sm:$0xff] %vm884_vm8, %v2007_v54  ;;  %1951 = vrot.lane.b32.xlu1 %v1920_v49, %s3006_s11  ;;  %1953 = vrot.lane.b32.xlu0 %v1922_v33, %s3006_s11  ;;  %v1600_v42 = vld [vmem:[#allocation3 + $0xd8] sm:$0xff]  ;;  %v1601_v43 = vld [vmem:[#allocation3 + $0xe0] sm:$0xff]  ;;  %v1602_v62 = vld [vmem:[#allocation3 + $0xe8] sm:$0x3] }
 0x2b6   : > { %v2123_v50 = vrot.slane %v1600_v42, 1  ;;  %v2124_v51 = vrot.slane %v1601_v43, 1  ;;  %v2192_v57 = vrot.slane %v1600_v42, 2  ;;  %v2193_v59 = vrot.slane %v1601_v43, 2 }
 0x2b7   : > { %v1804_v40 = vpop.permute.xlu1 %1803  ;;  %v1806_v44 = vpop.permute.xlu0 %1805  ;;  %v2126_v1 = vrot.slane %v1602_v62, 1  ;;  %v2195_v3 = vrot.slane %v1602_v62, 2 }
 0x2b8   : > { %1843 = vst.msk [vmem:[#allocation2 + $0x40] sm:$0xff] %vm628_vm5, %v1804_v40  ;;  %1844 = vst.msk [vmem:[#allocation2 + $0x48] sm:$0xff] %vm628_vm5, %v1806_v44  ;;  %v2125_v58 = vsel %vm385_vm2, %v2123_v50, %v2124_v51  ;;  %v2194_v63 = vsel %vm517_vm1, %v2192_v57, %v2193_v59 }
 0x2b9   : > { %2221 = vrot.lane.b32.xlu1 %v1989_v47, %s3010_s30  ;;  %2223 = vrot.lane.b32.xlu0 %v1991_v48, %s3010_s30  ;;  %v2127_v8 = vsel %vm385_vm2, %v2124_v51, %v2126_v1  ;;  %v2196_v5 = vsel %vm517_vm1, %v2193_v59, %v2195_v3 }
 0x2bb   : > { %v2071_v52 = vpop.permute.xlu1 %2070  ;;  %v2266_v53 = vld [vmem:[#allocation2 + $0x28] sm:$0xff]  ;;  %v2073_v56 = vpop.permute.xlu0 %2072 }
 0x2bc   : > { %2112 = vst.msk [vmem:[#allocation2 + $0x30] sm:$0xff] %vm967_vm9, %v2071_v52  ;;  %2854 = vmatmul.mubr.msk.f32.gmra.mrb[4].mxu1 %vm1193_vm12, %v2266_v53  ;;  %2113 = vst.msk [vmem:[#allocation2 + $0x38] sm:$0xff] %vm967_vm9, %v2073_v56 }
 0x2bd   : > { %2020 = vrot.lane.b32.xlu1 %v1989_v47, %s3007_s12  ;;  %2086 = vrot.lane.b32.xlu0 %v1600_v42, %s3008_s13 }
 0x2bf   : > { %v1870_v60 = vpop.permute.xlu1 %1869  ;;  %v1872_v61 = vpop.permute.xlu0 %1871 }
 0x2c0   : > { %1909 = vst.msk [vmem:[#allocation2 + $0x40] sm:$0xff] %vm711_vm6, %v1870_v60  ;;  %1910 = vst.msk [vmem:[#allocation2 + $0x48] sm:$0xff] %vm711_vm6, %v1872_v61 }
 0x2c1   : > { %2022 = vrot.lane.b32.xlu1 %v1991_v48, %s3007_s12  ;;  %2156 = vrot.lane.b32.xlu0 %v2125_v58, %s3009_s25 }
 0x2c3   : > { %v2141_v46 = vpop.permute.xlu1 %2140  ;;  %v2143_v0 = vpop.permute.xlu0 %2142 }
 0x2c4   : > { %2182 = vst.msk [vmem:[#allocation2 + $0x30] sm:$0xff] %vm1054_vm10, %v2141_v46  ;;  %2183 = vst.msk [vmem:[#allocation2 + $0x38] sm:$0xff] %vm1054_vm10, %v2143_v0 }
 0x2c5   : > { %2088 = vrot.lane.b32.xlu1 %v1601_v43, %s3008_s13  ;;  %2225 = vrot.lane.b32.xlu0 %v2194_v63, %s3010_s30 }
 0x2c7   : > { %v1940_v55 = vpop.permute.xlu1 %1939  ;;  %v1704_v2 = vpop.permute.xlu0 %1703 }
 0x2c8   : > { %1979 = vst.msk [vmem:[#allocation2 + $0x40] sm:$0xff] %vm798_vm7, %v1940_v55 }
 0x2c9   : > { %1741 = vst.msk [vmem:[#allocation2 + $0x50] sm:$0xff] %vm496_vm4, %v1704_v2  ;;  %2158 = vrot.lane.b32.xlu1 %v2127_v8, %s3009_s25  ;;  %s4130_s25 = scalar_lea.vmem %s4234_s5, %s2698_s18 }
 0x2cb   : > { %v2210_v41 = vpop.permute.xlu1 %2209  ;;  %v2009_v4 = vpop.permute.xlu0 %2008 }
 0x2cc   : > { %2251 = vst.msk [vmem:[#allocation2 + $0x30] sm:$0xff] %vm1140_vm11, %v2210_v41 }
 0x2cd   : > { %2048 = vst.msk [vmem:[#allocation2 + $0x40] sm:$0xff] %vm884_vm8, %v2009_v4  ;;  %2227 = vrot.lane.b32.xlu1 %v2196_v5, %s3010_s30 }
 0x2cf   : > { %v1942_v6 = vpop.permute.xlu1 %1941  ;;  %v1706_v45 = vpop.permute.xlu0 %1705 }
 0x2d0   : > { %1980 = vst.msk [vmem:[#allocation2 + $0x48] sm:$0xff] %vm798_vm7, %v1942_v6 }
 0x2d1   : > { %1742 = vst.msk [vmem:[#allocation2 + $0x58] sm:$0xff] %vm496_vm4, %v1706_v45 }
 0x2d3   : > { %v2212_v13 = vpop.permute.xlu1 %2211  ;;  %v2267_v7 = vld [vmem:[#allocation2 + $0x30] sm:$0xff]  ;;  %v2011_v9 = vpop.permute.xlu0 %2010 }
 0x2d4   : > { %2252 = vst.msk [vmem:[#allocation2 + $0x38] sm:$0xff] %vm1140_vm11, %v2212_v13  ;;  %2856 = vmatprep.mubr.msk.f32.mxu1 %vm1193_vm12, %v2267_v7  ;;  %v2939_v13 = vld [vmem:[%s3082_s7 + $0x38] sm:$0xff] }
 0x2d5   : > { %2049 = vst.msk [vmem:[#allocation2 + $0x48] sm:$0xff] %vm884_vm8, %v2011_v9  ;;  %v2510_v7 = vrot.slane %v2939_v13, 1  ;;  %v2940_v9 = vld [vmem:[%s3082_s7 + $0x40] sm:$0x3] }
 0x2d7   : > { %v1808_v10 = vpop.permute.xlu1 %1807  ;;  %v1810_v34 = vpop.permute.xlu0 %1809 }
 0x2d8   : > { %1845 = vst.msk [vmem:[#allocation2 + $0x50] sm:$0xff] %vm628_vm5, %v1808_v10  ;;  %1846 = vst.msk [vmem:[#allocation2 + $0x58] sm:$0xff] %vm628_vm5, %v1810_v34  ;;  %v2512_v10 = vrot.slane %v2940_v9, 1  ;;  %v2941_v34 = vld [vmem:[%s3082_s7 + $0x30] sm:$0xff] }
 0x2db   : > { %v2075_v11 = vpop.permute.xlu1 %2074  ;;  %v2268_v12 = vld [vmem:[#allocation2 + $0x38] sm:$0xff]  ;;  %v2077_v14 = vpop.permute.xlu0 %2076 }
 0x2dc   : > { %2114 = vst.msk [vmem:[#allocation2 + $0x40] sm:$0xff] %vm967_vm9, %v2075_v11  ;;  %2857 = vmatmul.mubr.msk.f32.gmra.mrb[6].mxu1 %vm1193_vm12, %v2268_v12  ;;  %2115 = vst.msk [vmem:[#allocation2 + $0x48] sm:$0xff] %vm967_vm9, %v2077_v14  ;;  %v2509_v11 = vrot.slane %v2941_v34, 1  ;;  %v4122_v12 = vld [vmem:[%s4233_s4] ss:$0 sm:$0xff] }
 0x2df   : > { %v1874_v15 = vpop.permute.xlu1 %1873  ;;  %v1876_v16 = vpop.permute.xlu0 %1875 }
 0x2e0   : > { %1911 = vst.msk [vmem:[#allocation2 + $0x50] sm:$0xff] %vm711_vm6, %v1874_v15  ;;  %1912 = vst.msk [vmem:[#allocation2 + $0x58] sm:$0xff] %vm711_vm6, %v1876_v16  ;;  %v2513_v15 = vsel %vm385_vm2, %v2510_v7, %v2512_v10 }
 0x2e3   : > { %v2145_v17 = vpop.permute.xlu1 %2144  ;;  %v2147_v18 = vpop.permute.xlu0 %2146 }
 0x2e4   : > { %2184 = vst.msk [vmem:[#allocation2 + $0x40] sm:$0xff] %vm1054_vm10, %v2145_v17  ;;  %2185 = vst.msk [vmem:[#allocation2 + $0x48] sm:$0xff] %vm1054_vm10, %v2147_v18  ;;  %v2511_v18 = vsel %vm385_vm2, %v2509_v11, %v2510_v7 }
 0x2e7   : > { %v1944_v19 = vpop.permute.xlu1 %1943  ;;  %v1708_v20 = vpop.permute.xlu0 %1707 }
 0x2e8   : > { %1981 = vst.msk [vmem:[#allocation2 + $0x50] sm:$0xff] %vm798_vm7, %v1944_v19 }
 0x2e9   : > { %1743 = vst.msk [vmem:[#allocation2 + $0x60] sm:$0xff] %vm496_vm4, %v1708_v20 }
 0x2eb   : > { %v2214_v21 = vpop.permute.xlu1 %2213  ;;  %v2013_v22 = vpop.permute.xlu0 %2012 }
 0x2ec   : > { %2253 = vst.msk [vmem:[#allocation2 + $0x40] sm:$0xff] %vm1140_vm11, %v2214_v21 }
 0x2ed   : > { %2050 = vst.msk [vmem:[#allocation2 + $0x50] sm:$0xff] %vm884_vm8, %v2013_v22  ;;  %v2942_v22 = vld [vmem:[%s3082_s7 + $0x50] sm:$0xff] }
 0x2ef   : > { %v1946_v23 = vpop.permute.xlu1 %1945  ;;  %v1710_v25 = vpop.permute.xlu0 %1709 }
 0x2f0   : > { %1982 = vst.msk [vmem:[#allocation2 + $0x58] sm:$0xff] %vm798_vm7, %v1946_v23  ;;  %v2515_v23 = vrot.slane %v2942_v22, 1 }
 0x2f1   : > { %1744 = vst.msk [vmem:[#allocation2 + $0x68] sm:$0xff] %vm496_vm4, %v1710_v25  ;;  %v2943_v25 = vld [vmem:[%s3082_s7 + $0x58] sm:$0x3] }
 0x2f3   : > { %v2216_v26 = vpop.permute.xlu1 %2215  ;;  %v2269_v27 = vld [vmem:[#allocation2 + $0x40] sm:$0xff]  ;;  %v2015_v28 = vpop.permute.xlu0 %2014 }
 0x2f4   : > { %2254 = vst.msk [vmem:[#allocation2 + $0x48] sm:$0xff] %vm1140_vm11, %v2216_v26  ;;  %2859 = vmatprep.mubr.msk.f32.mxu1 %vm1193_vm12, %v2269_v27  ;;  %v2517_v26 = vrot.slane %v2943_v25, 1  ;;  %v2944_v27 = vld [vmem:[%s3082_s7 + $0x48] sm:$0xff] }
 0x2f5   : > { %2051 = vst.msk [vmem:[#allocation2 + $0x58] sm:$0xff] %vm884_vm8, %v2015_v28  ;;  %v2514_v28 = vrot.slane %v2944_v27, 1 }
 0x2f7   : > { %v1812_v29 = vpop.permute.xlu1 %1811  ;;  %v1814_v30 = vpop.permute.xlu0 %1813 }
 0x2f8   : > { %1847 = vst.msk [vmem:[#allocation2 + $0x60] sm:$0xff] %vm628_vm5, %v1812_v29  ;;  %1848 = vst.msk [vmem:[#allocation2 + $0x68] sm:$0xff] %vm628_vm5, %v1814_v30  ;;  %v2518_v30 = vsel %vm385_vm2, %v2515_v23, %v2517_v26 }
 0x2fb   : > { %v2079_v31 = vpop.permute.xlu1 %2078  ;;  %v2270_v32 = vld [vmem:[#allocation2 + $0x48] sm:$0xff]  ;;  %v2081_v24 = vpop.permute.xlu0 %2080 }
 0x2fc   : > { %2116 = vst.msk [vmem:[#allocation2 + $0x50] sm:$0xff] %vm967_vm9, %v2079_v31  ;;  %2860 = vmatmul.mubr.msk.f32.gmra.mrb[8].mxu1 %vm1193_vm12, %v2270_v32  ;;  %2117 = vst.msk [vmem:[#allocation2 + $0x58] sm:$0xff] %vm967_vm9, %v2081_v24  ;;  %v2516_v24 = vsel %vm385_vm2, %v2514_v28, %v2515_v23 }
 0x2ff   : > { %v1878_v49 = vpop.permute.xlu1 %1877  ;;  %v1880_v33 = vpop.permute.xlu0 %1879 }
 0x300   : > { %1913 = vst.msk [vmem:[#allocation2 + $0x60] sm:$0xff] %vm711_vm6, %v1878_v49  ;;  %1914 = vst.msk [vmem:[#allocation2 + $0x68] sm:$0xff] %vm711_vm6, %v1880_v33 }
 0x303   : > { %v2149_v35 = vpop.permute.xlu1 %2148  ;;  %v2151_v36 = vpop.permute.xlu0 %2150 }
 0x304   : > { %2186 = vst.msk [vmem:[#allocation2 + $0x50] sm:$0xff] %vm1054_vm10, %v2149_v35  ;;  %2187 = vst.msk [vmem:[#allocation2 + $0x58] sm:$0xff] %vm1054_vm10, %v2151_v36  ;;  %v2945_v36 = vld [vmem:[%s3082_s7 + $0x68] sm:$0xff] }
 0x307   : > { %v1948_v37 = vpop.permute.xlu1 %1947  ;;  %v1712_v38 = vpop.permute.xlu0 %1711 }
 0x308   : > { %1983 = vst.msk [vmem:[#allocation2 + $0x60] sm:$0xff] %vm798_vm7, %v1948_v37  ;;  %v2520_v37 = vrot.slane %v2945_v36, 1 }
 0x309   : > { %1745 = vst.msk [vmem:[#allocation2 + $0x70] sm:$0xff] %vm496_vm4, %v1712_v38  ;;  %v2946_v38 = vld [vmem:[%s3082_s7 + $0x70] sm:$0x3] }
 0x30b   : > { %v2218_v54 = vpop.permute.xlu1 %2217  ;;  %v2017_v39 = vpop.permute.xlu0 %2016 }
 0x30c   : > { %2255 = vst.msk [vmem:[#allocation2 + $0x50] sm:$0xff] %vm1140_vm11, %v2218_v54  ;;  %v2522_v54 = vrot.slane %v2946_v38, 1 }
 0x30d   : > { %2052 = vst.msk [vmem:[#allocation2 + $0x60] sm:$0xff] %vm884_vm8, %v2017_v39  ;;  %v2947_v39 = vld [vmem:[%s3082_s7 + $0x60] sm:$0xff] }
 0x30f   : > { %v1950_v40 = vpop.permute.xlu1 %1949  ;;  %v1714_v42 = vpop.permute.xlu0 %1713 }
 0x310   : > { %1984 = vst.msk [vmem:[#allocation2 + $0x68] sm:$0xff] %vm798_vm7, %v1950_v40  ;;  %v2519_v40 = vrot.slane %v2947_v39, 1 }
 0x311   : > { %1746 = vst.msk [vmem:[#allocation2 + $0x78] sm:$0xff] %vm496_vm4, %v1714_v42 }
 0x313   : > { %v2220_v43 = vpop.permute.xlu1 %2219  ;;  %v2271_v44 = vld [vmem:[#allocation2 + $0x50] sm:$0xff]  ;;  %v2019_v47 = vpop.permute.xlu0 %2018 }
 0x314   : > { %2256 = vst.msk [vmem:[#allocation2 + $0x58] sm:$0xff] %vm1140_vm11, %v2220_v43  ;;  %2862 = vmatprep.mubr.msk.f32.mxu1 %vm1193_vm12, %v2271_v44  ;;  %v2523_v43 = vsel %vm385_vm2, %v2520_v37, %v2522_v54 }
 0x315   : > { %2053 = vst.msk [vmem:[#allocation2 + $0x68] sm:$0xff] %vm884_vm8, %v2019_v47 }
 0x317   : > { %v1816_v48 = vpop.permute.xlu1 %1815  ;;  %v1818_v50 = vpop.permute.xlu0 %1817 }
 0x318   : > { %1849 = vst.msk [vmem:[#allocation2 + $0x70] sm:$0xff] %vm628_vm5, %v1816_v48  ;;  %1850 = vst.msk [vmem:[#allocation2 + $0x78] sm:$0xff] %vm628_vm5, %v1818_v50  ;;  %v2521_v48 = vsel %vm385_vm2, %v2519_v40, %v2520_v37 }
 0x31b   : > { %v2083_v51 = vpop.permute.xlu1 %2082  ;;  %v2272_v52 = vld [vmem:[#allocation2 + $0x58] sm:$0xff]  ;;  %v2085_v53 = vpop.permute.xlu0 %2084 }
 0x31c   : > { %2118 = vst.msk [vmem:[#allocation2 + $0x60] sm:$0xff] %vm967_vm9, %v2083_v51  ;;  %2863 = vmatmul.mubr.msk.f32.gmra.mrb[10].mxu1 %vm1193_vm12, %v2272_v52  ;;  %2119 = vst.msk [vmem:[#allocation2 + $0x68] sm:$0xff] %vm967_vm9, %v2085_v53  ;;  %v2948_v53 = vld [vmem:[%s3082_s7 + $0x80] sm:$0xff] }
 0x31f   : > { %v1882_v56 = vpop.permute.xlu1 %1881  ;;  %v1884_v57 = vpop.permute.xlu0 %1883 }
 0x320   : > { %1915 = vst.msk [vmem:[#allocation2 + $0x70] sm:$0xff] %vm711_vm6, %v1882_v56  ;;  %1916 = vst.msk [vmem:[#allocation2 + $0x78] sm:$0xff] %vm711_vm6, %v1884_v57  ;;  %v2525_v56 = vrot.slane %v2948_v53, 1  ;;  %v2949_v57 = vld [vmem:[%s3082_s7 + $0x88] sm:$0x3] }
 0x323   : > { %v2153_v58 = vpop.permute.xlu1 %2152  ;;  %v2155_v59 = vpop.permute.xlu0 %2154 }
 0x324   : > { %2188 = vst.msk [vmem:[#allocation2 + $0x60] sm:$0xff] %vm1054_vm10, %v2153_v58  ;;  %2189 = vst.msk [vmem:[#allocation2 + $0x68] sm:$0xff] %vm1054_vm10, %v2155_v59  ;;  %v2527_v58 = vrot.slane %v2949_v57, 1  ;;  %v2950_v59 = vld [vmem:[%s3082_s7 + $0x78] sm:$0xff] }
 0x327   : > { %v1952_v60 = vpop.permute.xlu1 %1951  ;;  %v1954_v61 = vpop.permute.xlu0 %1953 }
 0x328   : > { %1985 = vst.msk [vmem:[#allocation2 + $0x70] sm:$0xff] %vm798_vm7, %v1952_v60  ;;  %1986 = vst.msk [vmem:[#allocation2 + $0x78] sm:$0xff] %vm798_vm7, %v1954_v61  ;;  %v2524_v60 = vrot.slane %v2950_v59, 1 }
 0x32b   : > { %v2222_v62 = vpop.permute.xlu1 %2221  ;;  %v2224_v63 = vpop.permute.xlu0 %2223 }
 0x32c   : > { %2257 = vst.msk [vmem:[#allocation2 + $0x60] sm:$0xff] %vm1140_vm11, %v2222_v62  ;;  %2258 = vst.msk [vmem:[#allocation2 + $0x68] sm:$0xff] %vm1140_vm11, %v2224_v63  ;;  %v2528_v62 = vsel %vm385_vm2, %v2525_v56, %v2527_v58 }
 0x32f   : > { %v2021_v46 = vpop.permute.xlu1 %2020  ;;  %v2087_v0 = vpop.permute.xlu0 %2086 }
 0x330   : > { %2054 = vst.msk [vmem:[#allocation2 + $0x70] sm:$0xff] %vm884_vm8, %v2021_v46 }
 0x331   : > { %2120 = vst.msk [vmem:[#allocation2 + $0x70] sm:$0xff] %vm967_vm9, %v2087_v0  ;;  %v2526_v0 = vsel %vm385_vm2, %v2524_v60, %v2525_v56 }
 0x333   : > { %v2023_v1 = vpop.permute.xlu1 %2022  ;;  %v2273_v55 = vld [vmem:[#allocation2 + $0x60] sm:$0xff]  ;;  %v2157_v2 = vpop.permute.xlu0 %2156  ;;  %v2274_v8 = vld [vmem:[#allocation2 + $0x68] sm:$0xff] }
 0x334   : > { %2055 = vst.msk [vmem:[#allocation2 + $0x78] sm:$0xff] %vm884_vm8, %v2023_v1  ;;  %2865 = vmatprep.mubr.msk.f32.mxu1 %vm1193_vm12, %v2273_v55 }
 0x335   : > { %2190 = vst.msk [vmem:[#allocation2 + $0x70] sm:$0xff] %vm1054_vm10, %v2157_v2  ;;  %2866 = vmatmul.mubr.msk.f32.gmra.mrb[12].mxu1 %vm1193_vm12, %v2274_v8  ;;  %v2951_v8 = vld [vmem:[%s3082_s7 + $0x98] sm:$0xff] }
 0x337   : > { %v2089_v3 = vpop.permute.xlu1 %2088  ;;  %v2226_v41 = vpop.permute.xlu0 %2225 }
 0x338   : > { %2121 = vst.msk [vmem:[#allocation2 + $0x78] sm:$0xff] %vm967_vm9, %v2089_v3  ;;  %v2530_v3 = vrot.slane %v2951_v8, 1 }
 0x339   : > { %2259 = vst.msk [vmem:[#allocation2 + $0x70] sm:$0xff] %vm1140_vm11, %v2226_v41  ;;  %v2952_v41 = vld [vmem:[%s3082_s7 + $0xa0] sm:$0x3] }
 0x33b   : > { %v2159_v4 = vpop.permute.xlu1 %2158 }
 0x33c   : > { %2191 = vst.msk [vmem:[#allocation2 + $0x78] sm:$0xff] %vm1054_vm10, %v2159_v4  ;;  %v2532_v4 = vrot.slane %v2952_v41, 1 }
 0x33e   : > { %v2533_v13 = vsel %vm385_vm2, %v2530_v3, %v2532_v4 }
 0x33f   : > { %v2228_v5 = vpop.permute.xlu1 %2227 }
 0x340   : > { %2260 = vst.msk [vmem:[#allocation2 + $0x78] sm:$0xff] %vm1140_vm11, %v2228_v5  ;;  %v2275_v6 = vld [vmem:[#allocation2 + $0x70] sm:$0xff] }
 0x341   : > { %2868 = vmatprep.mubr.msk.f32.mxu1 %vm1193_vm12, %v2275_v6  ;;  %v2953_v5 = vld [vmem:[%s3082_s7 + $0x90] sm:$0xff] }
 0x342   : > { %v2529_v6 = vrot.slane %v2953_v5, 1 }
 0x344   : > { %v2531_v10 = vsel %vm385_vm2, %v2529_v6, %v2530_v3 }
 0x347   : > { %v2276_v45 = vld [vmem:[#allocation2 + $0x78] sm:$0xff] }
 0x348   : > { %2869 = vmatmul.mubr.msk.f32.gmra.mrb[14].mxu1 %vm1193_vm12, %v2276_v45 }
 0x34e   : > { %v2849_v14 = vpop.f32.mrb[0].mxu1 }
 0x34f   : > { %v2412_v16 = vadd.f32 %v2849_v14, %v4122_v12  ;;  %v2406_v17 = vpop.f32.mrb[1].mxu1 }
 0x350   : > { %v2407_v19 = vadd.f32 %v4122_v12, %v2406_v17  ;;  %v2955_v17 = vld [vmem:[%s3082_s7 + $0xb8] sm:$0x3] }
 0x351   : > { %v2566_v20 = vadd.f32 %v2513_v15, %v2412_v16  ;;  %v2954_v15 = vld [vmem:[%s3082_s7 + $0xb0] sm:$0xff] }
 0x352   : > { %v2565_v21 = vadd.f32 %v2511_v18, %v2407_v19  ;;  %v2535_v16 = vrot.slane %v2954_v15, 1  ;;  %v2537_v18 = vrot.slane %v2955_v17, 1  ;;  %v2956_v19 = vld [vmem:[%s3082_s7 + $0xa8] sm:$0xff] }
 0x353   : > { %2582 = vst.msk [vmem:[%s4130_s25 + $0x8] sm:$0xff] %vm334_vm0, %v2566_v20  ;;  %v2534_v20 = vrot.slane %v2956_v19, 1 }
 0x354   : > { %2581 = vst.msk [vmem:[%s4130_s25] sm:$0xff] %vm334_vm0, %v2565_v21  ;;  %v2538_v22 = vsel %vm385_vm2, %v2535_v16, %v2537_v18 }
 0x355   : > { %v2536_v26 = vsel %vm385_vm2, %v2534_v20, %v2535_v16 }
 0x36e   : > { %v2852_v29 = vpop.f32.mrb[2].mxu1 }
 0x36f   : > { %v2422_v31 = vadd.f32 %v2852_v29, %v4122_v12  ;;  %v2416_v32 = vpop.f32.mrb[3].mxu1 }
 0x370   : > { %v2417_v49 = vadd.f32 %v4122_v12, %v2416_v32  ;;  %v2958_v32 = vld [vmem:[%s3082_s7 + $0xd0] sm:$0x3] }
 0x371   : > { %v2568_v33 = vadd.f32 %v2518_v30, %v2422_v31  ;;  %v2957_v30 = vld [vmem:[%s3082_s7 + $0xc8] sm:$0xff] }
 0x372   : > { %v2567_v35 = vadd.f32 %v2516_v24, %v2417_v49  ;;  %v2540_v31 = vrot.slane %v2957_v30, 1  ;;  %v2542_v24 = vrot.slane %v2958_v32, 1  ;;  %v2959_v49 = vld [vmem:[%s3082_s7 + $0xc0] sm:$0xff] }
 0x373   : > { %2584 = vst.msk [vmem:[%s4130_s25 + $0x18] sm:$0xff] %vm334_vm0, %v2568_v33  ;;  %v2539_v33 = vrot.slane %v2959_v49, 1 }
 0x374   : > { %2583 = vst.msk [vmem:[%s4130_s25 + $0x10] sm:$0xff] %vm334_vm0, %v2567_v35  ;;  %v2543_v36 = vsel %vm385_vm2, %v2540_v31, %v2542_v24 }
 0x375   : > { %v2541_v54 = vsel %vm385_vm2, %v2539_v33, %v2540_v31 }
 0x38f   : > { %v2855_v42 = vpop.f32.mrb[4].mxu1 }
 0x390   : > { %v2432_v44 = vadd.f32 %v2855_v42, %v4122_v12  ;;  %v2426_v47 = vpop.f32.mrb[5].mxu1 }
 0x391   : > { %v2427_v50 = vadd.f32 %v4122_v12, %v2426_v47  ;;  %v2961_v47 = vld [vmem:[%s3082_s7 + $0xe8] sm:$0x3] }
 0x392   : > { %v2570_v51 = vadd.f32 %v2523_v43, %v2432_v44  ;;  %v2960_v43 = vld [vmem:[%s3082_s7 + $0xe0] sm:$0xff] }
 0x393   : > { %v2569_v52 = vadd.f32 %v2521_v48, %v2427_v50  ;;  %v2545_v44 = vrot.slane %v2960_v43, 1  ;;  %v2547_v48 = vrot.slane %v2961_v47, 1  ;;  %v2962_v50 = vld [vmem:[%s3082_s7 + $0xd8] sm:$0xff] }
 0x394   : > { %2586 = vst.msk [vmem:[%s4130_s25 + $0x28] sm:$0xff] %vm334_vm0, %v2570_v51  ;;  %v2544_v51 = vrot.slane %v2962_v50, 1 }
 0x395   : > { %2585 = vst.msk [vmem:[%s4130_s25 + $0x20] sm:$0xff] %vm334_vm0, %v2569_v52  ;;  %v2548_v53 = vsel %vm385_vm2, %v2545_v44, %v2547_v48 }
 0x396   : > { %v2546_v58 = vsel %vm385_vm2, %v2544_v51, %v2545_v44 }
 0x3af   : > { %v2858_v61 = vpop.f32.mrb[6].mxu1 }
 0x3b0   : > { %v2442_v63 = vadd.f32 %v2858_v61, %v4122_v12  ;;  %v2436_v46 = vpop.f32.mrb[7].mxu1 }
 0x3b1   : > { %v2437_v1 = vadd.f32 %v4122_v12, %v2436_v46 }
 0x3b2   : > { %v2572_v55 = vadd.f32 %v2528_v62, %v2442_v63 }
 0x3b3   : > { %v2571_v2 = vadd.f32 %v2526_v0, %v2437_v1 }
 0x3b4   : > { %2588 = vst.msk [vmem:[%s4130_s25 + $0x38] sm:$0xff] %vm334_vm0, %v2572_v55 }
 0x3b5   : > { %2587 = vst.msk [vmem:[%s4130_s25 + $0x30] sm:$0xff] %vm334_vm0, %v2571_v2 }
 0x3cf   : > { %v2861_v45 = vpop.f32.mrb[8].mxu1 }
 0x3d0   : > { %v2452_v7 = vadd.f32 %v2861_v45, %v4122_v12  ;;  %v2446_v9 = vpop.f32.mrb[9].mxu1 }
 0x3d1   : > { %v2447_v34 = vadd.f32 %v4122_v12, %v2446_v9 }
 0x3d2   : > { %v2574_v11 = vadd.f32 %v2533_v13, %v2452_v7 }
 0x3d3   : > { %v2573_v14 = vadd.f32 %v2531_v10, %v2447_v34 }
 0x3d4   : > { %2590 = vst.msk [vmem:[%s4130_s25 + $0x48] sm:$0xff] %vm334_vm0, %v2574_v11 }
 0x3d5   : > { %2589 = vst.msk [vmem:[%s4130_s25 + $0x40] sm:$0xff] %vm334_vm0, %v2573_v14 }
 0x3ef   : > { %v2864_v21 = vpop.f32.mrb[10].mxu1 }
 0x3f0   : > { %v2462_v23 = vadd.f32 %v2864_v21, %v4122_v12  ;;  %v2456_v25 = vpop.f32.mrb[11].mxu1 }
 0x3f1   : > { %v2457_v27 = vadd.f32 %v4122_v12, %v2456_v25 }
 0x3f2   : > { %v2576_v28 = vadd.f32 %v2538_v22, %v2462_v23 }
 0x3f3   : > { %v2575_v29 = vadd.f32 %v2536_v26, %v2457_v27 }
 0x3f4   : > { %2592 = vst.msk [vmem:[%s4130_s25 + $0x58] sm:$0xff] %vm334_vm0, %v2576_v28 }
 0x3f5   : > { %2591 = vst.msk [vmem:[%s4130_s25 + $0x50] sm:$0xff] %vm334_vm0, %v2575_v29 }
 0x408   : > { %v2867_v35 = vpop.f32.mrb[12].mxu1 }
 0x409   : > { %v2472_v37 = vadd.f32 %v2867_v35, %v4122_v12  ;;  %v2466_v38 = vpop.f32.mrb[13].mxu1 }
 0x40a   : > { %v2467_v39 = vadd.f32 %v4122_v12, %v2466_v38 }
 0x40b   : > { %v2578_v40 = vadd.f32 %v2543_v36, %v2472_v37 }
 0x40c   : > { %v2577_v42 = vadd.f32 %v2541_v54, %v2467_v39 }
 0x40d   : > { %2594 = vst.msk [vmem:[%s4130_s25 + $0x68] sm:$0xff] %vm334_vm0, %v2578_v40 }
 0x40e   : > { %2593 = vst.msk [vmem:[%s4130_s25 + $0x60] sm:$0xff] %vm334_vm0, %v2577_v42 }
 0x41b   : > { %v2870_v52 = vpop.f32.mrb[14].mxu1 }
 0x41c   : > { %v2482_v56 = vadd.f32 %v2870_v52, %v4122_v12  ;;  %v2476_v57 = vpop.f32.mrb[15].mxu1 }
 0x41d   : > { %v2477_v59 = vadd.f32 %v4122_v12, %v2476_v57 }
 0x41e   : > { %v2580_v60 = vadd.f32 %v2548_v53, %v2482_v56 }
 0x41f   : > { %v2579_v61 = vadd.f32 %v2546_v58, %v2477_v59 }
 0x420   : > { %2596 = vst.msk [vmem:[%s4130_s25 + $0x78] sm:$0xff] %vm334_vm0, %v2580_v60 }
 0x421   : > { %2595 = vst.msk [vmem:[%s4130_s25 + $0x70] sm:$0xff] %vm334_vm0, %v2579_v61 }
 0x422 PF: > { %s15_s22 = sadd.s32 1, %s3001_s22   ;;  %s4235_s18 = smov %s2993_s20 }
 0x423   : > { %p12_p8 = scmp.ge.s32.totalorder %s15_s22, 6   ;;  %s4236_s19 = smov %s2997_s21 }
 0x424   : > { %s4237_s20 = smov %s4240_s23  ;;  %s4238_s21 = smov %s4244_s24 }
 0x425   :  { %14 = sbr.rel (!%p12_p8) target bundleno = 3 (0x3), region = 70 }

</bundles_post_ra>
